<compile_context>
chip_gen: v7x
topology: tpu7x:2x2x1
jax: 0.10.0
libtpu: 0.0.40
codegen_flags: <defaults>
</compile_context>

<pallas_src>
import jax
import jax.numpy as jnp
from jax import lax
from jax.experimental import pallas as pl
from jax.experimental.pallas import tpu as pltpu

C = 1024           # channels (fixed by the module)
G = 32             # groups of conv2d41
CG = C // G        # 32 channels per group
N, H, W = 1, 14, 14
P = N * H * W      # 196 spatial rows
EPS = 1e-5

TILE = 128         # output-channel tile per grid step (4 whole groups)
NT = C // TILE     # 8 grid steps
GPT = TILE // CG   # groups per tile = 4
OFF = W + 1        # top zero-padding rows for the flattened 3x3 window trick
R = P + 2 * OFF    # padded row count = 226


# --------------------- fused kernel: relu->1x1->BN->relu->grouped 3x3 ---------
def _fused_kernel(x_ref, w1_ref, g_ref, b_ref, w2_ref, o_ref, zpad_ref):
    # x_ref : (P, C)    f32   full activations (resident across grid)
    # w1_ref: (C, TILE) bf16  1x1-conv weight slice
    # g_ref : (1, TILE) f32   BN gamma
    # b_ref : (1, TILE) f32   BN beta
    # w2_ref: (9, TILE, TILE) bf16 compact block-diagonal grouped 3x3 weights
    # o_ref : (P, TILE) f32   output slice
    # zpad_ref: (R, TILE) bf16 scratch (zero-padded, spatially-flattened z)

    x = jnp.maximum(x_ref[...], 0.0).astype(jnp.bfloat16)              # relu34
    y = jnp.dot(x, w1_ref[...], preferred_element_type=jnp.float32)    # conv2d40 (1x1)

    mean = jnp.mean(y, axis=0, keepdims=True)                          # batch stats
    var = jnp.mean(jnp.square(y - mean), axis=0, keepdims=True)        # biased variance
    z = (y - mean) * lax.rsqrt(var + EPS) * g_ref[...] + b_ref[...]    # batchnorm2d40
    z = jnp.maximum(z, 0.0).astype(jnp.bfloat16)                       # relu37

    # zero-padded flattened copy for the 9-tap window reads
    zpad_ref[...] = jnp.zeros_like(zpad_ref)
    zpad_ref[pl.ds(OFF, P), :] = z

    # column masks depend only on kw -> hoisted (2 masked multiplies total)
    wpos = lax.broadcasted_iota(jnp.int32, (P, 1), 0) % W
    mask_l = (wpos >= 1).astype(jnp.float32)       # taps reading column ow-1
    mask_r = (wpos <= W - 2).astype(jnp.float32)   # taps reading column ow+1

    acc = jnp.zeros((P, TILE), jnp.float32)
    for kwi in range(3):
        part = jnp.zeros((P, TILE), jnp.float32)
        for khi in range(3):
            start = khi * W + kwi                  # static flat shift of this tap
            win = zpad_ref[pl.ds(start, P), :]
            part = part + jnp.dot(win, w2_ref[khi * 3 + kwi],
                                  preferred_element_type=jnp.float32)
        if kwi == 0:
            part = part * mask_l
        elif kwi == 2:
            part = part * mask_r
        acc = acc + part
    o_ref[...] = acc                                                    # conv2d41


def fused_forward_2d(x2d, w1_mat, gamma, beta, w2c):
    return pl.pallas_call(
        _fused_kernel,
        out_shape=jax.ShapeDtypeStruct((P, C), jnp.float32),
        grid_spec=pltpu.PrefetchScalarGridSpec(
            num_scalar_prefetch=0,
            grid=(NT,),
            in_specs=[pl.BlockSpec((P, C), lambda j: (0, 0)),
                      pl.BlockSpec((C, TILE), lambda j: (0, j)),
                      pl.BlockSpec((1, TILE), lambda j: (0, j)),
                      pl.BlockSpec((1, TILE), lambda j: (0, j)),
                      pl.BlockSpec((9, TILE, TILE), lambda j: (j, 0, 0))],
            out_specs=pl.BlockSpec((P, TILE), lambda j: (0, j)),
            scratch_shapes=[pltpu.VMEM((R, TILE), jnp.bfloat16)]),
        compiler_params=pltpu.CompilerParams(
            dimension_semantics=("parallel",)),
    )(x2d, w1_mat, gamma, beta, w2c)


# --------------------------- wrapper / weight prep ----------------------------
def build_compact_w2(w2):
    # w2: (C_out=1024, CG=32, 3, 3). Tile j of 128 output channels spans groups
    # [4j, 4j+4), which read exactly the 128 input channels of the same tile.
    # -> compact per-tile block-diagonal weights, shape (NT*9, TILE, TILE).
    w2g = w2.reshape(G, CG, CG, 3, 3)                         # (g, o_loc, i_loc, kh, kw)
    blocks = jnp.transpose(w2g, (3, 4, 0, 2, 1)).reshape(9, G, CG, CG)   # (t, g, i, o)
    blocks = blocks.reshape(9, NT, GPT, CG, CG)               # (t, n, g, i, o)
    eye = jnp.eye(GPT, dtype=w2.dtype)
    wc = jnp.einsum('tngio,gh->tngiho', blocks, eye)          # (t, n, g, i, h, o)
    wc = wc.reshape(9, NT, TILE, TILE)
    wc = jnp.transpose(wc, (1, 0, 2, 3)).reshape(NT * 9, TILE, TILE)     # tile-major
    return wc.astype(jnp.bfloat16)


def forward(x_nchw, w1, w2, gamma, beta):
    # x_nchw: (N, C, H, W) float32 — same layout the PyTorch module consumes.
    x2d = jnp.transpose(x_nchw, (0, 2, 3, 1)).reshape(P, C)
    w1_mat = jnp.transpose(w1.reshape(C, C)).astype(jnp.bfloat16)   # (Cin, Cout)
    w2c = build_compact_w2(w2)
    y2d = fused_forward_2d(x2d, w1_mat, gamma.reshape(1, C).astype(jnp.float32),
                           beta.reshape(1, C).astype(jnp.float32), w2c)
    return jnp.transpose(y2d.reshape(N, H, W, C), (0, 3, 1, 2))


# ----------------------------- pure-JAX reference ----------------------------
def reference(x, w1, w2, gamma, beta):
    x130 = jnp.maximum(x, 0.0)
    x131 = lax.conv_general_dilated(x130, w1, (1, 1), 'VALID',
                                    dimension_numbers=('NCHW', 'OIHW', 'NCHW'),
                                    precision=lax.Precision.HIGHEST)
    mean = jnp.mean(x131, axis=(0, 2, 3), keepdims=True)
    var = jnp.var(x131, axis=(0, 2, 3), keepdims=True)
    x132 = ((x131 - mean) * lax.rsqrt(var + EPS) * gamma[None, :, None, None]
            + beta[None, :, None, None])
    x133 = jnp.maximum(x132, 0.0)
    x134 = lax.conv_general_dilated(x133, w2, (1, 1), ((1, 1), (1, 1)),
                                    dimension_numbers=('NCHW', 'OIHW', 'NCHW'),
                                    feature_group_count=G,
                                    precision=lax.Precision.HIGHEST)
    return x134


if __name__ == "__main__":
    key = jax.random.PRNGKey(0)
    kx, k1, k2, kg, kb = jax.random.split(key, 5)
    x = jax.random.normal(kx, (N, C, H, W), jnp.float32)
    w1 = jax.random.normal(k1, (C, C, 1, 1), jnp.float32) / jnp.sqrt(float(C))
    w2 = jax.random.normal(k2, (C, CG, 3, 3), jnp.float32) / jnp.sqrt(9.0 * CG)
    gamma = 1.0 + 0.1 * jax.random.normal(kg, (C,), jnp.float32)
    beta = 0.1 * jax.random.normal(kb, (C,), jnp.float32)

    out = jax.jit(forward)(x, w1, w2, gamma, beta)
    out = jax.block_until_ready(out)

    ref = reference(x, w1, w2, gamma, beta)
    assert out.shape == (N, C, H, W) and out.dtype == jnp.float32
    ok = bool(jnp.all(jnp.isfinite(out))) and bool(
        jnp.all(jnp.abs(out - ref) <= 2e-2 + 2e-2 * jnp.abs(ref)))
    if not ok:
        raise SystemExit(
            f"mismatch: max abs err = {float(jnp.max(jnp.abs(out - ref)))}")
    # TODO(synk): BatchNorm2d running_mean/running_var momentum updates are a
    # training-state side effect and do not affect this forward output; not modeled.
    print("KERNEL_OK")
</pallas_src>

<mosaic_0001>
module attributes {stable_mosaic.version = 11 : i64} {
  func.func @_fused_kernel(%arg0: i32, %arg1: memref<196x1024xf32, #tpu.memory_space<vmem>>, %arg2: memref<1024x128xbf16, #tpu.memory_space<vmem>>, %arg3: memref<1x128xf32, #tpu.memory_space<vmem>>, %arg4: memref<1x128xf32, #tpu.memory_space<vmem>>, %arg5: memref<9x128x128xbf16, #tpu.memory_space<vmem>>, %arg6: memref<196x128xf32, #tpu.memory_space<vmem>>, %arg7: memref<226x128xbf16, #tpu.memory_space<vmem>>) attributes {dimension_semantics = [#tpu.dimension_semantics<parallel>], iteration_bounds = array<i64: 8>, scalar_prefetch = 0 : i64, scratch_operands = 1 : i64, tpu.core_type = #tpu.core_type<tc>, window_params = [{pipeline_mode = #tpu.pipeline_mode<synchronous>, transform_indices = @transform_0, window_bounds = array<i64: 196, 1024>}, {transform_indices = @transform_1, window_bounds = array<i64: 1024, 128>}, {transform_indices = @transform_2, window_bounds = array<i64: 1, 128>}, {transform_indices = @transform_3, window_bounds = array<i64: 1, 128>}, {transform_indices = @transform_4, window_bounds = array<i64: 9, 128, 128>}, {transform_indices = @transform_5, window_bounds = array<i64: 196, 128>}]} {
    %c0 = arith.constant 0 : index
    %c0_0 = arith.constant 0 : index
    %0 = vector.load %arg1[%c0, %c0_0] : memref<196x1024xf32, #tpu.memory_space<vmem>>, vector<196x1024xf32>
    %cst = arith.constant 0.000000e+00 : f32
    %1 = vector.broadcast %cst : f32 to vector<196x1024xf32>
    %2 = arith.maximumf %0, %1 : vector<196x1024xf32>
    %3 = arith.truncf %2 : vector<196x1024xf32> to vector<196x1024xbf16>
    %c0_1 = arith.constant 0 : index
    %c0_2 = arith.constant 0 : index
    %4 = vector.load %arg2[%c0_1, %c0_2] : memref<1024x128xbf16, #tpu.memory_space<vmem>>, vector<1024x128xbf16>
    %cst_3 = arith.constant dense<0.000000e+00> : vector<196x128xf32>
    %5 = tpu.matmul %3, %4, %cst_3 {dimension_numbers = #tpu.dot_dimension_numbers<[1], [0], [0], [1], [0, 0, 1, 1], [], []>} : vector<196x1024xbf16>, vector<1024x128xbf16>, vector<196x128xf32> -> vector<196x128xf32>
    %cst_4 = arith.constant dense<0.000000e+00> : vector<128xf32>
    %6 = vector.multi_reduction <add>, %5, %cst_4 [0] : vector<196x128xf32> to vector<128xf32>
    %7 = vector.shape_cast %6 : vector<128xf32> to vector<1x128xf32>
    %cst_5 = arith.constant 1.960000e+02 : f32
    %8 = vector.broadcast %cst_5 : f32 to vector<1x128xf32>
    %9 = arith.divf %7, %8 : vector<1x128xf32>
    %10 = vector.broadcast %9 : vector<1x128xf32> to vector<196x128xf32>
    %11 = arith.subf %5, %10 : vector<196x128xf32>
    %12 = arith.mulf %11, %11 : vector<196x128xf32>
    %cst_6 = arith.constant dense<0.000000e+00> : vector<128xf32>
    %13 = vector.multi_reduction <add>, %12, %cst_6 [0] : vector<196x128xf32> to vector<128xf32>
    %14 = vector.shape_cast %13 : vector<128xf32> to vector<1x128xf32>
    %cst_7 = arith.constant 1.960000e+02 : f32
    %15 = vector.broadcast %cst_7 : f32 to vector<1x128xf32>
    %16 = arith.divf %14, %15 : vector<1x128xf32>
    %17 = vector.broadcast %9 : vector<1x128xf32> to vector<196x128xf32>
    %18 = arith.subf %5, %17 : vector<196x128xf32>
    %cst_8 = arith.constant 9.99999974E-6 : f32
    %19 = vector.broadcast %cst_8 : f32 to vector<1x128xf32>
    %20 = arith.addf %16, %19 : vector<1x128xf32>
    %21 = math.rsqrt %20 : vector<1x128xf32>
    %22 = vector.broadcast %21 : vector<1x128xf32> to vector<196x128xf32>
    %23 = arith.mulf %18, %22 : vector<196x128xf32>
    %c0_9 = arith.constant 0 : index
    %c0_10 = arith.constant 0 : index
    %24 = vector.load %arg3[%c0_9, %c0_10] : memref<1x128xf32, #tpu.memory_space<vmem>>, vector<1x128xf32>
    %25 = vector.broadcast %24 : vector<1x128xf32> to vector<196x128xf32>
    %26 = arith.mulf %23, %25 : vector<196x128xf32>
    %c0_11 = arith.constant 0 : index
    %c0_12 = arith.constant 0 : index
    %27 = vector.load %arg4[%c0_11, %c0_12] : memref<1x128xf32, #tpu.memory_space<vmem>>, vector<1x128xf32>
    %28 = vector.broadcast %27 : vector<1x128xf32> to vector<196x128xf32>
    %29 = arith.addf %26, %28 : vector<196x128xf32>
    %cst_13 = arith.constant 0.000000e+00 : f32
    %30 = vector.broadcast %cst_13 : f32 to vector<196x128xf32>
    %31 = arith.maximumf %29, %30 : vector<196x128xf32>
    %32 = arith.truncf %31 : vector<196x128xf32> to vector<196x128xbf16>
    %cst_14 = arith.constant 0.000000e+00 : bf16
    %33 = vector.broadcast %cst_14 : bf16 to vector<226x128xbf16>
    %c0_15 = arith.constant 0 : index
    %c0_16 = arith.constant 0 : index
    %34 = vector.load %arg7[%c0_15, %c0_16] : memref<226x128xbf16, #tpu.memory_space<vmem>>, vector<226x128xbf16>
    tpu.vector_store %arg7[%c0_15, %c0_16], %33 {strides = array<i32>} : memref<226x128xbf16, #tpu.memory_space<vmem>>, vector<226x128xbf16>,
    %c15 = arith.constant 15 : index
    %c0_17 = arith.constant 0 : index
    %35 = vector.load %arg7[%c15, %c0_17] : memref<226x128xbf16, #tpu.memory_space<vmem>>, vector<196x128xbf16>
    tpu.vector_store %arg7[%c15, %c0_17], %32 {strides = array<i32>} : memref<226x128xbf16, #tpu.memory_space<vmem>>, vector<196x128xbf16>,
    %36 = tpu.iota {dimensions = array<i32: 0>} : vector<196x1xi32>
    %c14_i32 = arith.constant 14 : i32
    %c0_i32 = arith.constant 0 : i32
    %37 = arith.cmpi eq, %c14_i32, %c0_i32 : i32
    %c1_i32 = arith.constant 1 : i32
    %38 = arith.select %37, %c1_i32, %c14_i32 : i32
    %39 = vector.broadcast %38 : i32 to vector<196x1xi32>
    %40 = arith.remsi %36, %39 : vector<196x1xi32>
    %c0_i32_18 = arith.constant 0 : i32
    %41 = vector.broadcast %c0_i32_18 : i32 to vector<196x1xi32>
    %42 = arith.cmpi ne, %40, %41 : vector<196x1xi32>
    %c0_i32_19 = arith.constant 0 : i32
    %43 = vector.broadcast %c0_i32_19 : i32 to vector<196x1xi32>
    %44 = arith.cmpi slt, %40, %43 : vector<196x1xi32>
    %c0_i32_20 = arith.constant 0 : i32
    %45 = arith.cmpi slt, %38, %c0_i32_20 : i32
    %46 = vector.broadcast %45 : i1 to vector<196x1xi1>
    %47 = vector.broadcast %46 : vector<196x1xi1> to vector<196x1xi1>
    %48 = arith.xori %44, %47 : vector<196x1xi1>
    %49 = arith.andi %48, %42 : vector<196x1xi1>
    %50 = vector.broadcast %38 : i32 to vector<196x1xi32>
    %51 = arith.addi %40, %50 : vector<196x1xi32>
    %52 = arith.select %49, %51, %40 : vector<196x1xi1>, vector<196x1xi32>
    %c1_i32_21 = arith.constant 1 : i32
    %53 = vector.broadcast %c1_i32_21 : i32 to vector<196x1xi32>
    %54 = arith.cmpi sge, %52, %53 : vector<196x1xi32>
    %55 = arith.extui %54 : vector<196x1xi1> to vector<196x1xi32>
    %56 = arith.sitofp %55 : vector<196x1xi32> to vector<196x1xf32>
    %c12_i32 = arith.constant 12 : i32
    %57 = vector.broadcast %c12_i32 : i32 to vector<196x1xi32>
    %58 = arith.cmpi sle, %52, %57 : vector<196x1xi32>
    %59 = arith.extui %58 : vector<196x1xi1> to vector<196x1xi32>
    %60 = arith.sitofp %59 : vector<196x1xi32> to vector<196x1xf32>
    %cst_22 = arith.constant 0.000000e+00 : f32
    %61 = vector.broadcast %cst_22 : f32 to vector<196x128xf32>
    %cst_23 = arith.constant 0.000000e+00 : f32
    %62 = vector.broadcast %cst_23 : f32 to vector<196x128xf32>
    %c0_24 = arith.constant 0 : index
    %c0_25 = arith.constant 0 : index
    %63 = vector.load %arg7[%c0_24, %c0_25] : memref<226x128xbf16, #tpu.memory_space<vmem>>, vector<196x128xbf16>
    %c0_26 = arith.constant 0 : index
    %c0_27 = arith.constant 0 : index
    %c0_28 = arith.constant 0 : index
    %64 = vector.load %arg5[%c0_26, %c0_27, %c0_28] : memref<9x128x128xbf16, #tpu.memory_space<vmem>>, vector<1x128x128xbf16>
    %65 = vector.shape_cast %64 : vector<1x128x128xbf16> to vector<128x128xbf16>
    %cst_29 = arith.constant dense<0.000000e+00> : vector<196x128xf32>
    %66 = tpu.matmul %63, %65, %cst_29 {dimension_numbers = #tpu.dot_dimension_numbers<[1], [0], [0], [1], [0, 0, 1, 1], [], []>} : vector<196x128xbf16>, vector<128x128xbf16>, vector<196x128xf32> -> vector<196x128xf32>
    %67 = arith.addf %62, %66 : vector<196x128xf32>
    %c14 = arith.constant 14 : index
    %c0_30 = arith.constant 0 : index
    %68 = vector.load %arg7[%c14, %c0_30] : memref<226x128xbf16, #tpu.memory_space<vmem>>, vector<196x128xbf16>
    %c3 = arith.constant 3 : index
    %c0_31 = arith.constant 0 : index
    %c0_32 = arith.constant 0 : index
    %69 = vector.load %arg5[%c3, %c0_31, %c0_32] : memref<9x128x128xbf16, #tpu.memory_space<vmem>>, vector<1x128x128xbf16>
    %70 = vector.shape_cast %69 : vector<1x128x128xbf16> to vector<128x128xbf16>
    %cst_33 = arith.constant dense<0.000000e+00> : vector<196x128xf32>
    %71 = tpu.matmul %68, %70, %cst_33 {dimension_numbers = #tpu.dot_dimension_numbers<[1], [0], [0], [1], [0, 0, 1, 1], [], []>} : vector<196x128xbf16>, vector<128x128xbf16>, vector<196x128xf32> -> vector<196x128xf32>
    %72 = arith.addf %67, %71 : vector<196x128xf32>
    %c28 = arith.constant 28 : index
    %c0_34 = arith.constant 0 : index
    %73 = vector.load %arg7[%c28, %c0_34] : memref<226x128xbf16, #tpu.memory_space<vmem>>, vector<196x128xbf16>
    %c6 = arith.constant 6 : index
    %c0_35 = arith.constant 0 : index
    %c0_36 = arith.constant 0 : index
    %74 = vector.load %arg5[%c6, %c0_35, %c0_36] : memref<9x128x128xbf16, #tpu.memory_space<vmem>>, vector<1x128x128xbf16>
    %75 = vector.shape_cast %74 : vector<1x128x128xbf16> to vector<128x128xbf16>
    %cst_37 = arith.constant dense<0.000000e+00> : vector<196x128xf32>
    %76 = tpu.matmul %73, %75, %cst_37 {dimension_numbers = #tpu.dot_dimension_numbers<[1], [0], [0], [1], [0, 0, 1, 1], [], []>} : vector<196x128xbf16>, vector<128x128xbf16>, vector<196x128xf32> -> vector<196x128xf32>
    %77 = arith.addf %72, %76 : vector<196x128xf32>
    %78 = vector.broadcast %56 : vector<196x1xf32> to vector<196x128xf32>
    %79 = arith.mulf %77, %78 : vector<196x128xf32>
    %80 = arith.addf %61, %79 : vector<196x128xf32>
    %cst_38 = arith.constant 0.000000e+00 : f32
    %81 = vector.broadcast %cst_38 : f32 to vector<196x128xf32>
    %c1 = arith.constant 1 : index
    %c0_39 = arith.constant 0 : index
    %82 = vector.load %arg7[%c1, %c0_39] : memref<226x128xbf16, #tpu.memory_space<vmem>>, vector<196x128xbf16>
    %c1_40 = arith.constant 1 : index
    %c0_41 = arith.constant 0 : index
    %c0_42 = arith.constant 0 : index
    %83 = vector.load %arg5[%c1_40, %c0_41, %c0_42] : memref<9x128x128xbf16, #tpu.memory_space<vmem>>, vector<1x128x128xbf16>
    %84 = vector.shape_cast %83 : vector<1x128x128xbf16> to vector<128x128xbf16>
    %cst_43 = arith.constant dense<0.000000e+00> : vector<196x128xf32>
    %85 = tpu.matmul %82, %84, %cst_43 {dimension_numbers = #tpu.dot_dimension_numbers<[1], [0], [0], [1], [0, 0, 1, 1], [], []>} : vector<196x128xbf16>, vector<128x128xbf16>, vector<196x128xf32> -> vector<196x128xf32>
    %86 = arith.addf %81, %85 : vector<196x128xf32>
    %c15_44 = arith.constant 15 : index
    %c0_45 = arith.constant 0 : index
    %87 = vector.load %arg7[%c15_44, %c0_45] : memref<226x128xbf16, #tpu.memory_space<vmem>>, vector<196x128xbf16>
    %c4 = arith.constant 4 : index
    %c0_46 = arith.constant 0 : index
    %c0_47 = arith.constant 0 : index
    %88 = vector.load %arg5[%c4, %c0_46, %c0_47] : memref<9x128x128xbf16, #tpu.memory_space<vmem>>, vector<1x128x128xbf16>
    %89 = vector.shape_cast %88 : vector<1x128x128xbf16> to vector<128x128xbf16>
    %cst_48 = arith.constant dense<0.000000e+00> : vector<196x128xf32>
    %90 = tpu.matmul %87, %89, %cst_48 {dimension_numbers = #tpu.dot_dimension_numbers<[1], [0], [0], [1], [0, 0, 1, 1], [], []>} : vector<196x128xbf16>, vector<128x128xbf16>, vector<196x128xf32> -> vector<196x128xf32>
    %91 = arith.addf %86, %90 : vector<196x128xf32>
    %c29 = arith.constant 29 : index
    %c0_49 = arith.constant 0 : index
    %92 = vector.load %arg7[%c29, %c0_49] : memref<226x128xbf16, #tpu.memory_space<vmem>>, vector<196x128xbf16>
    %c7 = arith.constant 7 : index
    %c0_50 = arith.constant 0 : index
    %c0_51 = arith.constant 0 : index
    %93 = vector.load %arg5[%c7, %c0_50, %c0_51] : memref<9x128x128xbf16, #tpu.memory_space<vmem>>, vector<1x128x128xbf16>
    %94 = vector.shape_cast %93 : vector<1x128x128xbf16> to vector<128x128xbf16>
    %cst_52 = arith.constant dense<0.000000e+00> : vector<196x128xf32>
    %95 = tpu.matmul %92, %94, %cst_52 {dimension_numbers = #tpu.dot_dimension_numbers<[1], [0], [0], [1], [0, 0, 1, 1], [], []>} : vector<196x128xbf16>, vector<128x128xbf16>, vector<196x128xf32> -> vector<196x128xf32>
    %96 = arith.addf %91, %95 : vector<196x128xf32>
    %97 = arith.addf %80, %96 : vector<196x128xf32>
    %cst_53 = arith.constant 0.000000e+00 : f32
    %98 = vector.broadcast %cst_53 : f32 to vector<196x128xf32>
    %c2 = arith.constant 2 : index
    %c0_54 = arith.constant 0 : index
    %99 = vector.load %arg7[%c2, %c0_54] : memref<226x128xbf16, #tpu.memory_space<vmem>>, vector<196x128xbf16>
    %c2_55 = arith.constant 2 : index
    %c0_56 = arith.constant 0 : index
    %c0_57 = arith.constant 0 : index
    %100 = vector.load %arg5[%c2_55, %c0_56, %c0_57] : memref<9x128x128xbf16, #tpu.memory_space<vmem>>, vector<1x128x128xbf16>
    %101 = vector.shape_cast %100 : vector<1x128x128xbf16> to vector<128x128xbf16>
    %cst_58 = arith.constant dense<0.000000e+00> : vector<196x128xf32>
    %102 = tpu.matmul %99, %101, %cst_58 {dimension_numbers = #tpu.dot_dimension_numbers<[1], [0], [0], [1], [0, 0, 1, 1], [], []>} : vector<196x128xbf16>, vector<128x128xbf16>, vector<196x128xf32> -> vector<196x128xf32>
    %103 = arith.addf %98, %102 : vector<196x128xf32>
    %c16 = arith.constant 16 : index
    %c0_59 = arith.constant 0 : index
    %104 = vector.load %arg7[%c16, %c0_59] : memref<226x128xbf16, #tpu.memory_space<vmem>>, vector<196x128xbf16>
    %c5 = arith.constant 5 : index
    %c0_60 = arith.constant 0 : index
    %c0_61 = arith.constant 0 : index
    %105 = vector.load %arg5[%c5, %c0_60, %c0_61] : memref<9x128x128xbf16, #tpu.memory_space<vmem>>, vector<1x128x128xbf16>
    %106 = vector.shape_cast %105 : vector<1x128x128xbf16> to vector<128x128xbf16>
    %cst_62 = arith.constant dense<0.000000e+00> : vector<196x128xf32>
    %107 = tpu.matmul %104, %106, %cst_62 {dimension_numbers = #tpu.dot_dimension_numbers<[1], [0], [0], [1], [0, 0, 1, 1], [], []>} : vector<196x128xbf16>, vector<128x128xbf16>, vector<196x128xf32> -> vector<196x128xf32>
    %108 = arith.addf %103, %107 : vector<196x128xf32>
    %c30 = arith.constant 30 : index
    %c0_63 = arith.constant 0 : index
    %109 = vector.load %arg7[%c30, %c0_63] : memref<226x128xbf16, #tpu.memory_space<vmem>>, vector<196x128xbf16>
    %c8 = arith.constant 8 : index
    %c0_64 = arith.constant 0 : index
    %c0_65 = arith.constant 0 : index
    %110 = vector.load %arg5[%c8, %c0_64, %c0_65] : memref<9x128x128xbf16, #tpu.memory_space<vmem>>, vector<1x128x128xbf16>
    %111 = vector.shape_cast %110 : vector<1x128x128xbf16> to vector<128x128xbf16>
    %cst_66 = arith.constant dense<0.000000e+00> : vector<196x128xf32>
    %112 = tpu.matmul %109, %111, %cst_66 {dimension_numbers = #tpu.dot_dimension_numbers<[1], [0], [0], [1], [0, 0, 1, 1], [], []>} : vector<196x128xbf16>, vector<128x128xbf16>, vector<196x128xf32> -> vector<196x128xf32>
    %113 = arith.addf %108, %112 : vector<196x128xf32>
    %114 = vector.broadcast %60 : vector<196x1xf32> to vector<196x128xf32>
    %115 = arith.mulf %113, %114 : vector<196x128xf32>
    %116 = arith.addf %97, %115 : vector<196x128xf32>
    %c0_67 = arith.constant 0 : index
    %c0_68 = arith.constant 0 : index
    %117 = vector.load %arg6[%c0_67, %c0_68] : memref<196x128xf32, #tpu.memory_space<vmem>>, vector<196x128xf32>
    tpu.vector_store %arg6[%c0_67, %c0_68], %116 {strides = array<i32>} : memref<196x128xf32, #tpu.memory_space<vmem>>, vector<196x128xf32>,
    return
  }
  func.func @transform_0(%arg0: i32) -> (i32, i32) {
    %c0_i32 = arith.constant 0 : i32
    %c0_i32_0 = arith.constant 0 : i32
    %c0_i32_1 = arith.constant 0 : i32
    return %c0_i32, %c0_i32_0 : i32, i32
  }
  func.func @transform_1(%arg0: i32) -> (i32, i32) {
    %c0_i32 = arith.constant 0 : i32
    %c0_i32_0 = arith.constant 0 : i32
    return %c0_i32, %arg0 : i32, i32
  }
  func.func @transform_2(%arg0: i32) -> (i32, i32) {
    %c0_i32 = arith.constant 0 : i32
    %c0_i32_0 = arith.constant 0 : i32
    return %c0_i32, %arg0 : i32, i32
  }
  func.func @transform_3(%arg0: i32) -> (i32, i32) {
    %c0_i32 = arith.constant 0 : i32
    %c0_i32_0 = arith.constant 0 : i32
    return %c0_i32, %arg0 : i32, i32
  }
  func.func @transform_4(%arg0: i32) -> (i32, i32, i32) {
    %c0_i32 = arith.constant 0 : i32
    %c0_i32_0 = arith.constant 0 : i32
    %c0_i32_1 = arith.constant 0 : i32
    return %arg0, %c0_i32, %c0_i32_0 : i32, i32, i32
  }
  func.func @transform_5(%arg0: i32) -> (i32, i32) {
    %c0_i32 = arith.constant 0 : i32
    %c0_i32_0 = arith.constant 0 : i32
    return %c0_i32, %arg0 : i32, i32
  }
}

</mosaic_0001>

<bundles_post_ra>
// kernel: forward.1
= control target key start
LH: loop header
LB: loop body
LE: loop exit
PB: predicated region body
PF: predicated region fallthrough
CT: control target
= control target key end

     0   :  { %s8963_s18 = smov 0   ;;  %s8965_s19 = smov 0   ;;  %s12431_s0 = inlined_call_operand.vmem [shape: f32[196,1024], index: 0, kind: input, shape index: {}]   ;;  %s12432_s1 = inlined_call_operand.vmem [shape: bf16[1024,1024], index: 1, kind: input, shape index: {}]   ;;  %s12433_s2 = inlined_call_operand.vmem [shape: f32[1,1024], index: 2, kind: input, shape index: {}]   ;;  %s12434_s3 = inlined_call_operand.vmem [shape: f32[1,1024], index: 3, kind: input, shape index: {}]   ;;  %s12435_s4 = inlined_call_operand.vmem [shape: bf16[72,128,128], index: 4, kind: input, shape index: {}]   ;;  %s12436_s5 = inlined_call_operand.vmem [shape: f32[196,1024], index: 5, kind: output, shape index: {}]  }
   0x1   :  { %s8967_s20 = smov 0  }
   0x2 LB: > { %s8979_s21 = sadd.s32 4294967295, %s8928_s20   ;;  %s8982_s22 = sadd.s32 1, %s8928_s20   ;;  %s8928_s20 = sphi %s8967_s20, %s12572_s20   ;;  %s8924_s19 = sphi %s8965_s19, %s12571_s19   ;;  %s8920_s18 = sphi %s8963_s18, %s12570_s18  }
   0x3   : > { %s40_s23 = ssub.s32 %s8928_s20, %s8982_s22  ;;  %s43_s24 = sadd.s32 1, %s8924_s19 }
   0x4   : > { %p41_p0 = scmp.eq.s32.totalorder %s40_s23, 0  ;;  %p50_p1 = scmp.ne.s32.totalorder %s8924_s19, %s8920_s18 }
   0x5   : > { %p51_p2 = scmp.eq.s32.totalorder %s8928_s20, 0  ;;  %p158_p3 = scmp.eq.s32.totalorder %s8979_s21, 7 }
   0x6   : > { %s8992_s25 = scalar_select %p41_p0, %s8924_s19, %s43_s24  }
   0x7   : > { %p52_p4 = por %p51_p2, %p50_p1  ;;  %p8994_p5 = por %p158_p3, %p50_p1 }
   0x8   : > { %p6800_p6 = scmp.ge.s32.totalorder %s8928_s20, 8 }
   0xa   : > { %183 = sbr.rel (%p6800_p6) target bundleno = 149 (0x95), region = 20 }
  0x11   : > { %186 = sbr.rel (!%p52_p4) target bundleno = 149 (0x95), region = 24  ;;  %s188_s27 = sand.u32 (%p52_p4), 1, %s8924_s19  }
  0x12   : > { %s6802_s28 = sshll.u32 (%p52_p4), %s8928_s20, 2  ;;  %s6801_s29 = sshll.u32 (%p52_p4), %s188_s27, 9 }
  0x13   : > { %s9004_s7 = scalar_lea.vmem (%p52_p4), %s12432_s1, %s6802_s28  ;;  %s9008_s8 = scalar_lea.vmem (%p52_p4), [#allocation3], %s6801_s29 }
  0x14   : > { %v208_v0 = vld [vmem:[%s9004_s7] sm:$0xf] (%p52_p4) }
  0x15   : > { %v210_v1 = vld [vmem:[%s9004_s7 + $0x20] sm:$0xf] (%p52_p4)  ;;  %209 = vst [vmem:[%s9008_s8] sm:$0xf] (%p52_p4), %v208_v0 }
  0x16   : > { %211 = vst [vmem:[%s9008_s8 + $0x4] sm:$0xf] (%p52_p4), %v210_v1  ;;  %v212_v2 = vld [vmem:[%s9004_s7 + $0x40] sm:$0xf] (%p52_p4) }
  0x17   : > { %v214_v3 = vld [vmem:[%s9004_s7 + $0x60] sm:$0xf] (%p52_p4)  ;;  %213 = vst [vmem:[%s9008_s8 + $0x8] sm:$0xf] (%p52_p4), %v212_v2 }
  0x18   : > { %v216_v4 = vld [vmem:[%s9004_s7 + $0x80] sm:$0xf]  ;;  %215 = vst [vmem:[%s9008_s8 + $0xc] sm:$0xf] %v214_v3 }
  0x19   : > { %217 = vst [vmem:[%s9008_s8 + $0x10] sm:$0xf] %v216_v4  ;;  %v218_v5 = vld [vmem:[%s9004_s7 + $0xa0] sm:$0xf] }
  0x1a   : > { %v220_v6 = vld [vmem:[%s9004_s7 + $0xc0] sm:$0xf]  ;;  %219 = vst [vmem:[%s9008_s8 + $0x14] sm:$0xf] %v218_v5 }
  0x1b   : > { %v222_v7 = vld [vmem:[%s9004_s7 + $0xe0] sm:$0xf]  ;;  %221 = vst [vmem:[%s9008_s8 + $0x18] sm:$0xf] %v220_v6 }
  0x1c   : > { %223 = vst [vmem:[%s9008_s8 + $0x1c] sm:$0xf] %v222_v7  ;;  %v224_v8 = vld [vmem:[%s9004_s7 + $0x100] sm:$0xf] }
  0x1d   : > { %v226_v9 = vld [vmem:[%s9004_s7 + $0x120] sm:$0xf]  ;;  %225 = vst [vmem:[%s9008_s8 + $0x20] sm:$0xf] %v224_v8 }
  0x1e   : > { %v228_v10 = vld [vmem:[%s9004_s7 + $0x140] sm:$0xf]  ;;  %227 = vst [vmem:[%s9008_s8 + $0x24] sm:$0xf] %v226_v9 }
  0x1f   : > { %229 = vst [vmem:[%s9008_s8 + $0x28] sm:$0xf] %v228_v10  ;;  %v230_v11 = vld [vmem:[%s9004_s7 + $0x160] sm:$0xf] }
  0x20   : > { %v232_v12 = vld [vmem:[%s9004_s7 + $0x180] sm:$0xf]  ;;  %231 = vst [vmem:[%s9008_s8 + $0x2c] sm:$0xf] %v230_v11 }
  0x21   : > { %v234_v13 = vld [vmem:[%s9004_s7 + $0x1a0] sm:$0xf]  ;;  %233 = vst [vmem:[%s9008_s8 + $0x30] sm:$0xf] %v232_v12 }
  0x22   : > { %235 = vst [vmem:[%s9008_s8 + $0x34] sm:$0xf] %v234_v13  ;;  %v236_v14 = vld [vmem:[%s9004_s7 + $0x1c0] sm:$0xf] }
  0x23   : > { %v238_v15 = vld [vmem:[%s9004_s7 + $0x1e0] sm:$0xf]  ;;  %237 = vst [vmem:[%s9008_s8 + $0x38] sm:$0xf] %v236_v14 }
  0x24   : > { %v240_v16 = vld [vmem:[%s9004_s7 + $0x200] sm:$0xf]  ;;  %239 = vst [vmem:[%s9008_s8 + $0x3c] sm:$0xf] %v238_v15 }
  0x25   : > { %241 = vst [vmem:[%s9008_s8 + $0x40] sm:$0xf] %v240_v16  ;;  %v242_v17 = vld [vmem:[%s9004_s7 + $0x220] sm:$0xf] }
  0x26   : > { %v244_v18 = vld [vmem:[%s9004_s7 + $0x240] sm:$0xf]  ;;  %243 = vst [vmem:[%s9008_s8 + $0x44] sm:$0xf] %v242_v17 }
  0x27   : > { %v246_v19 = vld [vmem:[%s9004_s7 + $0x260] sm:$0xf]  ;;  %245 = vst [vmem:[%s9008_s8 + $0x48] sm:$0xf] %v244_v18 }
  0x28   : > { %247 = vst [vmem:[%s9008_s8 + $0x4c] sm:$0xf] %v246_v19  ;;  %v248_v20 = vld [vmem:[%s9004_s7 + $0x280] sm:$0xf] }
  0x29   : > { %v250_v21 = vld [vmem:[%s9004_s7 + $0x2a0] sm:$0xf]  ;;  %249 = vst [vmem:[%s9008_s8 + $0x50] sm:$0xf] %v248_v20 }
  0x2a   : > { %v252_v22 = vld [vmem:[%s9004_s7 + $0x2c0] sm:$0xf]  ;;  %251 = vst [vmem:[%s9008_s8 + $0x54] sm:$0xf] %v250_v21 }
  0x2b   : > { %253 = vst [vmem:[%s9008_s8 + $0x58] sm:$0xf] %v252_v22  ;;  %v254_v23 = vld [vmem:[%s9004_s7 + $0x2e0] sm:$0xf] }
  0x2c   : > { %v256_v24 = vld [vmem:[%s9004_s7 + $0x300] sm:$0xf]  ;;  %255 = vst [vmem:[%s9008_s8 + $0x5c] sm:$0xf] %v254_v23 }
  0x2d   : > { %v258_v25 = vld [vmem:[%s9004_s7 + $0x320] sm:$0xf]  ;;  %257 = vst [vmem:[%s9008_s8 + $0x60] sm:$0xf] %v256_v24 }
  0x2e   : > { %259 = vst [vmem:[%s9008_s8 + $0x64] sm:$0xf] %v258_v25  ;;  %v260_v26 = vld [vmem:[%s9004_s7 + $0x340] sm:$0xf] }
  0x2f   : > { %v262_v27 = vld [vmem:[%s9004_s7 + $0x360] sm:$0xf]  ;;  %261 = vst [vmem:[%s9008_s8 + $0x68] sm:$0xf] %v260_v26 }
  0x30   : > { %v264_v28 = vld [vmem:[%s9004_s7 + $0x380] sm:$0xf]  ;;  %263 = vst [vmem:[%s9008_s8 + $0x6c] sm:$0xf] %v262_v27 }
  0x31   : > { %265 = vst [vmem:[%s9008_s8 + $0x70] sm:$0xf] %v264_v28  ;;  %v266_v29 = vld [vmem:[%s9004_s7 + $0x3a0] sm:$0xf] }
  0x32   : > { %v268_v30 = vld [vmem:[%s9004_s7 + $0x3c0] sm:$0xf]  ;;  %267 = vst [vmem:[%s9008_s8 + $0x74] sm:$0xf] %v266_v29 }
  0x33   : > { %v270_v31 = vld [vmem:[%s9004_s7 + $0x3e0] sm:$0xf]  ;;  %269 = vst [vmem:[%s9008_s8 + $0x78] sm:$0xf] %v268_v30 }
  0x34   : > { %271 = vst [vmem:[%s9008_s8 + $0x7c] sm:$0xf] %v270_v31  ;;  %v272_v32 = vld [vmem:[%s9004_s7 + $0x400] sm:$0xf] }
  0x35   : > { %v274_v33 = vld [vmem:[%s9004_s7 + $0x420] sm:$0xf]  ;;  %273 = vst [vmem:[%s9008_s8 + $0x80] sm:$0xf] %v272_v32 }
  0x36   : > { %v276_v34 = vld [vmem:[%s9004_s7 + $0x440] sm:$0xf]  ;;  %275 = vst [vmem:[%s9008_s8 + $0x84] sm:$0xf] %v274_v33 }
  0x37   : > { %277 = vst [vmem:[%s9008_s8 + $0x88] sm:$0xf] %v276_v34  ;;  %v278_v35 = vld [vmem:[%s9004_s7 + $0x460] sm:$0xf] }
  0x38   : > { %v280_v36 = vld [vmem:[%s9004_s7 + $0x480] sm:$0xf]  ;;  %279 = vst [vmem:[%s9008_s8 + $0x8c] sm:$0xf] %v278_v35 }
  0x39   : > { %v282_v37 = vld [vmem:[%s9004_s7 + $0x4a0] sm:$0xf]  ;;  %281 = vst [vmem:[%s9008_s8 + $0x90] sm:$0xf] %v280_v36 }
  0x3a   : > { %283 = vst [vmem:[%s9008_s8 + $0x94] sm:$0xf] %v282_v37  ;;  %v284_v38 = vld [vmem:[%s9004_s7 + $0x4c0] sm:$0xf] }
  0x3b   : > { %v286_v39 = vld [vmem:[%s9004_s7 + $0x4e0] sm:$0xf]  ;;  %285 = vst [vmem:[%s9008_s8 + $0x98] sm:$0xf] %v284_v38 }
  0x3c   : > { %v288_v40 = vld [vmem:[%s9004_s7 + $0x500] sm:$0xf]  ;;  %287 = vst [vmem:[%s9008_s8 + $0x9c] sm:$0xf] %v286_v39 }
  0x3d   : > { %289 = vst [vmem:[%s9008_s8 + $0xa0] sm:$0xf] %v288_v40  ;;  %v290_v41 = vld [vmem:[%s9004_s7 + $0x520] sm:$0xf] }
  0x3e   : > { %v292_v42 = vld [vmem:[%s9004_s7 + $0x540] sm:$0xf]  ;;  %291 = vst [vmem:[%s9008_s8 + $0xa4] sm:$0xf] %v290_v41 }
  0x3f   : > { %v294_v43 = vld [vmem:[%s9004_s7 + $0x560] sm:$0xf]  ;;  %293 = vst [vmem:[%s9008_s8 + $0xa8] sm:$0xf] %v292_v42 }
  0x40   : > { %295 = vst [vmem:[%s9008_s8 + $0xac] sm:$0xf] %v294_v43  ;;  %v296_v44 = vld [vmem:[%s9004_s7 + $0x580] sm:$0xf] }
  0x41   : > { %v298_v45 = vld [vmem:[%s9004_s7 + $0x5a0] sm:$0xf]  ;;  %297 = vst [vmem:[%s9008_s8 + $0xb0] sm:$0xf] %v296_v44 }
  0x42   : > { %v300_v46 = vld [vmem:[%s9004_s7 + $0x5c0] sm:$0xf]  ;;  %299 = vst [vmem:[%s9008_s8 + $0xb4] sm:$0xf] %v298_v45 }
  0x43   : > { %301 = vst [vmem:[%s9008_s8 + $0xb8] sm:$0xf] %v300_v46  ;;  %v302_v47 = vld [vmem:[%s9004_s7 + $0x5e0] sm:$0xf] }
  0x44   : > { %v304_v48 = vld [vmem:[%s9004_s7 + $0x600] sm:$0xf]  ;;  %303 = vst [vmem:[%s9008_s8 + $0xbc] sm:$0xf] %v302_v47 }
  0x45   : > { %v306_v49 = vld [vmem:[%s9004_s7 + $0x620] sm:$0xf]  ;;  %305 = vst [vmem:[%s9008_s8 + $0xc0] sm:$0xf] %v304_v48 }
  0x46   : > { %307 = vst [vmem:[%s9008_s8 + $0xc4] sm:$0xf] %v306_v49  ;;  %v308_v50 = vld [vmem:[%s9004_s7 + $0x640] sm:$0xf] }
  0x47   : > { %v310_v51 = vld [vmem:[%s9004_s7 + $0x660] sm:$0xf]  ;;  %309 = vst [vmem:[%s9008_s8 + $0xc8] sm:$0xf] %v308_v50 }
  0x48   : > { %v312_v52 = vld [vmem:[%s9004_s7 + $0x680] sm:$0xf]  ;;  %311 = vst [vmem:[%s9008_s8 + $0xcc] sm:$0xf] %v310_v51 }
  0x49   : > { %313 = vst [vmem:[%s9008_s8 + $0xd0] sm:$0xf] %v312_v52  ;;  %v314_v53 = vld [vmem:[%s9004_s7 + $0x6a0] sm:$0xf] }
  0x4a   : > { %v316_v54 = vld [vmem:[%s9004_s7 + $0x6c0] sm:$0xf]  ;;  %315 = vst [vmem:[%s9008_s8 + $0xd4] sm:$0xf] %v314_v53 }
  0x4b   : > { %v318_v55 = vld [vmem:[%s9004_s7 + $0x6e0] sm:$0xf]  ;;  %317 = vst [vmem:[%s9008_s8 + $0xd8] sm:$0xf] %v316_v54 }
  0x4c   : > { %319 = vst [vmem:[%s9008_s8 + $0xdc] sm:$0xf] %v318_v55  ;;  %v320_v56 = vld [vmem:[%s9004_s7 + $0x700] sm:$0xf] }
  0x4d   : > { %v322_v57 = vld [vmem:[%s9004_s7 + $0x720] sm:$0xf]  ;;  %321 = vst [vmem:[%s9008_s8 + $0xe0] sm:$0xf] %v320_v56 }
  0x4e   : > { %v324_v58 = vld [vmem:[%s9004_s7 + $0x740] sm:$0xf]  ;;  %323 = vst [vmem:[%s9008_s8 + $0xe4] sm:$0xf] %v322_v57 }
  0x4f   : > { %325 = vst [vmem:[%s9008_s8 + $0xe8] sm:$0xf] %v324_v58  ;;  %v326_v59 = vld [vmem:[%s9004_s7 + $0x760] sm:$0xf] }
  0x50   : > { %v328_v60 = vld [vmem:[%s9004_s7 + $0x780] sm:$0xf]  ;;  %327 = vst [vmem:[%s9008_s8 + $0xec] sm:$0xf] %v326_v59 }
  0x51   : > { %v330_v61 = vld [vmem:[%s9004_s7 + $0x7a0] sm:$0xf]  ;;  %329 = vst [vmem:[%s9008_s8 + $0xf0] sm:$0xf] %v328_v60 }
  0x52   : > { %331 = vst [vmem:[%s9008_s8 + $0xf4] sm:$0xf] %v330_v61  ;;  %v332_v62 = vld [vmem:[%s9004_s7 + $0x7c0] sm:$0xf] }
  0x53   : > { %v334_v63 = vld [vmem:[%s9004_s7 + $0x7e0] sm:$0xf]  ;;  %333 = vst [vmem:[%s9008_s8 + $0xf8] sm:$0xf] %v332_v62 }
  0x54   : > { %v336_v0 = vld [vmem:[%s9004_s7 + $0x800] sm:$0xf]  ;;  %335 = vst [vmem:[%s9008_s8 + $0xfc] sm:$0xf] %v334_v63 }
  0x55   : > { %337 = vst [vmem:[%s9008_s8 + $0x100] sm:$0xf] %v336_v0  ;;  %v338_v1 = vld [vmem:[%s9004_s7 + $0x820] sm:$0xf] }
  0x56   : > { %v340_v2 = vld [vmem:[%s9004_s7 + $0x840] sm:$0xf]  ;;  %339 = vst [vmem:[%s9008_s8 + $0x104] sm:$0xf] %v338_v1 }
  0x57   : > { %v342_v3 = vld [vmem:[%s9004_s7 + $0x860] sm:$0xf]  ;;  %341 = vst [vmem:[%s9008_s8 + $0x108] sm:$0xf] %v340_v2 }
  0x58   : > { %343 = vst [vmem:[%s9008_s8 + $0x10c] sm:$0xf] %v342_v3  ;;  %v344_v4 = vld [vmem:[%s9004_s7 + $0x880] sm:$0xf] }
  0x59   : > { %v346_v5 = vld [vmem:[%s9004_s7 + $0x8a0] sm:$0xf]  ;;  %345 = vst [vmem:[%s9008_s8 + $0x110] sm:$0xf] %v344_v4 }
  0x5a   : > { %v348_v6 = vld [vmem:[%s9004_s7 + $0x8c0] sm:$0xf]  ;;  %347 = vst [vmem:[%s9008_s8 + $0x114] sm:$0xf] %v346_v5 }
  0x5b   : > { %349 = vst [vmem:[%s9008_s8 + $0x118] sm:$0xf] %v348_v6  ;;  %v350_v7 = vld [vmem:[%s9004_s7 + $0x8e0] sm:$0xf] }
  0x5c   : > { %v352_v8 = vld [vmem:[%s9004_s7 + $0x900] sm:$0xf]  ;;  %351 = vst [vmem:[%s9008_s8 + $0x11c] sm:$0xf] %v350_v7 }
  0x5d   : > { %v354_v9 = vld [vmem:[%s9004_s7 + $0x920] sm:$0xf]  ;;  %353 = vst [vmem:[%s9008_s8 + $0x120] sm:$0xf] %v352_v8 }
  0x5e   : > { %355 = vst [vmem:[%s9008_s8 + $0x124] sm:$0xf] %v354_v9  ;;  %v356_v10 = vld [vmem:[%s9004_s7 + $0x940] sm:$0xf] }
  0x5f   : > { %v358_v11 = vld [vmem:[%s9004_s7 + $0x960] sm:$0xf]  ;;  %357 = vst [vmem:[%s9008_s8 + $0x128] sm:$0xf] %v356_v10 }
  0x60   : > { %v360_v12 = vld [vmem:[%s9004_s7 + $0x980] sm:$0xf]  ;;  %359 = vst [vmem:[%s9008_s8 + $0x12c] sm:$0xf] %v358_v11 }
  0x61   : > { %361 = vst [vmem:[%s9008_s8 + $0x130] sm:$0xf] %v360_v12  ;;  %v362_v13 = vld [vmem:[%s9004_s7 + $0x9a0] sm:$0xf] }
  0x62   : > { %v364_v14 = vld [vmem:[%s9004_s7 + $0x9c0] sm:$0xf]  ;;  %363 = vst [vmem:[%s9008_s8 + $0x134] sm:$0xf] %v362_v13 }
  0x63   : > { %v366_v15 = vld [vmem:[%s9004_s7 + $0x9e0] sm:$0xf]  ;;  %365 = vst [vmem:[%s9008_s8 + $0x138] sm:$0xf] %v364_v14 }
  0x64   : > { %367 = vst [vmem:[%s9008_s8 + $0x13c] sm:$0xf] %v366_v15  ;;  %v368_v16 = vld [vmem:[%s9004_s7 + $0xa00] sm:$0xf] }
  0x65   : > { %v370_v17 = vld [vmem:[%s9004_s7 + $0xa20] sm:$0xf]  ;;  %369 = vst [vmem:[%s9008_s8 + $0x140] sm:$0xf] %v368_v16 }
  0x66   : > { %v372_v18 = vld [vmem:[%s9004_s7 + $0xa40] sm:$0xf]  ;;  %371 = vst [vmem:[%s9008_s8 + $0x144] sm:$0xf] %v370_v17 }
  0x67   : > { %373 = vst [vmem:[%s9008_s8 + $0x148] sm:$0xf] %v372_v18  ;;  %v374_v19 = vld [vmem:[%s9004_s7 + $0xa60] sm:$0xf] }
  0x68   : > { %v376_v20 = vld [vmem:[%s9004_s7 + $0xa80] sm:$0xf]  ;;  %375 = vst [vmem:[%s9008_s8 + $0x14c] sm:$0xf] %v374_v19 }
  0x69   : > { %v378_v21 = vld [vmem:[%s9004_s7 + $0xaa0] sm:$0xf]  ;;  %377 = vst [vmem:[%s9008_s8 + $0x150] sm:$0xf] %v376_v20 }
  0x6a   : > { %379 = vst [vmem:[%s9008_s8 + $0x154] sm:$0xf] %v378_v21  ;;  %v380_v22 = vld [vmem:[%s9004_s7 + $0xac0] sm:$0xf] }
  0x6b   : > { %v382_v23 = vld [vmem:[%s9004_s7 + $0xae0] sm:$0xf]  ;;  %381 = vst [vmem:[%s9008_s8 + $0x158] sm:$0xf] %v380_v22 }
  0x6c   : > { %v384_v24 = vld [vmem:[%s9004_s7 + $0xb00] sm:$0xf]  ;;  %383 = vst [vmem:[%s9008_s8 + $0x15c] sm:$0xf] %v382_v23 }
  0x6d   : > { %385 = vst [vmem:[%s9008_s8 + $0x160] sm:$0xf] %v384_v24  ;;  %v386_v25 = vld [vmem:[%s9004_s7 + $0xb20] sm:$0xf] }
  0x6e   : > { %v388_v26 = vld [vmem:[%s9004_s7 + $0xb40] sm:$0xf]  ;;  %387 = vst [vmem:[%s9008_s8 + $0x164] sm:$0xf] %v386_v25 }
  0x6f   : > { %v390_v27 = vld [vmem:[%s9004_s7 + $0xb60] sm:$0xf]  ;;  %389 = vst [vmem:[%s9008_s8 + $0x168] sm:$0xf] %v388_v26 }
  0x70   : > { %391 = vst [vmem:[%s9008_s8 + $0x16c] sm:$0xf] %v390_v27  ;;  %v392_v28 = vld [vmem:[%s9004_s7 + $0xb80] sm:$0xf] }
  0x71   : > { %v394_v29 = vld [vmem:[%s9004_s7 + $0xba0] sm:$0xf]  ;;  %393 = vst [vmem:[%s9008_s8 + $0x170] sm:$0xf] %v392_v28 }
  0x72   : > { %v396_v30 = vld [vmem:[%s9004_s7 + $0xbc0] sm:$0xf]  ;;  %395 = vst [vmem:[%s9008_s8 + $0x174] sm:$0xf] %v394_v29 }
  0x73   : > { %397 = vst [vmem:[%s9008_s8 + $0x178] sm:$0xf] %v396_v30  ;;  %v398_v31 = vld [vmem:[%s9004_s7 + $0xbe0] sm:$0xf] }
  0x74   : > { %v400_v32 = vld [vmem:[%s9004_s7 + $0xc00] sm:$0xf]  ;;  %399 = vst [vmem:[%s9008_s8 + $0x17c] sm:$0xf] %v398_v31 }
  0x75   : > { %v402_v33 = vld [vmem:[%s9004_s7 + $0xc20] sm:$0xf]  ;;  %401 = vst [vmem:[%s9008_s8 + $0x180] sm:$0xf] %v400_v32 }
  0x76   : > { %403 = vst [vmem:[%s9008_s8 + $0x184] sm:$0xf] %v402_v33  ;;  %v404_v34 = vld [vmem:[%s9004_s7 + $0xc40] sm:$0xf] }
  0x77   : > { %v406_v35 = vld [vmem:[%s9004_s7 + $0xc60] sm:$0xf]  ;;  %405 = vst [vmem:[%s9008_s8 + $0x188] sm:$0xf] %v404_v34 }
  0x78   : > { %v408_v36 = vld [vmem:[%s9004_s7 + $0xc80] sm:$0xf]  ;;  %407 = vst [vmem:[%s9008_s8 + $0x18c] sm:$0xf] %v406_v35 }
  0x79   : > { %409 = vst [vmem:[%s9008_s8 + $0x190] sm:$0xf] %v408_v36  ;;  %v410_v37 = vld [vmem:[%s9004_s7 + $0xca0] sm:$0xf] }
  0x7a   : > { %v412_v38 = vld [vmem:[%s9004_s7 + $0xcc0] sm:$0xf]  ;;  %411 = vst [vmem:[%s9008_s8 + $0x194] sm:$0xf] %v410_v37 }
  0x7b   : > { %v414_v39 = vld [vmem:[%s9004_s7 + $0xce0] sm:$0xf]  ;;  %413 = vst [vmem:[%s9008_s8 + $0x198] sm:$0xf] %v412_v38 }
  0x7c   : > { %415 = vst [vmem:[%s9008_s8 + $0x19c] sm:$0xf] %v414_v39  ;;  %v416_v40 = vld [vmem:[%s9004_s7 + $0xd00] sm:$0xf] }
  0x7d   : > { %v418_v41 = vld [vmem:[%s9004_s7 + $0xd20] sm:$0xf]  ;;  %417 = vst [vmem:[%s9008_s8 + $0x1a0] sm:$0xf] %v416_v40 }
  0x7e   : > { %v420_v42 = vld [vmem:[%s9004_s7 + $0xd40] sm:$0xf]  ;;  %419 = vst [vmem:[%s9008_s8 + $0x1a4] sm:$0xf] %v418_v41 }
  0x7f   : > { %421 = vst [vmem:[%s9008_s8 + $0x1a8] sm:$0xf] %v420_v42  ;;  %v422_v43 = vld [vmem:[%s9004_s7 + $0xd60] sm:$0xf] }
  0x80   : > { %v424_v44 = vld [vmem:[%s9004_s7 + $0xd80] sm:$0xf]  ;;  %423 = vst [vmem:[%s9008_s8 + $0x1ac] sm:$0xf] %v422_v43 }
  0x81   : > { %v426_v45 = vld [vmem:[%s9004_s7 + $0xda0] sm:$0xf]  ;;  %425 = vst [vmem:[%s9008_s8 + $0x1b0] sm:$0xf] %v424_v44 }
  0x82   : > { %427 = vst [vmem:[%s9008_s8 + $0x1b4] sm:$0xf] %v426_v45  ;;  %v428_v46 = vld [vmem:[%s9004_s7 + $0xdc0] sm:$0xf] }
  0x83   : > { %v430_v47 = vld [vmem:[%s9004_s7 + $0xde0] sm:$0xf]  ;;  %429 = vst [vmem:[%s9008_s8 + $0x1b8] sm:$0xf] %v428_v46 }
  0x84   : > { %v432_v48 = vld [vmem:[%s9004_s7 + $0xe00] sm:$0xf]  ;;  %431 = vst [vmem:[%s9008_s8 + $0x1bc] sm:$0xf] %v430_v47 }
  0x85   : > { %433 = vst [vmem:[%s9008_s8 + $0x1c0] sm:$0xf] %v432_v48  ;;  %v434_v49 = vld [vmem:[%s9004_s7 + $0xe20] sm:$0xf] }
  0x86   : > { %v436_v50 = vld [vmem:[%s9004_s7 + $0xe40] sm:$0xf]  ;;  %435 = vst [vmem:[%s9008_s8 + $0x1c4] sm:$0xf] %v434_v49 }
  0x87   : > { %v438_v51 = vld [vmem:[%s9004_s7 + $0xe60] sm:$0xf]  ;;  %437 = vst [vmem:[%s9008_s8 + $0x1c8] sm:$0xf] %v436_v50 }
  0x88   : > { %439 = vst [vmem:[%s9008_s8 + $0x1cc] sm:$0xf] %v438_v51  ;;  %v440_v52 = vld [vmem:[%s9004_s7 + $0xe80] sm:$0xf] }
  0x89   : > { %v442_v53 = vld [vmem:[%s9004_s7 + $0xea0] sm:$0xf]  ;;  %441 = vst [vmem:[%s9008_s8 + $0x1d0] sm:$0xf] %v440_v52 }
  0x8a   : > { %v444_v54 = vld [vmem:[%s9004_s7 + $0xec0] sm:$0xf]  ;;  %443 = vst [vmem:[%s9008_s8 + $0x1d4] sm:$0xf] %v442_v53 }
  0x8b   : > { %445 = vst [vmem:[%s9008_s8 + $0x1d8] sm:$0xf] %v444_v54  ;;  %v446_v55 = vld [vmem:[%s9004_s7 + $0xee0] sm:$0xf] }
  0x8c   : > { %v448_v56 = vld [vmem:[%s9004_s7 + $0xf00] sm:$0xf]  ;;  %447 = vst [vmem:[%s9008_s8 + $0x1dc] sm:$0xf] %v446_v55 }
  0x8d   : > { %v450_v57 = vld [vmem:[%s9004_s7 + $0xf20] sm:$0xf]  ;;  %449 = vst [vmem:[%s9008_s8 + $0x1e0] sm:$0xf] %v448_v56 }
  0x8e   : > { %451 = vst [vmem:[%s9008_s8 + $0x1e4] sm:$0xf] %v450_v57  ;;  %v452_v58 = vld [vmem:[%s9004_s7 + $0xf40] sm:$0xf] }
  0x8f   : > { %v454_v59 = vld [vmem:[%s9004_s7 + $0xf60] sm:$0xf]  ;;  %453 = vst [vmem:[%s9008_s8 + $0x1e8] sm:$0xf] %v452_v58 }
  0x90   : > { %v456_v60 = vld [vmem:[%s9004_s7 + $0xf80] sm:$0xf]  ;;  %455 = vst [vmem:[%s9008_s8 + $0x1ec] sm:$0xf] %v454_v59 }
  0x91   : > { %457 = vst [vmem:[%s9008_s8 + $0x1f0] sm:$0xf] %v456_v60  ;;  %v458_v61 = vld [vmem:[%s9004_s7 + $0xfa0] sm:$0xf] }
  0x92   : > { %v460_v62 = vld [vmem:[%s9004_s7 + $0xfc0] sm:$0xf]  ;;  %459 = vst [vmem:[%s9008_s8 + $0x1f4] sm:$0xf] %v458_v61 }
  0x93   : > { %v462_v63 = vld [vmem:[%s9004_s7 + $0xfe0] sm:$0xf]  ;;  %461 = vst [vmem:[%s9008_s8 + $0x1f8] sm:$0xf] %v460_v62 }
  0x94   : > { %463 = vst [vmem:[%s9008_s8 + $0x1fc] sm:$0xf] %v462_v63 }
  0x95 PF: > { %p6803_p7 = scmp.ge.s32.totalorder %s8928_s20, 1  ;;  %p763_p8 = scmp.lt.s32.totalorder %s8928_s20, 9 }
  0x97   : > { %p764_p9 = pnand %p6803_p7, %p763_p8 }
  0x99   : > { %767 = sbr.rel (%p764_p9) target bundleno = 1784 (0x6f8), region = 77 }
  0xa0   : > { %s770_s9 = sand.u32 1, %s8920_s18   ;;  %v823_v0 = vld [vmem:[%s12431_s0 + $0x8] sm:$0xff]  ;;  %v822_v18 = vld [vmem:[%s12431_s0] sm:$0xff]  ;;  %vm2405_vm0 = vcmask 1043456   ;;  %vm8932_vm1 = vmmov 0   ;;  %p808_p11 = scmp.lt.s32.totalorder %s8979_s21, 7 }
  0xa1   : > { %v831_v1 = vld [vmem:[%s12431_s0 + $0x48] sm:$0xff]  ;;  %s6804_s14 = sshll.u32 %s770_s9, 9  ;;  %v1023_v2 = vmax.f32 %v823_v0, 0.0  ;;  %v830_v19 = vld [vmem:[%s12431_s0 + $0x40] sm:$0xff]  ;;  %v1022_v24 = vmax.f32 %v822_v18, 0.0  ;;  %vm3027_vm5 = vcmask 1041408  }
  0xa2   : > { %v1031_v3 = vmax.f32 %v831_v1, 0.0  ;;  %s9275_s15 = scalar_lea.vmem [#allocation3], %s6804_s14  ;;  %v839_v20 = vld [vmem:[%s12431_s0 + $0x88] sm:$0xff]  ;;  %v1030_v25 = vmax.f32 %v830_v19, 0.0  ;;  %v838_v31 = vld [vmem:[%s12431_s0 + $0x80] sm:$0xff]  ;;  %s814_s14 = smul.u32 9, %s8979_s21 }
  0xa3   : > { %v8714_v4 = vld [vmem:[%s9275_s15 + $0x40] sm:$0xff]   ;;  %v8716_v7 = vld [vmem:[%s9275_s15 + $0x48] sm:$0xff]   ;;  %v8718_v9 = vld [vmem:[%s9275_s15 + $0x50] sm:$0xff]   ;;  %v1039_v27 = vmax.f32 %v839_v20, 0.0  ;;  %v1038_v38 = vmax.f32 %v838_v31, 0.0  ;;  %s10467_s24 = scalar_select %p808_p11, %s8979_s21, 7 }
  0xa4   : > { %v1223_v5 = vpack.c.bf16 %v1031_v3, %v1023_v2  ;;  %v8715_v6 = vld [vmem:[%s9275_s15] sm:$0xff]   ;;  %7235 = vmatprep.subr.bf16.mxu1 %v8714_v4  ;;  %v8717_v8 = vld [vmem:[%s9275_s15 + $0x8] sm:$0xff]   ;;  %v8719_v10 = vld [vmem:[%s9275_s15 + $0x10] sm:$0xff]   ;;  %v1222_v30 = vpack.c.bf16 %v1030_v25, %v1022_v24  ;;  %p815_p10 = scmp.lt.s32.totalorder %s814_s14, 71  ;;  %vm2719_vm2 = vsmask.f32 3328 }
  0xa5   : > { %7236 = vmatpush3.bf16.msra.mxu1 %v8715_v6  ;;  %v8720_v11 = vld [vmem:[%s9275_s15 + $0x58] sm:$0xff]   ;;  %v8722_v13 = vld [vmem:[%s9275_s15 + $0x60] sm:$0xff]   ;;  %v8724_v15 = vld [vmem:[%s9275_s15 + $0x68] sm:$0xff]   ;;  %s810_s29 = scalar_lea.vmem %s12433_s2, %s10467_s24  ;;  %vm2720_vm3 = vsmask.f32 7440  ;;  %vm2997_vm7 = vcmask 1043459  }
  0xa6   : > { %1870 = vmatprep.mubr.bf16.mxu1 %v1223_v5  ;;  %7237 = vmatprep.subr.bf16.mxu1 %v8716_v7  ;;  %v8721_v12 = vld [vmem:[%s9275_s15 + $0x18] sm:$0xff]   ;;  %v8723_v14 = vld [vmem:[%s9275_s15 + $0x20] sm:$0xff]   ;;  %v8725_v16 = vld [vmem:[%s9275_s15 + $0x28] sm:$0xff]   ;;  %s12574_s14 = smov (!%p815_p10, %s814_s14), 71  ;;  %vm3028_vm6 = vsmask.f32 1280 }
  0xa7   : > { %v8726_v17 = vld [vmem:[%s9275_s15 + $0x70] sm:$0xff]   ;;  %v8728_v23 = vld [vmem:[%s9275_s15 + $0x78] sm:$0xff]   ;;  %v8730_v29 = vld [vmem:[%s9275_s15 + $0xc0] sm:$0xff]   ;;  %s7209_s16 = sshll.u32 %s12574_s14, 6  ;;  %vm2998_vm8 = vsmask.f32 7950 }
  0xa8   : > { %v847_v21 = vld [vmem:[%s12431_s0 + $0xc8] sm:$0xff]  ;;  %v846_v32 = vld [vmem:[%s12431_s0 + $0xc0] sm:$0xff]  ;;  %v8731_v33 = vld [vmem:[%s9275_s15 + $0x80] sm:$0xff]   ;;  %s10297_s23 = scalar_lea.vmem %s12435_s4, %s7209_s16  ;;  %vm3811_vm11 = vcmask 1044480   ;;  %vm4692_vm12 = vsmask.f32 4352 }
  0xa9   : > { %7238 = vmatpush3.bf16.msra.mxu1 %v8717_v8  ;;  %v8727_v22 = vld [vmem:[%s9275_s15 + $0x30] sm:$0xff]   ;;  %v8729_v26 = vld [vmem:[%s9275_s15 + $0x38] sm:$0xff]   ;;  %v1047_v28 = vmax.f32 %v847_v21, 0.0  ;;  %v8732_v35 = vld [vmem:[%s9275_s15 + $0xc8] sm:$0xff]   ;;  %v1046_v39 = vmax.f32 %v846_v32, 0.0  ;;  %vm6008_vm13 = vcmask 1046528  }
  0xaa   : > { %7239 = vmatprep.subr.bf16.mxu1 %v8718_v9  ;;  %v855_v36 = vld [vmem:[%s12431_s0 + $0x108] sm:$0xff]  ;;  %v8733_v40 = vld [vmem:[%s9275_s15 + $0x88] sm:$0xff]   ;;  %v9337_v54 = vld [vmem:[%s9275_s15 + $0x140] sm:$0xff]   ;;  %vm5009_vm14 = vsmask.f32 7424  ;;  %vm4355_vm15 = vcmask 1045504  }
  0xab   : > { %v1231_v34 = vpack.c.bf16 %v1047_v28, %v1039_v27  ;;  %v863_v37 = vld [vmem:[%s12431_s0 + $0x148] sm:$0xff]  ;;  %v1055_v41 = vmax.f32 %v855_v36, 0.0  ;;  %v854_v43 = vld [vmem:[%s12431_s0 + $0x100] sm:$0xff]  ;;  %v1230_v46 = vpack.c.bf16 %v1046_v39, %v1038_v38  ;;  %7423 = vmatprep.subr.bf16.mxu0 %v9337_v54  ;;  %v9341_v56 = vld [vmem:[%s9275_s15 + $0x100] sm:$0xff]   ;;  %s8636_s7 = smul.u32 200, %s770_s9  ;;  %s7206_s18 = sshll.u32 (%p8994_p5), %s8979_s21, 3 }
  0xac   : > { %v1063_v42 = vmax.f32 %v863_v37, 0.0  ;;  %v8734_v44 = vld [vmem:[%s9275_s15 + $0xd0] sm:$0xff]   ;;  %v1054_v51 = vmax.f32 %v854_v43, 0.0  ;;  %v8736_v53 = vld [vmem:[%s9275_s15 + $0xd8] sm:$0xff]   ;;  %v8738_v60 = vld [vmem:[%s9275_s15 + $0xe0] sm:$0xff]   ;;  %7424 = vmatpush3.bf16.msra.mxu0 %v9341_v56  ;;  %s12372_s11 = scalar_lea.vmem (%p8994_p5), %s12436_s5, %s7206_s18 }
  0xad   : > { %7240 = vmatpush3.bf16.msra.mxu1 %v8719_v10  ;;  %v862_v45 = vld [vmem:[%s12431_s0 + $0x140] sm:$0xff]  ;;  %v871_v48 = vld [vmem:[%s12431_s0 + $0x188] sm:$0xff]  ;;  %v8739_v3 = vld [vmem:[%s9275_s15 + $0xa0] sm:$0xff]   ;;  %s12267_s8 = scalar_lea.vmem [#allocation4], %s8636_s7 }
  0xae   : > { %7241 = vmatprep.subr.bf16.mxu1 %v8720_v11  ;;  %v1239_v47 = vpack.c.bf16 %v1063_v42, %v1055_v41  ;;  %v879_v49 = vld [vmem:[%s12431_s0 + $0x1c8] sm:$0xff]  ;;  %v1062_v52 = vmax.f32 %v862_v45, 0.0  ;;  %v1071_v55 = vmax.f32 %v871_v48, 0.0  ;;  %v870_v59 = vld [vmem:[%s12431_s0 + $0x180] sm:$0xff]  ;;  %v9404_v25 = vld [vmem:[%s9275_s15 + $0x120] sm:$0xff]  }
  0xaf   : > { %v8735_v50 = vld [vmem:[%s9275_s15 + $0x90] sm:$0xff]   ;;  %v1079_v57 = vmax.f32 %v879_v49, 0.0  ;;  %v8737_v58 = vld [vmem:[%s9275_s15 + $0x98] sm:$0xff]   ;;  %v9350_v61 = vld [vmem:[%s9275_s15 + $0x148] sm:$0xff]   ;;  %v1070_v6 = vmax.f32 %v870_v59, 0.0 }
  0xb0   : > { %v878_v62 = vld [vmem:[%s12431_s0 + $0x1c0] sm:$0xff]  ;;  %v1238_v63 = vpack.c.bf16 %v1062_v52, %v1054_v51  ;;  %v887_v0 = vld [vmem:[%s12431_s0 + $0x208] sm:$0xff]  ;;  %7425 = vmatprep.subr.bf16.mxu0 %v9350_v61  ;;  %vm10604_vm4 = vmor %vm2719_vm2, %vm2720_vm3 }
  0xb1   : > { %7242 = vmatpush3.bf16.msra.mxu1 %v8721_v12  ;;  %v1247_v1 = vpack.c.bf16 %v1079_v57, %v1071_v55  ;;  %v895_v2 = vld [vmem:[%s12431_s0 + $0x248] sm:$0xff]  ;;  %v9364_v4 = vld [vmem:[%s9275_s15 + $0x108] sm:$0xff]   ;;  %v1078_v8 = vmax.f32 %v878_v62, 0.0  ;;  %v1087_v10 = vmax.f32 %v887_v0, 0.0  ;;  %vm10652_vm9 = vmand %vm3027_vm5, %vm3028_vm6 }
  0xb2   : > { %7243 = vmatprep.subr.bf16.mxu1 %v8722_v13  ;;  %v8740_v5 = vld [vmem:[%s9275_s15 + $0xe8] sm:$0xff]   ;;  %7426 = vmatpush3.bf16.msra.mxu0 %v9364_v4  ;;  %v9369_v7 = vld [vmem:[%s9275_s15 + $0x150] sm:$0xff]   ;;  %v1095_v11 = vmax.f32 %v895_v2, 0.0  ;;  %v9376_v13 = vld [vmem:[%s9275_s15 + $0x158] sm:$0xff]  }
  0xb3   : > { %v9372_v9 = vld [vmem:[%s9275_s15 + $0x110] sm:$0xff]   ;;  %v8741_v12 = vld [vmem:[%s9275_s15 + $0xa8] sm:$0xff]   ;;  %7427 = vmatprep.subr.bf16.mxu0 %v9369_v7  ;;  %v1246_v18 = vpack.c.bf16 %v1078_v8, %v1070_v6  ;;  %v8753_v24 = vld [vmem:[%s9275_s15 + $0xf8] sm:$0xff]  }
  0xb4   : > { %v903_v19 = vld [vmem:[%s12431_s0 + $0x288] sm:$0xff]  ;;  %v9409_v31 = vld [vmem:[%s9275_s15 + $0x168] sm:$0xff]   ;;  %vm10670_vm10 = vmand %vm2997_vm7, %vm2998_vm8 }
  0xb5   : > { %7244 = vmatpush3.bf16.msra.mxu1 %v8723_v14  ;;  %v8744_v14 = vld [vmem:[%s9275_s15 + $0xf0] sm:$0xff]   ;;  %v1103_v28 = vmax.f32 %v903_v19, 0.0  ;;  %v9438_v43 = vld [vmem:[%s9275_s15 + $0x178] sm:$0xff]  }
  0xb6   : > { %7245 = vmatprep.subr.bf16.mxu1 %v8724_v15  ;;  %v886_v15 = vld [vmem:[%s12431_s0 + $0x200] sm:$0xff]  ;;  %7428 = vmatpush3.bf16.msra.mxu0 %v9372_v9  ;;  %v911_v20 = vld [vmem:[%s12431_s0 + $0x2c8] sm:$0xff] }
  0xb7   : > { %v8746_v21 = vld [vmem:[%s9275_s15 + $0xb0] sm:$0xff]   ;;  %7429 = vmatprep.subr.bf16.mxu0 %v9376_v13 }
  0xb8   : > { %v902_v32 = vld [vmem:[%s12431_s0 + $0x280] sm:$0xff]  ;;  %v919_v38 = vld [vmem:[%s12431_s0 + $0x308] sm:$0xff] }
  0xb9   : > { %7246 = vmatpush3.bf16.msra.mxu1 %v8725_v16  ;;  %v894_v16 = vld [vmem:[%s12431_s0 + $0x240] sm:$0xff]  ;;  %v927_v39 = vld [vmem:[%s12431_s0 + $0x348] sm:$0xff]  ;;  %v1102_v41 = vmax.f32 %v902_v32, 0.0 }
  0xba   : > { %7247 = vmatprep.subr.bf16.mxu1 %v8726_v17  ;;  %v9388_v17 = vld [vmem:[%s9275_s15 + $0x118] sm:$0xff]   ;;  %v1094_v27 = vmax.f32 %v894_v16, 0.0  ;;  %v910_v37 = vld [vmem:[%s12431_s0 + $0x2c0] sm:$0xff] }
  0xbb   : > { %7430 = vmatpush3.bf16.msra.mxu0 %v9388_v17  ;;  %v1110_v42 = vmax.f32 %v910_v37, 0.0  ;;  %v835_v45 = vld [vmem:[%s12431_s0 + $0x68] sm:$0xff]  ;;  %v834_v51 = vld [vmem:[%s12431_s0 + $0x60] sm:$0xff] }
  0xbc   : > { %v1035_v49 = vmax.f32 %v835_v45, 0.0  ;;  %v843_v57 = vld [vmem:[%s12431_s0 + $0xa8] sm:$0xff]  ;;  %v918_v0 = vld [vmem:[%s12431_s0 + $0x300] sm:$0xff] }
  0xbd   : > { %7248 = vmatpush3.bf16.msra.mxu1 %v8727_v22  ;;  %v1255_v22 = vpack.c.bf16 %v1095_v11, %v1087_v10  ;;  %v1262_v59 = vpack.c.bf16 %v1110_v42, %v1102_v41  ;;  %v935_v2 = vld [vmem:[%s12431_s0 + $0x388] sm:$0xff]  ;;  %v842_v8 = vld [vmem:[%s12431_s0 + $0xa0] sm:$0xff]  ;;  %v1118_v11 = vmax.f32 %v918_v0, 0.0 }
  0xbe   : > { %7249 = vmatprep.subr.bf16.mxu1 %v8728_v23  ;;  %v9399_v23 = vld [vmem:[%s9275_s15 + $0x160] sm:$0xff]   ;;  %v850_v10 = vld [vmem:[%s12431_s0 + $0xe0] sm:$0xff]  ;;  %v1135_v16 = vmax.f32 %v935_v2, 0.0  ;;  %v1042_v19 = vmax.f32 %v842_v8, 0.0  ;;  %v875_v41 = vld [vmem:[%s12431_s0 + $0x1a8] sm:$0xff] }
  0xbf   : > { %7431 = vmatprep.subr.bf16.mxu0 %v9399_v23  ;;  %v866_v37 = vld [vmem:[%s12431_s0 + $0x160] sm:$0xff]  ;;  %v883_v42 = vld [vmem:[%s12431_s0 + $0x1e8] sm:$0xff] }
  0xc0   : > { %7432 = vmatpush3.bf16.msra.mxu0 %v9404_v25  ;;  %v899_v2 = vld [vmem:[%s12431_s0 + $0x268] sm:$0xff] }
  0xc1   : > { %7250 = vmatpush3.bf16.msra.mxu1 %v8729_v26  ;;  %v1086_v26 = vmax.f32 %v886_v15, 0.0  ;;  %7433 = vmatprep.subr.bf16.mxu0 %v9409_v31  ;;  %v867_v15 = vld [vmem:[%s12431_s0 + $0x168] sm:$0xff] }
  0xc2   : > { %7329 = vmatprep.subr.bf16.mxu1 %v8730_v29  ;;  %v1111_v29 = vmax.f32 %v911_v20, 0.0  ;;  %v1050_v20 = vmax.f32 %v850_v10, 0.0  ;;  %v966_v10 = vld [vmem:[%s12431_s0 + $0x480] sm:$0xff] }
  0xc4   : > { %1871 = vmatmul.mubr.bf16.vlgmr.msra.gmra.mrb[0].mxu1 %v1222_v30  ;;  %v8755_v30 = vld [vmem:[%s9275_s15 + $0xb8] sm:$0xff]   ;;  %v1263_v36 = vpack.c.bf16 %v1111_v29, %v1103_v28  ;;  %v942_v28 = vld [vmem:[%s12431_s0 + $0x3c0] sm:$0xff]  ;;  %v1234_v32 = vpack.c.bf16 %v1050_v20, %v1042_v19 }
  0xc5   : > { %7330 = vmatpush3.bf16.msra.mxu1 %v8731_v33  ;;  %1878 = vmatprep.mubr.bf16.mxu1 %v1231_v34  ;;  %v9416_v33 = vld [vmem:[%s9275_s15 + $0x128] sm:$0xff]   ;;  %v1254_v34 = vpack.c.bf16 %v1094_v27, %v1086_v26  ;;  %v951_v29 = vld [vmem:[%s12431_s0 + $0x408] sm:$0xff] }
  0xc6   : > { %7331 = vmatprep.subr.bf16.mxu1 %v8732_v35  ;;  %v9420_v35 = vld [vmem:[%s9275_s15 + $0x170] sm:$0xff]   ;;  %7434 = vmatpush3.bf16.msra.mxu0 %v9416_v33 }
  0xc7   : > { %7435 = vmatprep.subr.bf16.mxu0 %v9420_v35  ;;  %v934_v27 = vld [vmem:[%s12431_s0 + $0x380] sm:$0xff] }
  0xc8   : > { %v890_v19 = vld [vmem:[%s12431_s0 + $0x220] sm:$0xff] }
  0xc9   : > { %7332 = vmatpush3.bf16.msra.mxu1 %v8733_v40  ;;  %v9434_v40 = vld [vmem:[%s9275_s15 + $0x130] sm:$0xff]  }
  0xca   : > { %7333 = vmatprep.subr.bf16.mxu1 %v8734_v44  ;;  %v827_v44 = vld [vmem:[%s12431_s0 + $0x28] sm:$0xff]  ;;  %7436 = vmatpush3.bf16.msra.mxu0 %v9434_v40  ;;  %v898_v20 = vld [vmem:[%s12431_s0 + $0x260] sm:$0xff] }
  0xcb   : > { %v1027_v48 = vmax.f32 %v827_v44, 0.0  ;;  %7437 = vmatprep.subr.bf16.mxu0 %v9438_v43  ;;  %v1151_v44 = vmax.f32 %v951_v29, 0.0 }
  0xcc   : > { %1879 = vmatmul.mubr.bf16.gmra.mrb[4].mxu1 %v1230_v46  ;;  %v1119_v46 = vmax.f32 %v919_v38, 0.0  ;;  %v1134_v38 = vmax.f32 %v934_v27, 0.0 }
  0xcd   : > { %1886 = vmatprep.mubr.bf16.mxu1 %v1239_v47  ;;  %7334 = vmatpush3.bf16.msra.mxu1 %v8735_v50  ;;  %v1127_v47 = vmax.f32 %v927_v39, 0.0  ;;  %v826_v50 = vld [vmem:[%s12431_s0 + $0x20] sm:$0xff]  ;;  %v1227_v55 = vpack.c.bf16 %v1035_v49, %v1027_v48  ;;  %v1142_v39 = vmax.f32 %v942_v28, 0.0  ;;  %v1075_v48 = vmax.f32 %v875_v41, 0.0 }
  0xce   : > { %7335 = vmatprep.subr.bf16.mxu1 %v8736_v53  ;;  %v1026_v52 = vmax.f32 %v826_v50, 0.0  ;;  %v1034_v53 = vmax.f32 %v834_v51, 0.0  ;;  %v1083_v49 = vmax.f32 %v883_v42, 0.0  ;;  %v1166_v28 = vmax.f32 %v966_v10, 0.0  ;;  %v990_v41 = vld [vmem:[%s12431_s0 + $0x540] sm:$0xff] }
  0xcf   : > { %2142 = vmatprep.mubr.bf16.mxu0 %v1227_v55  ;;  %v1278_v50 = vpack.c.bf16 %v1142_v39, %v1134_v38  ;;  %v967_v55 = vld [vmem:[%s12431_s0 + $0x488] sm:$0xff]  ;;  %v982_v39 = vld [vmem:[%s12431_s0 + $0x500] sm:$0xff] }
  0xd0   : > { %v922_v10 = vld [vmem:[%s12431_s0 + $0x320] sm:$0xff] }
  0xd1   : > { %7336 = vmatpush3.bf16.msra.mxu1 %v8737_v58  ;;  %v851_v58 = vld [vmem:[%s12431_s0 + $0xe8] sm:$0xff] }
  0xd2   : > { %7337 = vmatprep.subr.bf16.mxu1 %v8738_v60  ;;  %v1043_v60 = vmax.f32 %v843_v57, 0.0  ;;  %v1051_v62 = vmax.f32 %v851_v58, 0.0  ;;  %v975_v57 = vld [vmem:[%s12431_s0 + $0x4c8] sm:$0xff] }
  0xd4   : > { %1887 = vmatmul.mubr.bf16.gmra.mrb[8].mxu1 %v1238_v63  ;;  %v1271_v63 = vpack.c.bf16 %v1127_v47, %v1119_v46  ;;  %v1235_v6 = vpack.c.bf16 %v1051_v62, %v1043_v60  ;;  %v1066_v47 = vmax.f32 %v866_v37, 0.0  ;;  %v874_v60 = vld [vmem:[%s12431_s0 + $0x1a0] sm:$0xff] }
  0xd5   : > { %1894 = vmatprep.mubr.bf16.mxu1 %v1247_v1  ;;  %7338 = vmatpush3.bf16.msra.mxu1 %v8739_v3  ;;  %v926_v1 = vld [vmem:[%s12431_s0 + $0x340] sm:$0xff]  ;;  %v943_v3 = vld [vmem:[%s12431_s0 + $0x3c8] sm:$0xff] }
  0xd6   : > { %7339 = vmatprep.subr.bf16.mxu1 %v8740_v5  ;;  %v1226_v5 = vpack.c.bf16 %v1034_v53, %v1026_v52  ;;  %v950_v52 = vld [vmem:[%s12431_s0 + $0x400] sm:$0xff] }
  0xd7   : > { %v958_v53 = vld [vmem:[%s12431_s0 + $0x440] sm:$0xff] }
  0xd8   : > { %v882_v62 = vld [vmem:[%s12431_s0 + $0x1e0] sm:$0xff]  ;;  %v1158_v0 = vmax.f32 %v958_v53, 0.0  ;;  %v923_v53 = vld [vmem:[%s12431_s0 + $0x328] sm:$0xff] }
  0xd9   : > { %7340 = vmatpush3.bf16.msra.mxu1 %v8741_v12  ;;  %v1126_v12 = vmax.f32 %v926_v1, 0.0  ;;  %v891_v1 = vld [vmem:[%s12431_s0 + $0x228] sm:$0xff]  ;;  %v1082_v8 = vmax.f32 %v882_v62, 0.0  ;;  %v1123_v62 = vmax.f32 %v923_v53, 0.0 }
  0xda   : > { %7341 = vmatprep.subr.bf16.mxu1 %v8744_v14  ;;  %v859_v14 = vld [vmem:[%s12431_s0 + $0x128] sm:$0xff] }
  0xdc   : > { %1895 = vmatmul.mubr.bf16.gmra.mrb[12].mxu1 %v1246_v18  ;;  %v1143_v18 = vmax.f32 %v943_v3, 0.0  ;;  %v1167_v3 = vmax.f32 %v967_v55, 0.0  ;;  %v931_v55 = vld [vmem:[%s12431_s0 + $0x368] sm:$0xff] }
  0xdd   : > { %1902 = vmatprep.mubr.bf16.mxu1 %v1255_v22  ;;  %7342 = vmatpush3.bf16.msra.mxu1 %v8746_v21  ;;  %v1059_v21 = vmax.f32 %v859_v14, 0.0  ;;  %v1067_v22 = vmax.f32 %v867_v15, 0.0  ;;  %v1099_v14 = vmax.f32 %v899_v2, 0.0  ;;  %v998_v2 = vld [vmem:[%s12431_s0 + $0x580] sm:$0xff] }
  0xde   : > { %7343 = vmatprep.subr.bf16.mxu1 %v8753_v24  ;;  %v1270_v24 = vpack.c.bf16 %v1126_v12, %v1118_v11  ;;  %v1279_v26 = vpack.c.bf16 %v1143_v18, %v1135_v16  ;;  %v974_v11 = vld [vmem:[%s12431_s0 + $0x4c0] sm:$0xff]  ;;  %v1091_v12 = vmax.f32 %v891_v1, 0.0  ;;  %v983_v16 = vld [vmem:[%s12431_s0 + $0x508] sm:$0xff] }
  0xdf   : > { %v991_v18 = vld [vmem:[%s12431_s0 + $0x548] sm:$0xff]  ;;  %v1174_v29 = vmax.f32 %v974_v11, 0.0  ;;  %v930_v11 = vld [vmem:[%s12431_s0 + $0x360] sm:$0xff] }
  0xe0   : > { %v1259_v27 = vpack.c.bf16 %v1099_v14, %v1091_v12  ;;  %v1198_v12 = vmax.f32 %v998_v2, 0.0 }
  0xe1   : > { %7344 = vmatpush3.bf16.msra.mxu1 %v8755_v30  ;;  %v959_v30 = vld [vmem:[%s12431_s0 + $0x448] sm:$0xff]  ;;  %v1294_v42 = vpack.c.bf16 %v1174_v29, %v1166_v28 }
  0xe2   : > { %8412 = vmatprep.subr.bf16.mxu1 %v9337_v54  ;;  %v9454_v54 = vld [vmem:[%s9275_s15 + $0x138] sm:$0xff]   ;;  %v1159_v45 = vmax.f32 %v959_v30, 0.0  ;;  %v1183_v30 = vmax.f32 %v983_v16, 0.0  ;;  %v1122_v16 = vmax.f32 %v922_v10, 0.0 }
  0xe3   : > { %7438 = vmatpush3.bf16.msra.mxu0 %v9454_v54 }
  0xe4   : > { %1903 = vmatmul.mubr.bf16.gmra.mrb[16].mxu1 %v1254_v34  ;;  %v1243_v34 = vpack.c.bf16 %v1067_v22, %v1059_v21  ;;  %v1287_v51 = vpack.c.bf16 %v1159_v45, %v1151_v44  ;;  %v907_v22 = vld [vmem:[%s12431_s0 + $0x2a8] sm:$0xff] }
  0xe5   : > { %1910 = vmatprep.mubr.bf16.mxu1 %v1263_v36  ;;  %v858_v36 = vld [vmem:[%s12431_s0 + $0x120] sm:$0xff]  ;;  %v1107_v37 = vmax.f32 %v907_v22, 0.0  ;;  %v999_v44 = vld [vmem:[%s12431_s0 + $0x588] sm:$0xff]  ;;  %v825_v22 = vld [vmem:[%s12431_s0 + $0x18] sm:$0xff] }
  0xe6   : > { %2143 = vmatmul.mubr.bf16.vlgmr.msra.gmra.mrb[0].mxu0 %v1226_v5  ;;  %v1058_v46 = vmax.f32 %v858_v36, 0.0  ;;  %v1175_v5 = vmax.f32 %v975_v57, 0.0  ;;  %v1098_v36 = vmax.f32 %v898_v20, 0.0  ;;  %v1199_v57 = vmax.f32 %v999_v44, 0.0 }
  0xe7   : > { %2150 = vmatprep.mubr.bf16.mxu0 %v1235_v6  ;;  %v1074_v6 = vmax.f32 %v874_v60, 0.0  ;;  %v1025_v28 = vmax.f32 %v825_v22, 0.0  ;;  %v921_v22 = vld [vmem:[%s12431_s0 + $0x318] sm:$0xff] }
  0xe8   : > { %v1242_v58 = vpack.c.bf16 %v1066_v47, %v1058_v46  ;;  %v1295_v21 = vpack.c.bf16 %v1175_v5, %v1167_v3  ;;  %v1007_v46 = vld [vmem:[%s12431_s0 + $0x5c8] sm:$0xff]  ;;  %v1006_v3 = vld [vmem:[%s12431_s0 + $0x5c0] sm:$0xff] }
  0xe9   : > { %v1015_v5 = vld [vmem:[%s12431_s0 + $0x608] sm:$0xf]  ;;  %v1206_v14 = vmax.f32 %v1006_v3, 0.0  ;;  %v872_v3 = vld [vmem:[%s12431_s0 + $0x190] sm:$0xff] }
  0xec   : > { %1911 = vmatmul.mubr.bf16.gmra.mrb[20].mxu1 %v1262_v59  ;;  %v1251_v59 = vpack.c.bf16 %v1083_v49, %v1075_v48  ;;  %v906_v49 = vld [vmem:[%s12431_s0 + $0x2a0] sm:$0xff] }
  0xed   : > { %1918 = vmatprep.mubr.bf16.mxu1 %v1271_v63  ;;  %v1150_v63 = vmax.f32 %v950_v52, 0.0  ;;  %v1190_v52 = vmax.f32 %v990_v41, 0.0 }
  0xee   : > { %2151 = vmatmul.mubr.bf16.gmra.mrb[4].mxu0 %v1234_v32  ;;  %v1191_v32 = vmax.f32 %v991_v18, 0.0  ;;  %v1130_v18 = vmax.f32 %v930_v11, 0.0 }
  0xef   : > { %2158 = vmatprep.mubr.bf16.mxu0 %v1243_v34  ;;  %v1286_v15 = vpack.c.bf16 %v1158_v0, %v1150_v63  ;;  %v1090_v34 = vmax.f32 %v890_v19, 0.0  ;;  %v1131_v63 = vmax.f32 %v931_v55, 0.0  ;;  %v1310_v19 = vpack.c.bf16 %v1206_v14, %v1198_v12  ;;  %v888_v12 = vld [vmem:[%s12431_s0 + $0x210] sm:$0xff]  ;;  %v905_v14 = vld [vmem:[%s12431_s0 + $0x298] sm:$0xff] }
  0xf0   : > { %v1303_v45 = vpack.c.bf16 %v1191_v32, %v1183_v30 }
  0xf1   : > { %v1258_v47 = vpack.c.bf16 %v1098_v36, %v1090_v34  ;;  %v824_v34 = vld [vmem:[%s12431_s0 + $0x10] sm:$0xff] }
  0xf2   : > { %v832_v36 = vld [vmem:[%s12431_s0 + $0x50] sm:$0xff] }
  0xf3   : > { %v1032_v41 = vmax.f32 %v832_v36, 0.0 }
  0xf4   : > { %1919 = vmatmul.mubr.bf16.gmra.mrb[24].mxu1 %v1270_v24  ;;  %v915_v24 = vld [vmem:[%s12431_s0 + $0x2e8] sm:$0xff] }
  0xf5   : > { %1926 = vmatprep.mubr.bf16.mxu1 %v1279_v26  ;;  %v1250_v26 = vpack.c.bf16 %v1082_v8, %v1074_v6  ;;  %v1115_v38 = vmax.f32 %v915_v24, 0.0  ;;  %v1275_v8 = vpack.c.bf16 %v1131_v63, %v1123_v62  ;;  %v833_v24 = vld [vmem:[%s12431_s0 + $0x58] sm:$0xff] }
  0xf6   : > { %2159 = vmatmul.mubr.bf16.gmra.mrb[8].mxu0 %v1242_v58  ;;  %v1207_v58 = vmax.f32 %v1007_v46, 0.0  ;;  %v1033_v29 = vmax.f32 %v833_v24, 0.0 }
  0xf7   : > { %2166 = vmatprep.mubr.bf16.mxu0 %v1251_v59  ;;  %v1267_v48 = vpack.c.bf16 %v1115_v38, %v1107_v37  ;;  %v1106_v59 = vmax.f32 %v906_v49, 0.0  ;;  %v841_v37 = vld [vmem:[%s12431_s0 + $0x98] sm:$0xff] }
  0xf8   : > { %v1311_v1 = vpack.c.bf16 %v1207_v58, %v1199_v57  ;;  %v1225_v32 = vpack.c.bf16 %v1033_v29, %v1025_v28  ;;  %v849_v38 = vld [vmem:[%s12431_s0 + $0xd8] sm:$0xff] }
  0xf9   : > { %v1049_v44 = vmax.f32 %v849_v38, 0.0  ;;  %v857_v49 = vld [vmem:[%s12431_s0 + $0x118] sm:$0xff] }
  0xfa   : > { %v1057_v53 = vmax.f32 %v857_v49, 0.0 }
  0xfc   : > { %1927 = vmatmul.mubr.bf16.gmra.mrb[28].mxu1 %v1278_v50  ;;  %v914_v50 = vld [vmem:[%s12431_s0 + $0x2e0] sm:$0xff] }
  0xfd   : > { %1934 = vmatprep.mubr.bf16.mxu1 %v1287_v51  ;;  %v1182_v51 = vmax.f32 %v982_v39, 0.0  ;;  %v1114_v60 = vmax.f32 %v914_v50, 0.0  ;;  %v1024_v39 = vmax.f32 %v824_v34, 0.0  ;;  %v865_v50 = vld [vmem:[%s12431_s0 + $0x158] sm:$0xff] }
  0xfe   : > { %2167 = vmatmul.mubr.bf16.gmra.mrb[12].mxu0 %v1250_v26  ;;  %v1274_v26 = vpack.c.bf16 %v1130_v18, %v1122_v16  ;;  %v1065_v55 = vmax.f32 %v865_v50, 0.0  ;;  %v1105_v16 = vmax.f32 %v905_v14, 0.0  ;;  %v945_v34 = vld [vmem:[%s12431_s0 + $0x3d8] sm:$0xff] }
  0xff   : > { %2174 = vmatprep.mubr.bf16.mxu0 %v1259_v27  ;;  %v1302_v0 = vpack.c.bf16 %v1190_v52, %v1182_v51  ;;  %v1266_v6 = vpack.c.bf16 %v1114_v60, %v1106_v59  ;;  %v856_v59 = vld [vmem:[%s12431_s0 + $0x110] sm:$0xff] }
 0x100   : > { %v1241_v58 = vpack.c.bf16 %v1065_v55, %v1057_v53  ;;  %v864_v60 = vld [vmem:[%s12431_s0 + $0x150] sm:$0xff] }
 0x101   : > { %v1064_v62 = vmax.f32 %v864_v60, 0.0  ;;  %v952_v55 = vld [vmem:[%s12431_s0 + $0x410] sm:$0xff] }
 0x102   : > { %v1152_v60 = vmax.f32 %v952_v55, 0.0  ;;  %v8765_v55 = vld [vmem:[%s9275_s15 + $0x188] sm:$0xff]  }
 0x104   : > { %1935 = vmatmul.mubr.bf16.gmra.mrb[32].mxu1 %v1286_v15  ;;  %v1215_v15 = vmax.f32 %v1015_v5, 0.0  ;;  %v889_v5 = vld [vmem:[%s12431_s0 + $0x218] sm:$0xff] }
 0x105   : > { %1942 = vmatprep.mubr.bf16.mxu1 %v1295_v21  ;;  %v1014_v21 = vld [vmem:[%s12431_s0 + $0x600] sm:$0xf] }
 0x106   : > { %2175 = vmatmul.mubr.bf16.gmra.mrb[16].mxu0 %v1258_v47  ;;  %v1319_v20 = vpack.c.bf16 %v1215_v15, %v1215_v15  ;;  %v1214_v27 = vmax.f32 %v1014_v21, 0.0  ;;  %v840_v47 = vld [vmem:[%s12431_s0 + $0x90] sm:$0xff] }
 0x107   : > { %2182 = vmatprep.mubr.bf16.mxu0 %v1267_v48  ;;  %v848_v48 = vld [vmem:[%s12431_s0 + $0xd0] sm:$0xff]  ;;  %v1040_v51 = vmax.f32 %v840_v47, 0.0  ;;  %v961_v47 = vld [vmem:[%s12431_s0 + $0x458] sm:$0xff] }
 0x108   : > { %v1318_v30 = vpack.c.bf16 %v1214_v27, %v1214_v27  ;;  %v1048_v52 = vmax.f32 %v848_v48, 0.0  ;;  %v904_v21 = vld [vmem:[%s12431_s0 + $0x290] sm:$0xff] }
 0x10a   : > { %v1232_v57 = vpack.c.bf16 %v1048_v52, %v1040_v51  ;;  %v1161_v51 = vmax.f32 %v961_v47, 0.0  ;;  %v954_v47 = vld [vmem:[%s12431_s0 + $0x420] sm:$0xff] }
 0x10c   : > { %1943 = vmatmul.mubr.bf16.gmra.mrb[36].mxu1 %v1294_v42  ;;  %v1041_v42 = vmax.f32 %v841_v37, 0.0 }
 0x10d   : > { %1950 = vmatprep.mubr.bf16.mxu1 %v1303_v45  ;;  %v1224_v45 = vpack.c.bf16 %v1032_v41, %v1024_v39  ;;  %v1145_v39 = vmax.f32 %v945_v34, 0.0  ;;  %v946_v34 = vld [vmem:[%s12431_s0 + $0x3e0] sm:$0xff] }
 0x10e   : > { %2183 = vmatmul.mubr.bf16.gmra.mrb[20].mxu0 %v1266_v6  ;;  %v1233_v46 = vpack.c.bf16 %v1049_v44, %v1041_v42  ;;  %v936_v44 = vld [vmem:[%s12431_s0 + $0x390] sm:$0xff] }
 0x10f   : > { %2190 = vmatprep.mubr.bf16.mxu0 %v1275_v8  ;;  %v1089_v8 = vmax.f32 %v889_v5, 0.0  ;;  %v1136_v48 = vmax.f32 %v936_v44, 0.0 }
 0x114   : > { %1951 = vmatmul.mubr.bf16.gmra.mrb[40].mxu1 %v1302_v0 }
 0x115   : > { %1958 = vmatprep.mubr.bf16.mxu1 %v1311_v1 }
 0x116   : > { %2191 = vmatmul.mubr.bf16.gmra.mrb[24].mxu0 %v1274_v26  ;;  %v1121_v26 = vmax.f32 %v921_v22, 0.0 }
 0x11c   : > { %1959 = vmatmul.mubr.bf16.gmra.mrb[44].mxu1 %v1310_v19 }
 0x11d   : > { %1966 = vmatprep.mubr.bf16.mxu1 %v1319_v20 }
 0x124   : > { %1967 = vmatmul.mubr.bf16.gmra.mrb[48].mxu1 %v1318_v30  ;;  %v928_v30 = vld [vmem:[%s12431_s0 + $0x350] sm:$0xff] }
 0x125   : > { %2006 = vmatprep.mubr.bf16.mxu1 %v1225_v32  ;;  %v937_v32 = vld [vmem:[%s12431_s0 + $0x398] sm:$0xff]  ;;  %v1128_v37 = vmax.f32 %v928_v30, 0.0 }
 0x126   : > { %v1137_v38 = vmax.f32 %v937_v32, 0.0  ;;  %v938_v32 = vld [vmem:[%s12431_s0 + $0x3a0] sm:$0xff] }
 0x128   : > { %v1281_v42 = vpack.c.bf16 %v1145_v39, %v1137_v38  ;;  %v1138_v38 = vmax.f32 %v938_v32, 0.0  ;;  %v1146_v39 = vmax.f32 %v946_v34, 0.0 }
 0x12a   : > { %v1282_v44 = vpack.c.bf16 %v1146_v39, %v1138_v38  ;;  %v1002_v38 = vld [vmem:[%s12431_s0 + $0x5a0] sm:$0xff] }
 0x12b   : > { %v1010_v39 = vld [vmem:[%s12431_s0 + $0x5e0] sm:$0xff] }
 0x12c   : > { %2007 = vmatmul.mubr.bf16.vlgmr.msra.gmra.mrb[52].mxu1 %v1224_v45  ;;  %v944_v45 = vld [vmem:[%s12431_s0 + $0x3d0] sm:$0xff] }
 0x12d   : > { %8420 = vmatpush3.bf16.msra.mxu1 %v9341_v56  ;;  %2014 = vmatprep.mubr.bf16.mxu1 %v1233_v46  ;;  %v873_v56 = vld [vmem:[%s12431_s0 + $0x198] sm:$0xff]  ;;  %v1144_v49 = vmax.f32 %v944_v45, 0.0 }
 0x12e   : > { %8413 = vmatprep.subr.bf16.mxu1 %v9350_v61  ;;  %v881_v61 = vld [vmem:[%s12431_s0 + $0x1d8] sm:$0xff]  ;;  %v1073_v63 = vmax.f32 %v873_v56, 0.0 }
 0x12f   : > { %v1081_v0 = vmax.f32 %v881_v61, 0.0  ;;  %v953_v46 = vld [vmem:[%s12431_s0 + $0x418] sm:$0xff]  ;;  %v1280_v52 = vpack.c.bf16 %v1144_v49, %v1136_v48  ;;  %v962_v48 = vld [vmem:[%s12431_s0 + $0x460] sm:$0xff] }
 0x130   : > { %v1153_v50 = vmax.f32 %v953_v46, 0.0  ;;  %v8763_v45 = vld [vmem:[%s9275_s15 + $0x180] sm:$0xff]   ;;  %v8764_v49 = vld [vmem:[%s9275_s15 + $0x1c8] sm:$0xff]  }
 0x131   : > { %8421 = vmatpush3.bf16.msra.mxu1 %v9364_v4  ;;  %v1056_v4 = vmax.f32 %v856_v59, 0.0  ;;  %v1249_v2 = vpack.c.bf16 %v1081_v0, %v1073_v63  ;;  %v977_v59 = vld [vmem:[%s12431_s0 + $0x4d8] sm:$0xff]  ;;  %v968_v0 = vld [vmem:[%s12431_s0 + $0x490] sm:$0xff] }
 0x132   : > { %8414 = vmatprep.subr.bf16.mxu1 %v9369_v7  ;;  %v880_v7 = vld [vmem:[%s12431_s0 + $0x1d0] sm:$0xff]  ;;  %v1289_v53 = vpack.c.bf16 %v1161_v51, %v1153_v50  ;;  %v971_v50 = vld [vmem:[%s12431_s0 + $0x4a8] sm:$0xff] }
 0x133   : > { %v1240_v1 = vpack.c.bf16 %v1064_v62, %v1056_v4  ;;  %v1080_v6 = vmax.f32 %v880_v7, 0.0  ;;  %v1177_v4 = vmax.f32 %v977_v59, 0.0  ;;  %v1168_v7 = vmax.f32 %v968_v0, 0.0  ;;  %v979_v51 = vld [vmem:[%s12431_s0 + $0x4e8] sm:$0xff] }
 0x134   : > { %2015 = vmatmul.mubr.bf16.gmra.mrb[56].mxu1 %v1232_v57  ;;  %v960_v57 = vld [vmem:[%s12431_s0 + $0x450] sm:$0xff]  ;;  %v8766_v59 = vld [vmem:[%s9275_s15 + $0x1d0] sm:$0xff]  }
 0x135   : > { %2022 = vmatprep.mubr.bf16.mxu1 %v1241_v58  ;;  %8422 = vmatpush3.bf16.msra.mxu1 %v9372_v9  ;;  %v897_v9 = vld [vmem:[%s12431_s0 + $0x258] sm:$0xff]  ;;  %v1160_v56 = vmax.f32 %v960_v57, 0.0  ;;  %v1171_v57 = vmax.f32 %v971_v50, 0.0  ;;  %v8777_v50 = vld [vmem:[%s9275_s15 + $0x1b8] sm:$0xff]  }
 0x136   : > { %8415 = vmatprep.subr.bf16.mxu1 %v9376_v13  ;;  %v1072_v13 = vmax.f32 %v872_v3, 0.0  ;;  %v1097_v10 = vmax.f32 %v897_v9, 0.0  ;;  %v969_v58 = vld [vmem:[%s12431_s0 + $0x498] sm:$0xff] }
 0x137   : > { %v1169_v61 = vmax.f32 %v969_v58, 0.0  ;;  %v1288_v62 = vpack.c.bf16 %v1160_v56, %v1152_v60  ;;  %v993_v3 = vld [vmem:[%s12431_s0 + $0x558] sm:$0xff]  ;;  %v1179_v58 = vmax.f32 %v979_v51, 0.0 }
 0x138   : > { %v1257_v11 = vpack.c.bf16 %v1097_v10, %v1089_v8  ;;  %v984_v10 = vld [vmem:[%s12431_s0 + $0x510] sm:$0xff] }
 0x139   : > { %8423 = vmatpush3.bf16.msra.mxu1 %v9388_v17  ;;  %v1248_v17 = vpack.c.bf16 %v1080_v6, %v1072_v13  ;;  %v1297_v63 = vpack.c.bf16 %v1177_v4, %v1169_v61  ;;  %v1193_v13 = vmax.f32 %v993_v3, 0.0  ;;  %v1299_v0 = vpack.c.bf16 %v1179_v58, %v1171_v57 }
 0x13a   : > { %8416 = vmatprep.subr.bf16.mxu1 %v9399_v23  ;;  %v896_v23 = vld [vmem:[%s12431_s0 + $0x250] sm:$0xff] }
 0x13b   : > { %v1096_v15 = vmax.f32 %v896_v23, 0.0  ;;  %v1184_v23 = vmax.f32 %v984_v10, 0.0  ;;  %v8769_v10 = vld [vmem:[%s9275_s15 + $0x198] sm:$0xff]  }
 0x13c   : > { %2023 = vmatmul.mubr.bf16.gmra.mrb[60].mxu1 %v1240_v1  ;;  %v976_v1 = vld [vmem:[%s12431_s0 + $0x4d0] sm:$0xff] }
 0x13d   : > { %2030 = vmatprep.mubr.bf16.mxu1 %v1249_v2  ;;  %8424 = vmatpush3.bf16.msra.mxu1 %v9404_v25  ;;  %v913_v25 = vld [vmem:[%s12431_s0 + $0x2d8] sm:$0xff]  ;;  %v1176_v5 = vmax.f32 %v976_v1, 0.0  ;;  %v970_v1 = vld [vmem:[%s12431_s0 + $0x4a0] sm:$0xff] }
 0x13e   : > { %8417 = vmatprep.subr.bf16.mxu1 %v9409_v31  ;;  %v1088_v31 = vmax.f32 %v888_v12, 0.0  ;;  %v1113_v18 = vmax.f32 %v913_v25, 0.0  ;;  %v985_v2 = vld [vmem:[%s12431_s0 + $0x518] sm:$0xff] }
 0x13f   : > { %v1185_v9 = vmax.f32 %v985_v2, 0.0  ;;  %v1296_v6 = vpack.c.bf16 %v1176_v5, %v1168_v7  ;;  %v1009_v12 = vld [vmem:[%s12431_s0 + $0x5d8] sm:$0xff]  ;;  %v978_v2 = vld [vmem:[%s12431_s0 + $0x4e0] sm:$0xff]  ;;  %v8768_v7 = vld [vmem:[%s9275_s15 + $0x1d8] sm:$0xff]  }
 0x140   : > { %v1256_v19 = vpack.c.bf16 %v1096_v15, %v1088_v31  ;;  %v1265_v20 = vpack.c.bf16 %v1113_v18, %v1105_v16  ;;  %v1209_v31 = vmax.f32 %v1009_v12, 0.0  ;;  %v1000_v18 = vld [vmem:[%s12431_s0 + $0x590] sm:$0xff]  ;;  %v987_v5 = vld [vmem:[%s12431_s0 + $0x528] sm:$0xff] }
 0x141   : > { %8425 = vmatpush3.bf16.msra.mxu1 %v9416_v33  ;;  %v8762_v33 = vld [vmem:[%s9275_s15 + $0x1c0] sm:$0xff]   ;;  %v1305_v8 = vpack.c.bf16 %v1193_v13, %v1185_v9  ;;  %v995_v9 = vld [vmem:[%s12431_s0 + $0x568] sm:$0xff] }
 0x142   : > { %8418 = vmatprep.subr.bf16.mxu1 %v9420_v35  ;;  %v912_v35 = vld [vmem:[%s12431_s0 + $0x2d0] sm:$0xff] }
 0x143   : > { %v1112_v24 = vmax.f32 %v912_v35, 0.0  ;;  %v8770_v12 = vld [vmem:[%s9275_s15 + $0x1e0] sm:$0xff]  }
 0x144   : > { %2031 = vmatmul.mubr.bf16.gmra.mrb[64].mxu1 %v1248_v17  ;;  %v992_v17 = vld [vmem:[%s12431_s0 + $0x550] sm:$0xff] }
 0x145   : > { %2038 = vmatprep.mubr.bf16.mxu1 %v1257_v11  ;;  %8426 = vmatpush3.bf16.msra.mxu1 %v9434_v40  ;;  %v929_v40 = vld [vmem:[%s12431_s0 + $0x358] sm:$0xff]  ;;  %v1192_v14 = vmax.f32 %v992_v17, 0.0  ;;  %v1187_v17 = vmax.f32 %v987_v5, 0.0 }
 0x146   : > { %8419 = vmatprep.subr.bf16.mxu1 %v9438_v43  ;;  %v1104_v43 = vmax.f32 %v904_v21, 0.0  ;;  %v1129_v27 = vmax.f32 %v929_v40, 0.0  ;;  %v1001_v11 = vld [vmem:[%s12431_s0 + $0x598] sm:$0xff] }
 0x147   : > { %v1201_v25 = vmax.f32 %v1001_v11, 0.0  ;;  %v1304_v15 = vpack.c.bf16 %v1192_v14, %v1184_v23  ;;  %v1195_v11 = vmax.f32 %v995_v9, 0.0 }
 0x148   : > { %v1264_v28 = vpack.c.bf16 %v1112_v24, %v1104_v43  ;;  %v1273_v29 = vpack.c.bf16 %v1129_v27, %v1121_v26  ;;  %v1016_v43 = vld [vmem:[%s12431_s0 + $0x610] sm:$0xf]  ;;  %v939_v24 = vld [vmem:[%s12431_s0 + $0x3a8] sm:$0xff] }
 0x149   : > { %8427 = vmatpush3.bf16.msra.mxu1 %v9454_v54  ;;  %v920_v54 = vld [vmem:[%s12431_s0 + $0x310] sm:$0xff]  ;;  %v1313_v16 = vpack.c.bf16 %v1209_v31, %v1201_v25  ;;  %v947_v26 = vld [vmem:[%s12431_s0 + $0x3e8] sm:$0xff]  ;;  %v1216_v27 = vmax.f32 %v1016_v43, 0.0 }
 0x14a   : > { %7517 = vmatprep.subr.bf16.mxu1 %v8762_v33  ;;  %v1120_v36 = vmax.f32 %v920_v54, 0.0  ;;  %v1008_v33 = vld [vmem:[%s12431_s0 + $0x5d0] sm:$0xff] }
 0x14b   : > { %v1208_v21 = vmax.f32 %v1008_v33, 0.0  ;;  %v1320_v54 = vpack.c.bf16 %v1216_v27, %v1216_v27  ;;  %v994_v33 = vld [vmem:[%s12431_s0 + $0x560] sm:$0xff] }
 0x14c   : > { %2039 = vmatmul.mubr.bf16.gmra.mrb[68].mxu1 %v1256_v19  ;;  %v1272_v41 = vpack.c.bf16 %v1128_v37, %v1120_v36  ;;  %v1017_v19 = vld [vmem:[%s12431_s0 + $0x618] sm:$0xf]  ;;  %v955_v36 = vld [vmem:[%s12431_s0 + $0x428] sm:$0xff] }
 0x14d   : > { %2046 = vmatprep.mubr.bf16.mxu1 %v1265_v20  ;;  %v1200_v20 = vmax.f32 %v1000_v18, 0.0  ;;  %v1217_v35 = vmax.f32 %v1017_v19, 0.0  ;;  %v963_v37 = vld [vmem:[%s12431_s0 + $0x468] sm:$0xff]  ;;  %v986_v18 = vld [vmem:[%s12431_s0 + $0x520] sm:$0xff]  ;;  %v8771_v19 = vld [vmem:[%s9275_s15 + $0x1a0] sm:$0xff]  }
 0x14e   : > { %v1186_v43 = vmax.f32 %v986_v18, 0.0 }
 0x14f   : > { %v1312_v22 = vpack.c.bf16 %v1208_v21, %v1200_v20  ;;  %v1321_v40 = vpack.c.bf16 %v1217_v35, %v1217_v35  ;;  %v8772_v21 = vld [vmem:[%s9275_s15 + $0x1e8] sm:$0xff]   ;;  %v1003_v35 = vld [vmem:[%s12431_s0 + $0x5a8] sm:$0xff] }
 0x154   : > { %2047 = vmatmul.mubr.bf16.gmra.mrb[72].mxu1 %v1264_v28  ;;  %v1139_v28 = vmax.f32 %v939_v24, 0.0  ;;  %v1194_v24 = vmax.f32 %v994_v33, 0.0 }
 0x155   : > { %2054 = vmatprep.mubr.bf16.mxu1 %v1273_v29  ;;  %v1147_v29 = vmax.f32 %v947_v26, 0.0  ;;  %v1203_v26 = vmax.f32 %v1003_v35, 0.0 }
 0x156   : > { %v1306_v32 = vpack.c.bf16 %v1194_v24, %v1186_v43  ;;  %v852_v43 = vld [vmem:[%s12431_s0 + $0xf0] sm:$0xff] }
 0x157   : > { %v1283_v30 = vpack.c.bf16 %v1147_v29, %v1139_v28  ;;  %v8773_v28 = vld [vmem:[%s9275_s15 + $0x1a8] sm:$0xff]   ;;  %v8774_v29 = vld [vmem:[%s9275_s15 + $0x1f0] sm:$0xff]  }
 0x15c   : > { %2055 = vmatmul.mubr.bf16.gmra.mrb[76].mxu1 %v1272_v41  ;;  %v1155_v41 = vmax.f32 %v955_v36, 0.0 }
 0x15d   : > { %2062 = vmatprep.mubr.bf16.mxu1 %v1281_v42  ;;  %v1163_v42 = vmax.f32 %v963_v37, 0.0 }
 0x15f   : > { %v1291_v46 = vpack.c.bf16 %v1163_v42, %v1155_v41  ;;  %v8775_v41 = vld [vmem:[%s9275_s15 + $0x1b0] sm:$0xff]  }
 0x164   : > { %2063 = vmatmul.mubr.bf16.gmra.mrb[80].mxu1 %v1280_v52  ;;  %v1154_v52 = vmax.f32 %v954_v47, 0.0  ;;  %v1202_v47 = vmax.f32 %v1002_v38, 0.0 }
 0x165   : > { %2070 = vmatprep.mubr.bf16.mxu1 %v1289_v53  ;;  %v1162_v53 = vmax.f32 %v962_v48, 0.0  ;;  %v1210_v48 = vmax.f32 %v1010_v39, 0.0 }
 0x167   : > { %v1290_v61 = vpack.c.bf16 %v1162_v53, %v1154_v52  ;;  %v1314_v53 = vpack.c.bf16 %v1210_v48, %v1202_v47 }
 0x16c   : > { %2071 = vmatmul.mubr.bf16.gmra.mrb[84].mxu1 %v1288_v62 }
 0x16d   : > { %2078 = vmatprep.mubr.bf16.mxu1 %v1297_v63  ;;  %v8767_v63 = vld [vmem:[%s9275_s15 + $0x190] sm:$0xff]  }
 0x174   : > { %2079 = vmatmul.mubr.bf16.gmra.mrb[88].mxu1 %v1296_v6  ;;  %v1170_v6 = vmax.f32 %v970_v1, 0.0 }
 0x175   : > { %2086 = vmatprep.mubr.bf16.mxu1 %v1305_v8  ;;  %v1178_v8 = vmax.f32 %v978_v2, 0.0 }
 0x177   : > { %v1298_v25 = vpack.c.bf16 %v1178_v8, %v1170_v6  ;;  %v828_v8 = vld [vmem:[%s12431_s0 + $0x30] sm:$0xff] }
 0x17c   : > { %2087 = vmatmul.mubr.bf16.gmra.mrb[92].mxu1 %v1304_v15 }
 0x17d   : > { %2094 = vmatprep.mubr.bf16.mxu1 %v1313_v16  ;;  %v1307_v16 = vpack.c.bf16 %v1195_v11, %v1187_v17  ;;  %v845_v11 = vld [vmem:[%s12431_s0 + $0xb8] sm:$0xff] }
 0x184   : > { %2095 = vmatmul.mubr.bf16.gmra.mrb[96].mxu1 %v1312_v22  ;;  %v1011_v22 = vld [vmem:[%s12431_s0 + $0x5e8] sm:$0xff] }
 0x185   : > { %2102 = vmatprep.mubr.bf16.mxu1 %v1321_v40  ;;  %v1211_v27 = vmax.f32 %v1011_v22, 0.0  ;;  %v844_v22 = vld [vmem:[%s12431_s0 + $0xb0] sm:$0xff] }
 0x187   : > { %v1315_v37 = vpack.c.bf16 %v1211_v27, %v1203_v26  ;;  %v861_v27 = vld [vmem:[%s12431_s0 + $0x138] sm:$0xff] }
 0x188   : > { %v1061_v39 = vmax.f32 %v861_v27, 0.0 }
 0x18c   : > { %2103 = vmatmul.mubr.bf16.gmra.mrb[100].mxu1 %v1320_v54 }
 0x18d   : > { %2198 = vmatprep.mubr.bf16.mxu1 %v1283_v30 }
 0x194   : > { %2199 = vmatmul.mubr.bf16.vlgmr.msra.gmra.mrb[104].mxu1 %v1282_v44  ;;  %v1019_v44 = vld [vmem:[%s12431_s0 + $0x628] sm:$0xf] }
 0x195   : > { %7518 = vmatpush3.bf16.msra.mxu1 %v8763_v45  ;;  %2206 = vmatprep.mubr.bf16.mxu1 %v1291_v46  ;;  %v8776_v45 = vld [vmem:[%s9275_s15 + $0x1f8] sm:$0xff]   ;;  %s813_s15 = scalar_lea.vmem %s12434_s3, %s10467_s24 }
 0x196   : > { %7519 = vmatprep.subr.bf16.mxu1 %v8764_v49  ;;  %v1219_v49 = vmax.f32 %v1019_v44, 0.0 }
 0x197   : > { %v7251_v60 = vpop.f32.mrb[0].mxu1 }
 0x198   : > { %v7252_v56 = vpop.f32.mrb[1].mxu1  ;;  %v1323_v58 = vpack.c.bf16 %v1219_v49, %v1219_v49 }
 0x199   : > { %v9802_v4 = vadd.f32 %v7252_v56, %v7251_v60  ;;  %v7254_v62 = vpop.f32.mrb[2].mxu1  ;;  %7520 = vmatpush3.bf16.msra.mxu1 %v8765_v55  ;;  %v829_v56 = vld [vmem:[%s12431_s0 + $0x38] sm:$0xff] }
 0x19a   : > { %v7255_v3 = vpop.f32.mrb[3].mxu1  ;;  %7521 = vmatprep.subr.bf16.mxu1 %v8766_v59  ;;  %v1018_v59 = vld [vmem:[%s12431_s0 + $0x620] sm:$0xf] }
 0x19b   : > { %v9818_v13 = vadd.f32 %v7255_v3, %v7254_v62 }
 0x19c   : > { %2207 = vmatmul.mubr.bf16.gmra.mrb[108].mxu1 %v1290_v61  ;;  %v837_v61 = vld [vmem:[%s12431_s0 + $0x78] sm:$0xff] }
 0x19d   : > { %7522 = vmatpush3.bf16.msra.mxu1 %v8767_v63  ;;  %2214 = vmatprep.mubr.bf16.mxu1 %v1299_v0  ;;  %v1218_v63 = vmax.f32 %v1018_v59, 0.0  ;;  %v1029_v0 = vmax.f32 %v829_v56, 0.0  ;;  %v1037_v1 = vmax.f32 %v837_v61, 0.0  ;;  %v885_v59 = vld [vmem:[%s12431_s0 + $0x1f8] sm:$0xff] }
 0x19e   : > { %7523 = vmatprep.subr.bf16.mxu1 %v8768_v7 }
 0x19f   : > { %v7257_v23 = vpop.f32.mrb[4].mxu1  ;;  %v1322_v7 = vpack.c.bf16 %v1218_v63, %v1218_v63  ;;  %v1229_v6 = vpack.c.bf16 %v1037_v1, %v1029_v0 }
 0x1a0   : > { %v7258_v14 = vpop.f32.mrb[5].mxu1 }
 0x1a1   : > { %v9822_v31 = vadd.f32 %v7258_v14, %v7257_v23  ;;  %v7260_v15 = vpop.f32.mrb[6].mxu1  ;;  %7524 = vmatpush3.bf16.msra.mxu1 %v8769_v10  ;;  %v836_v10 = vld [vmem:[%s12431_s0 + $0x70] sm:$0xff]  ;;  %v1028_v14 = vmax.f32 %v828_v8, 0.0 }
 0x1a2   : > { %v7261_v20 = vpop.f32.mrb[7].mxu1  ;;  %7525 = vmatprep.subr.bf16.mxu1 %v8770_v12  ;;  %v853_v12 = vld [vmem:[%s12431_s0 + $0xf8] sm:$0xff] }
 0x1a3   : > { %v9838_v40 = vadd.f32 %v7261_v20, %v7260_v15  ;;  %v1045_v15 = vmax.f32 %v845_v11, 0.0 }
 0x1a4   : > { %2215 = vmatmul.mubr.bf16.gmra.mrb[112].mxu1 %v1298_v25  ;;  %v1036_v25 = vmax.f32 %v836_v10, 0.0 }
 0x1a5   : > { %2222 = vmatprep.mubr.bf16.mxu1 %v1307_v16  ;;  %7526 = vmatpush3.bf16.msra.mxu1 %v8771_v19  ;;  %v1053_v16 = vmax.f32 %v853_v12, 0.0 }
 0x1a6   : > { %7527 = vmatprep.subr.bf16.mxu1 %v8772_v21  ;;  %v1228_v19 = vpack.c.bf16 %v1036_v25, %v1028_v14  ;;  %v876_v14 = vld [vmem:[%s12431_s0 + $0x1b0] sm:$0xff] }
 0x1a7   : > { %v7263_v54 = vpop.f32.mrb[8].mxu1  ;;  %v1237_v35 = vpack.c.bf16 %v1053_v16, %v1045_v15  ;;  %v884_v25 = vld [vmem:[%s12431_s0 + $0x1f0] sm:$0xff] }
 0x1a8   : > { %v7264_v30 = vpop.f32.mrb[9].mxu1 }
 0x1a9   : > { %v9842_v34 = vadd.f32 %v7264_v30, %v7263_v54  ;;  %v7266_v36 = vpop.f32.mrb[10].mxu1  ;;  %7528 = vmatpush3.bf16.msra.mxu1 %v8773_v28  ;;  %v869_v28 = vld [vmem:[%s12431_s0 + $0x178] sm:$0xff] }
 0x1aa   : > { %v7267_v42 = vpop.f32.mrb[11].mxu1  ;;  %7529 = vmatprep.subr.bf16.mxu1 %v8774_v29 }
 0x1ab   : > { %v9855_v46 = vadd.f32 %v7267_v42, %v7266_v36  ;;  %v1044_v36 = vmax.f32 %v844_v22, 0.0 }
 0x1ac   : > { %2223 = vmatmul.mubr.bf16.gmra.mrb[116].mxu1 %v1306_v32 }
 0x1ad   : > { %2230 = vmatprep.mubr.bf16.mxu1 %v1315_v37  ;;  %7530 = vmatpush3.bf16.msra.mxu1 %v8775_v41  ;;  %v1052_v37 = vmax.f32 %v852_v43, 0.0  ;;  %v1069_v41 = vmax.f32 %v869_v28, 0.0  ;;  %v1076_v43 = vmax.f32 %v876_v14, 0.0  ;;  %v916_v14 = vld [vmem:[%s12431_s0 + $0x2f0] sm:$0xff] }
 0x1ae   : > { %7531 = vmatprep.subr.bf16.mxu1 %v8776_v45 }
 0x1af   : > { %v7269_v51 = vpop.f32.mrb[12].mxu1  ;;  %v1236_v47 = vpack.c.bf16 %v1052_v37, %v1044_v36 }
 0x1b0   : > { %v7270_v52 = vpop.f32.mrb[13].mxu1 }
 0x1b1   : > { %v9858_v55 = vadd.f32 %v7270_v52, %v7269_v51  ;;  %v7272_v57 = vpop.f32.mrb[14].mxu1  ;;  %7532 = vmatpush3.bf16.msra.mxu1 %v8777_v50  ;;  %v1245_v50 = vpack.c.bf16 %v1069_v41, %v1061_v39  ;;  %v860_v51 = vld [vmem:[%s12431_s0 + $0x130] sm:$0xff] }
 0x1b2   : > { %v7273_v60 = vpop.f32.mrb[15].mxu1  ;;  %v868_v52 = vld [vmem:[%s12431_s0 + $0x170] sm:$0xff]  ;;  %v1060_v0 = vmax.f32 %v860_v51, 0.0  ;;  %v917_v51 = vld [vmem:[%s12431_s0 + $0x2f8] sm:$0xff] }
 0x1b3   : > { %v9869_v62 = vadd.f32 %v7273_v60, %v7272_v57  ;;  %v1068_v1 = vmax.f32 %v868_v52, 0.0 }
 0x1b4   : > { %2231 = vmatmul.mubr.bf16.gmra.mrb[120].mxu1 %v1314_v53 }
 0x1b5   : > { %2238 = vmatprep.mubr.bf16.mxu1 %v1323_v58  ;;  %v877_v58 = vld [vmem:[%s12431_s0 + $0x1b8] sm:$0xff]  ;;  %v1244_v10 = vpack.c.bf16 %v1068_v1, %v1060_v0  ;;  %v1117_v1 = vmax.f32 %v917_v51, 0.0 }
 0x1b7   : > { %v7275_v2 = vpop.f32.mrb[16].mxu1 }
 0x1b8   : > { %v7276_v3 = vpop.f32.mrb[17].mxu1 }
 0x1b9   : > { %v9871_v5 = vadd.f32 %v7276_v3, %v7275_v2  ;;  %v7278_v9 = vpop.f32.mrb[18].mxu1  ;;  %v7439_v24 = vpop.f32.mrb[0].mxu0  ;;  %v1077_v3 = vmax.f32 %v877_v58, 0.0 }
 0x1ba   : > { %v7279_v17 = vpop.f32.mrb[19].mxu1  ;;  %v7440_v29 = vpop.f32.mrb[1].mxu0 }
 0x1bb   : > { %v9885_v23 = vadd.f32 %v7279_v17, %v7278_v9  ;;  %v9903_v30 = vadd.f32 %v7440_v29, %v7439_v24  ;;  %v7442_v32 = vpop.f32.mrb[2].mxu0  ;;  %v1084_v24 = vmax.f32 %v884_v25, 0.0 }
 0x1bc   : > { %2239 = vmatmul.mubr.bf16.gmra.mrb[124].mxu1 %v1322_v7  ;;  %v7443_v38 = vpop.f32.mrb[3].mxu0  ;;  %v1085_v7 = vmax.f32 %v885_v59, 0.0 }
 0x1bd   : > { %2278 = vmatprep.mubr.bf16.mxu1 %v1229_v6  ;;  %v9905_v42 = vadd.f32 %v7443_v38, %v7442_v32  ;;  %v1252_v37 = vpack.c.bf16 %v1084_v24, %v1076_v43 }
 0x1be   : > { %v1253_v12 = vpack.c.bf16 %v1085_v7, %v1077_v3 }
 0x1bf   : > { %v7281_v18 = vpop.f32.mrb[20].mxu1 }
 0x1c0   : > { %v7282_v33 = vpop.f32.mrb[21].mxu1 }
 0x1c1   : > { %v9887_v20 = vadd.f32 %v7282_v33, %v7281_v18  ;;  %v7284_v21 = vpop.f32.mrb[22].mxu1  ;;  %v7445_v53 = vpop.f32.mrb[4].mxu0  ;;  %v893_v18 = vld [vmem:[%s12431_s0 + $0x238] sm:$0xff] }
 0x1c2   : > { %v7285_v26 = vpop.f32.mrb[23].mxu1  ;;  %v7446_v60 = vpop.f32.mrb[5].mxu0  ;;  %v901_v33 = vld [vmem:[%s12431_s0 + $0x278] sm:$0xff]  ;;  %v1093_v27 = vmax.f32 %v893_v18, 0.0 }
 0x1c3   : > { %v9901_v54 = vadd.f32 %v7285_v26, %v7284_v21  ;;  %v9923_v61 = vadd.f32 %v7446_v60, %v7445_v53  ;;  %v7448_v63 = vpop.f32.mrb[6].mxu0  ;;  %v1101_v28 = vmax.f32 %v901_v33, 0.0  ;;  %v933_v18 = vld [vmem:[%s12431_s0 + $0x378] sm:$0xff] }
 0x1c4   : > { %2279 = vmatmul.mubr.bf16.vlgmr.msra.gmra.mrb[128].mxu1 %v1228_v19  ;;  %v7449_v2 = vpop.f32.mrb[7].mxu0 }
 0x1c5   : > { %2286 = vmatprep.mubr.bf16.mxu1 %v1237_v35  ;;  %v9925_v9 = vadd.f32 %v7449_v2, %v7448_v63  ;;  %v1261_v41 = vpack.c.bf16 %v1101_v28, %v1093_v27 }
 0x1c7   : > { %v7287_v44 = vpop.f32.mrb[24].mxu1 }
 0x1c8   : > { %v7288_v45 = vpop.f32.mrb[25].mxu1 }
 0x1c9   : > { %v9907_v48 = vadd.f32 %v7288_v45, %v7287_v44  ;;  %v7290_v49 = vpop.f32.mrb[26].mxu1  ;;  %v7451_v15 = vpop.f32.mrb[8].mxu0  ;;  %v892_v44 = vld [vmem:[%s12431_s0 + $0x230] sm:$0xff] }
 0x1ca   : > { %v7291_v57 = vpop.f32.mrb[27].mxu1  ;;  %v7452_v19 = vpop.f32.mrb[9].mxu0  ;;  %v900_v45 = vld [vmem:[%s12431_s0 + $0x270] sm:$0xff]  ;;  %v1092_v59 = vmax.f32 %v892_v44, 0.0 }
 0x1cb   : > { %v9921_v56 = vadd.f32 %v7291_v57, %v7290_v49  ;;  %v9943_v35 = vadd.f32 %v7452_v19, %v7451_v15  ;;  %v7454_v22 = vpop.f32.mrb[10].mxu0  ;;  %v1100_v60 = vmax.f32 %v900_v45, 0.0 }
 0x1cc   : > { %2287 = vmatmul.mubr.bf16.gmra.mrb[132].mxu1 %v1236_v47  ;;  %v7455_v26 = vpop.f32.mrb[11].mxu0 }
 0x1cd   : > { %2294 = vmatprep.mubr.bf16.mxu1 %v1245_v50  ;;  %v9945_v29 = vadd.f32 %v7455_v26, %v7454_v22  ;;  %v909_v50 = vld [vmem:[%s12431_s0 + $0x2b8] sm:$0xff]  ;;  %v1116_v26 = vmax.f32 %v916_v14, 0.0 }
 0x1ce   : > { %v1109_v0 = vmax.f32 %v909_v50, 0.0  ;;  %v932_v50 = vld [vmem:[%s12431_s0 + $0x370] sm:$0xff] }
 0x1cf   : > { %v7293_v6 = vpop.f32.mrb[28].mxu1 }
 0x1d0   : > { %v7294_v8 = vpop.f32.mrb[29].mxu1 }
 0x1d1   : > { %v9927_v17 = vadd.f32 %v7294_v8, %v7293_v6  ;;  %v7296_v11 = vpop.f32.mrb[30].mxu1  ;;  %v7457_v47 = vpop.f32.mrb[12].mxu0  ;;  %v1260_v6 = vpack.c.bf16 %v1100_v60, %v1092_v59  ;;  %v949_v59 = vld [vmem:[%s12431_s0 + $0x3f8] sm:$0xff] }
 0x1d2   : > { %v7297_v16 = vpop.f32.mrb[31].mxu1  ;;  %v7458_v52 = vpop.f32.mrb[13].mxu0 }
 0x1d3   : > { %v9941_v21 = vadd.f32 %v7297_v16, %v7296_v11  ;;  %v9963_v57 = vadd.f32 %v7458_v52, %v7457_v47  ;;  %v7460_v58 = vpop.f32.mrb[14].mxu0  ;;  %v1269_v11 = vpack.c.bf16 %v1117_v1, %v1109_v0  ;;  %v925_v16 = vld [vmem:[%s12431_s0 + $0x338] sm:$0xff] }
 0x1d4   : > { %2295 = vmatmul.mubr.bf16.gmra.mrb[136].mxu1 %v1244_v10  ;;  %v7461_v63 = vpop.f32.mrb[15].mxu0  ;;  %v1125_v28 = vmax.f32 %v925_v16, 0.0 }
 0x1d5   : > { %2302 = vmatprep.mubr.bf16.mxu1 %v1253_v12  ;;  %v9965_v2 = vadd.f32 %v7461_v63, %v7460_v58  ;;  %v908_v12 = vld [vmem:[%s12431_s0 + $0x2b0] sm:$0xff]  ;;  %v941_v58 = vld [vmem:[%s12431_s0 + $0x3b8] sm:$0xff] }
 0x1d6   : > { %v1108_v24 = vmax.f32 %v908_v12, 0.0 }
 0x1d7   : > { %v7299_v32 = vpop.f32.mrb[32].mxu1 }
 0x1d8   : > { %v7300_v36 = vpop.f32.mrb[33].mxu1 }
 0x1d9   : > { %v9947_v38 = vadd.f32 %v7300_v36, %v7299_v32  ;;  %v7302_v39 = vpop.f32.mrb[34].mxu1  ;;  %v7463_v25 = vpop.f32.mrb[16].mxu0  ;;  %v1133_v32 = vmax.f32 %v933_v18, 0.0 }
 0x1da   : > { %v7303_v49 = vpop.f32.mrb[35].mxu1  ;;  %v7464_v33 = vpop.f32.mrb[17].mxu0 }
 0x1db   : > { %v9961_v53 = vadd.f32 %v7303_v49, %v7302_v39  ;;  %v9983_v22 = vadd.f32 %v7464_v33, %v7463_v25  ;;  %v7466_v43 = vpop.f32.mrb[18].mxu0  ;;  %v1277_v47 = vpack.c.bf16 %v1133_v32, %v1125_v28  ;;  %v924_v49 = vld [vmem:[%s12431_s0 + $0x330] sm:$0xff]  ;;  %v957_v28 = vld [vmem:[%s12431_s0 + $0x438] sm:$0xff] }
 0x1dc   : > { %2303 = vmatmul.mubr.bf16.gmra.mrb[140].mxu1 %v1252_v37  ;;  %v7467_v27 = vpop.f32.mrb[19].mxu0  ;;  %v965_v32 = vld [vmem:[%s12431_s0 + $0x478] sm:$0xff] }
 0x1dd   : > { %2310 = vmatprep.mubr.bf16.mxu1 %v1261_v41  ;;  %v9985_v36 = vadd.f32 %v7467_v27, %v7466_v43  ;;  %v1268_v41 = vpack.c.bf16 %v1116_v26, %v1108_v24  ;;  %v940_v43 = vld [vmem:[%s12431_s0 + $0x3b0] sm:$0xff] }
 0x1de   : > { %v948_v24 = vld [vmem:[%s12431_s0 + $0x3f0] sm:$0xff] }
 0x1df   : > { %v7305_v3 = vpop.f32.mrb[36].mxu1 }
 0x1e0   : > { %v7306_v7 = vpop.f32.mrb[37].mxu1 }
 0x1e1   : > { %v9967_v8 = vadd.f32 %v7306_v7, %v7305_v3  ;;  %v7308_v10 = vpop.f32.mrb[38].mxu1  ;;  %v7469_v51 = vpop.f32.mrb[20].mxu0  ;;  %v1124_v3 = vmax.f32 %v924_v49, 0.0  ;;  %v1132_v7 = vmax.f32 %v932_v50, 0.0  ;;  %v1148_v49 = vmax.f32 %v948_v24, 0.0 }
 0x1e2   : > { %v7309_v15 = vpop.f32.mrb[39].mxu1  ;;  %v7470_v60 = vpop.f32.mrb[21].mxu0 }
 0x1e3   : > { %v9981_v19 = vadd.f32 %v7309_v15, %v7308_v10  ;;  %v10003_v0 = vadd.f32 %v7470_v60, %v7469_v51  ;;  %v7472_v1 = vpop.f32.mrb[22].mxu0  ;;  %v1141_v10 = vmax.f32 %v941_v58, 0.0  ;;  %v1276_v15 = vpack.c.bf16 %v1132_v7, %v1124_v3 }
 0x1e4   : > { %2311 = vmatmul.mubr.bf16.gmra.mrb[144].mxu1 %v1260_v6  ;;  %v7473_v6 = vpop.f32.mrb[23].mxu0  ;;  %v1157_v51 = vmax.f32 %v957_v28, 0.0 }
 0x1e5   : > { %2318 = vmatprep.mubr.bf16.mxu1 %v1269_v11  ;;  %v1149_v11 = vmax.f32 %v949_v59, 0.0  ;;  %v10005_v12 = vadd.f32 %v7473_v6, %v7472_v1 }
 0x1e7   : > { %v7311_v37 = vpop.f32.mrb[40].mxu1  ;;  %v1285_v33 = vpack.c.bf16 %v1149_v11, %v1141_v10  ;;  %v956_v10 = vld [vmem:[%s12431_s0 + $0x430] sm:$0xff] }
 0x1e8   : > { %v7312_v39 = vpop.f32.mrb[41].mxu1  ;;  %v964_v11 = vld [vmem:[%s12431_s0 + $0x470] sm:$0xff] }
 0x1e9   : > { %v9987_v44 = vadd.f32 %v7312_v39, %v7311_v37  ;;  %v7314_v45 = vpop.f32.mrb[42].mxu1  ;;  %v7475_v26 = vpop.f32.mrb[24].mxu0 }
 0x1ea   : > { %v7315_v52 = vpop.f32.mrb[43].mxu1  ;;  %v7476_v37 = vpop.f32.mrb[25].mxu0 }
 0x1eb   : > { %v10001_v63 = vadd.f32 %v7315_v52, %v7314_v45  ;;  %v7478_v45 = vpop.f32.mrb[26].mxu0  ;;  %v1165_v52 = vmax.f32 %v965_v32, 0.0 }
 0x1ec   : > { %2319 = vmatmul.mubr.bf16.gmra.mrb[148].mxu1 %v1268_v41  ;;  %v10023_v41 = vadd.f32 %v7476_v37, %v7475_v26  ;;  %v7479_v50 = vpop.f32.mrb[27].mxu0 }
 0x1ed   : > { %2326 = vmatprep.mubr.bf16.mxu1 %v1277_v47  ;;  %v1140_v47 = vmax.f32 %v940_v43, 0.0  ;;  %v10025_v58 = vadd.f32 %v7479_v50, %v7478_v45  ;;  %v1293_v6 = vpack.c.bf16 %v1165_v52, %v1157_v51  ;;  %v989_v51 = vld [vmem:[%s12431_s0 + $0x538] sm:$0xff] }
 0x1ee   : > { %v997_v52 = vld [vmem:[%s12431_s0 + $0x578] sm:$0xff] }
 0x1ef   : > { %v7317_v14 = vpop.f32.mrb[44].mxu1  ;;  %v1284_v1 = vpack.c.bf16 %v1148_v49, %v1140_v47  ;;  %v972_v47 = vld [vmem:[%s12431_s0 + $0x4b0] sm:$0xff] }
 0x1f0   : > { %v7318_v25 = vpop.f32.mrb[45].mxu1  ;;  %v980_v49 = vld [vmem:[%s12431_s0 + $0x4f0] sm:$0xff] }
 0x1f1   : > { %v10007_v16 = vadd.f32 %v7318_v25, %v7317_v14  ;;  %v7320_v18 = vpop.f32.mrb[46].mxu1  ;;  %v973_v25 = vld [vmem:[%s12431_s0 + $0x4b8] sm:$0xff] }
 0x1f2   : > { %v7321_v27 = vpop.f32.mrb[47].mxu1  ;;  %v1173_v43 = vmax.f32 %v973_v25, 0.0 }
 0x1f3   : > { %v10021_v39 = vadd.f32 %v7321_v27, %v7320_v18  ;;  %v1156_v18 = vmax.f32 %v956_v10, 0.0 }
 0x1f4   : > { %2327 = vmatmul.mubr.bf16.gmra.mrb[152].mxu1 %v1276_v15  ;;  %v981_v15 = vld [vmem:[%s12431_s0 + $0x4f8] sm:$0xff] }
 0x1f5   : > { %2334 = vmatprep.mubr.bf16.mxu1 %v1285_v33  ;;  %v1164_v33 = vmax.f32 %v964_v11, 0.0  ;;  %v1181_v24 = vmax.f32 %v981_v15, 0.0  ;;  %v1189_v11 = vmax.f32 %v989_v51, 0.0 }
 0x1f7   : > { %v7323_v59 = vpop.f32.mrb[48].mxu1  ;;  %v1292_v28 = vpack.c.bf16 %v1164_v33, %v1156_v18  ;;  %v1301_v45 = vpack.c.bf16 %v1181_v24, %v1173_v43 }
 0x1f8   : > { %v7324_v60 = vpop.f32.mrb[49].mxu1 }
 0x1f9   : > { %v10027_v3 = vadd.f32 %v7324_v60, %v7323_v59  ;;  %v7326_v7 = vpop.f32.mrb[50].mxu1 }
 0x1fa   : > { %v7327_v14 = vpop.f32.mrb[51].mxu1  ;;  %v1180_v7 = vmax.f32 %v980_v49, 0.0 }
 0x1fb   : > { %v1197_v14 = vmax.f32 %v997_v52, 0.0 }
 0x1fc   : > { %2335 = vmatmul.mubr.bf16.gmra.mrb[156].mxu1 %v1284_v1  ;;  %v1172_v1 = vmax.f32 %v972_v47, 0.0 }
 0x1fd   : > { %2342 = vmatprep.mubr.bf16.mxu1 %v1293_v6 }
 0x1fe   : > { %v1300_v33 = vpack.c.bf16 %v1180_v7, %v1172_v1 }
 0x1ff   : > { %v7345_v26 = vpop.f32.mrb[52].mxu1 }
 0x200   : > { %v7346_v27 = vpop.f32.mrb[53].mxu1 }
 0x201   : > { %v7347_v32 = vadd.f32 %v7346_v27, %v7345_v26  ;;  %v7348_v37 = vpop.f32.mrb[54].mxu1  ;;  %v988_v26 = vld [vmem:[%s12431_s0 + $0x530] sm:$0xff]  ;;  %v1013_v27 = vld [vmem:[%s12431_s0 + $0x5f8] sm:$0xff] }
 0x202   : > { %v7349_v50 = vpop.f32.mrb[55].mxu1  ;;  %v1213_v51 = vmax.f32 %v1013_v27, 0.0 }
 0x203   : > { %v7350_v59 = vadd.f32 %v7349_v50, %v7348_v37  ;;  %v2009_v60 = vadd.f32 %v7347_v32, %v9802_v4  ;;  %v1309_v4 = vpack.c.bf16 %v1197_v14, %v1189_v11  ;;  %v1188_v37 = vmax.f32 %v988_v26, 0.0  ;;  %v1004_v11 = vld [vmem:[%s12431_s0 + $0x5b0] sm:$0xff] }
 0x204   : > { %2343 = vmatmul.mubr.bf16.gmra.mrb[160].mxu1 %v1292_v28 }
 0x205   : > { %v10055_v6 = vadd.f32 %v9903_v30, %v2009_v60  ;;  %v2012_v10 = vadd.f32 %v7350_v59, %v9818_v13  ;;  %2350 = vmatprep.mubr.bf16.mxu1 %v1301_v45  ;;  %v996_v13 = vld [vmem:[%s12431_s0 + $0x570] sm:$0xff] }
 0x206   : > { %v1196_v45 = vmax.f32 %v996_v13, 0.0 }
 0x207   : > { %v10059_v25 = vadd.f32 %v9905_v42, %v2012_v10  ;;  %v7351_v15 = vpop.f32.mrb[56].mxu1  ;;  %v1005_v42 = vld [vmem:[%s12431_s0 + $0x5b8] sm:$0xff] }
 0x208   : > { %v7352_v18 = vpop.f32.mrb[57].mxu1  ;;  %v1205_v50 = vmax.f32 %v1005_v42, 0.0  ;;  %v1308_v1 = vpack.c.bf16 %v1196_v45, %v1188_v37 }
 0x209   : > { %v7353_v43 = vadd.f32 %v7352_v18, %v7351_v15  ;;  %v7354_v24 = vpop.f32.mrb[58].mxu1  ;;  %v1204_v18 = vmax.f32 %v1004_v11, 0.0 }
 0x20a   : > { %v7355_v30 = vpop.f32.mrb[59].mxu1 }
 0x20b   : > { %v7356_v28 = vadd.f32 %v7355_v30, %v7354_v24  ;;  %v2017_v32 = vadd.f32 %v7353_v43, %v9822_v31  ;;  %v1317_v31 = vpack.c.bf16 %v1213_v51, %v1205_v50 }
 0x20c   : > { %2351 = vmatmul.mubr.bf16.gmra.mrb[164].mxu1 %v1300_v33 }
 0x20d   : > { %v10075_v47 = vadd.f32 %v9923_v61, %v2017_v32  ;;  %v2020_v49 = vadd.f32 %v7356_v28, %v9838_v40  ;;  %2358 = vmatprep.mubr.bf16.mxu1 %v1309_v4  ;;  %v1012_v40 = vld [vmem:[%s12431_s0 + $0x5f0] sm:$0xff] }
 0x20e   : > { %v1212_v33 = vmax.f32 %v1012_v40, 0.0 }
 0x20f   : > { %v10079_v52 = vadd.f32 %v9925_v9, %v2020_v49  ;;  %v7357_v59 = vpop.f32.mrb[60].mxu1  ;;  %v1021_v9 = vld [vmem:[%s12431_s0 + $0x638] sm:$0xf] }
 0x210   : > { %v7358_v60 = vpop.f32.mrb[61].mxu1  ;;  %v1221_v4 = vmax.f32 %v1021_v9, 0.0  ;;  %v1316_v42 = vpack.c.bf16 %v1212_v33, %v1204_v18 }
 0x211   : > { %v7359_v7 = vadd.f32 %v7358_v60, %v7357_v59  ;;  %v7360_v10 = vpop.f32.mrb[62].mxu1 }
 0x212   : > { %v7361_v61 = vpop.f32.mrb[63].mxu1  ;;  %v1325_v32 = vpack.c.bf16 %v1221_v4, %v1221_v4 }
 0x213   : > { %v7362_v14 = vadd.f32 %v7361_v61, %v7360_v10  ;;  %v2025_v15 = vadd.f32 %v7359_v7, %v9842_v34  ;;  %v1020_v34 = vld [vmem:[%s12431_s0 + $0x630] sm:$0xf] }
 0x214   : > { %2359 = vmatmul.mubr.bf16.gmra.mrb[168].mxu1 %v1308_v1 }
 0x215   : > { %v10092_v43 = vadd.f32 %v9943_v35, %v2025_v15  ;;  %v2028_v24 = vadd.f32 %v7362_v14, %v9855_v46  ;;  %2366 = vmatprep.mubr.bf16.mxu1 %v1317_v31  ;;  %v1220_v46 = vmax.f32 %v1020_v34, 0.0 }
 0x217   : > { %v10096_v26 = vadd.f32 %v9945_v29, %v2028_v24  ;;  %v7363_v13 = vpop.f32.mrb[64].mxu1  ;;  %v1324_v60 = vpack.c.bf16 %v1220_v46, %v1220_v46 }
 0x218   : > { %v7364_v30 = vpop.f32.mrb[65].mxu1 }
 0x219   : > { %v7365_v27 = vadd.f32 %v7364_v30, %v7363_v13  ;;  %v7366_v28 = vpop.f32.mrb[66].mxu1 }
 0x21a   : > { %v7367_v37 = vpop.f32.mrb[67].mxu1 }
 0x21b   : > { %v7368_v35 = vadd.f32 %v7367_v37, %v7366_v28  ;;  %v2033_v45 = vadd.f32 %v7365_v27, %v9858_v55 }
 0x21c   : > { %2367 = vmatmul.mubr.bf16.gmra.mrb[172].mxu1 %v1316_v42 }
 0x21d   : > { %v10103_v49 = vadd.f32 %v9963_v57, %v2033_v45  ;;  %v2036_v29 = vadd.f32 %v7368_v35, %v9869_v62  ;;  %2374 = vmatprep.mubr.bf16.mxu1 %v1325_v32 }
 0x21f   : > { %v10107_v50 = vadd.f32 %v9965_v2, %v2036_v29  ;;  %v7369_v51 = vpop.f32.mrb[68].mxu1 }
 0x220   : > { %v7370_v59 = vpop.f32.mrb[69].mxu1 }
 0x221   : > { %v7371_v1 = vadd.f32 %v7370_v59, %v7369_v51  ;;  %v7372_v7 = vpop.f32.mrb[70].mxu1 }
 0x222   : > { %v7373_v10 = vpop.f32.mrb[71].mxu1 }
 0x223   : > { %v7374_v31 = vadd.f32 %v7373_v10, %v7372_v7  ;;  %v2041_v55 = vadd.f32 %v7371_v1, %v9871_v5 }
 0x224   : > { %2375 = vmatmul.mubr.bf16.gmra.mrb[176].mxu1 %v1324_v60 }
 0x225   : > { %v10111_v11 = vadd.f32 %v9983_v22, %v2041_v55  ;;  %v2044_v57 = vadd.f32 %v7374_v31, %v9885_v23 }
 0x227   : > { %v10115_v62 = vadd.f32 %v9985_v36, %v2044_v57  ;;  %v7375_v2 = vpop.f32.mrb[72].mxu1 }
 0x228   : > { %v7376_v40 = vpop.f32.mrb[73].mxu1 }
 0x229   : > { %v7377_v61 = vadd.f32 %v7376_v40, %v7375_v2  ;;  %v7378_v9 = vpop.f32.mrb[74].mxu1 }
 0x22a   : > { %v7379_v14 = vpop.f32.mrb[75].mxu1 }
 0x22b   : > { %v7380_v15 = vadd.f32 %v7379_v14, %v7378_v9  ;;  %v2049_v18 = vadd.f32 %v7377_v61, %v9887_v20 }
 0x22d   : > { %v10119_v33 = vadd.f32 %v10003_v0, %v2049_v18  ;;  %v2052_v5 = vadd.f32 %v7380_v15, %v9901_v54 }
 0x22f   : > { %v10123_v22 = vadd.f32 %v10005_v12, %v2052_v5  ;;  %v7381_v23 = vpop.f32.mrb[76].mxu1 }
 0x230   : > { %v7382_v24 = vpop.f32.mrb[77].mxu1 }
 0x231   : > { %v7383_v36 = vadd.f32 %v7382_v24, %v7381_v23  ;;  %v7384_v4 = vpop.f32.mrb[78].mxu1 }
 0x232   : > { %v7385_v13 = vpop.f32.mrb[79].mxu1 }
 0x233   : > { %v7386_v30 = vadd.f32 %v7385_v13, %v7384_v4  ;;  %v2057_v42 = vadd.f32 %v7383_v36, %v9907_v48 }
 0x235   : > { %v10127_v27 = vadd.f32 %v10023_v41, %v2057_v42  ;;  %v2060_v20 = vadd.f32 %v7386_v30, %v9921_v56 }
 0x237   : > { %v10131_v0 = vadd.f32 %v10025_v58, %v2060_v20  ;;  %v7387_v54 = vpop.f32.mrb[80].mxu1 }
 0x238   : > { %v7388_v28 = vpop.f32.mrb[81].mxu1 }
 0x239   : > { %v7389_v12 = vadd.f32 %v7388_v28, %v7387_v54  ;;  %v7390_v32 = vpop.f32.mrb[82].mxu1 }
 0x23a   : > { %v7391_v34 = vpop.f32.mrb[83].mxu1 }
 0x23b   : > { %v2065_v37 = vadd.f32 %v7389_v12, %v9927_v17  ;;  %v7392_v35 = vadd.f32 %v7391_v34, %v7390_v32 }
 0x23d   : > { %v2068_v45 = vadd.f32 %v7392_v35, %v9941_v21 }
 0x23f   : > { %v7393_v46 = vpop.f32.mrb[84].mxu1 }
 0x240   : > { %v7394_v48 = vpop.f32.mrb[85].mxu1 }
 0x241   : > { %v7395_v29 = vadd.f32 %v7394_v48, %v7393_v46  ;;  %v7396_v41 = vpop.f32.mrb[86].mxu1 }
 0x242   : > { %v7397_v51 = vpop.f32.mrb[87].mxu1 }
 0x243   : > { %v2073_v56 = vadd.f32 %v7395_v29, %v9947_v38  ;;  %v7398_v59 = vadd.f32 %v7397_v51, %v7396_v41 }
 0x245   : > { %v2076_v58 = vadd.f32 %v7398_v59, %v9961_v53 }
 0x247   : > { %v7399_v60 = vpop.f32.mrb[88].mxu1 }
 0x248   : > { %v7400_v1 = vpop.f32.mrb[89].mxu1 }
 0x249   : > { %v7401_v7 = vadd.f32 %v7400_v1, %v7399_v60  ;;  %v7402_v10 = vpop.f32.mrb[90].mxu1 }
 0x24a   : > { %v7403_v31 = vpop.f32.mrb[91].mxu1 }
 0x24b   : > { %v2081_v17 = vadd.f32 %v7401_v7, %v9967_v8  ;;  %v7404_v55 = vadd.f32 %v7403_v31, %v7402_v10 }
 0x24d   : > { %v2084_v21 = vadd.f32 %v7404_v55, %v9981_v19 }
 0x24f   : > { %v7405_v57 = vpop.f32.mrb[92].mxu1 }
 0x250   : > { %v7406_v2 = vpop.f32.mrb[93].mxu1 }
 0x251   : > { %v7407_v40 = vadd.f32 %v7406_v2, %v7405_v57  ;;  %v7408_v61 = vpop.f32.mrb[94].mxu1 }
 0x252   : > { %v7409_v9 = vpop.f32.mrb[95].mxu1 }
 0x253   : > { %v2089_v38 = vadd.f32 %v7407_v40, %v9987_v44  ;;  %v7410_v14 = vadd.f32 %v7409_v9, %v7408_v61 }
 0x255   : > { %v2092_v53 = vadd.f32 %v7410_v14, %v10001_v63 }
 0x257   : > { %v7411_v15 = vpop.f32.mrb[96].mxu1 }
 0x258   : > { %v7412_v18 = vpop.f32.mrb[97].mxu1 }
 0x259   : > { %v7413_v5 = vadd.f32 %v7412_v18, %v7411_v15  ;;  %v7414_v23 = vpop.f32.mrb[98].mxu1 }
 0x25a   : > { %v7415_v24 = vpop.f32.mrb[99].mxu1 }
 0x25b   : > { %v2097_v8 = vadd.f32 %v7413_v5, %v10007_v16  ;;  %v7416_v36 = vadd.f32 %v7415_v24, %v7414_v23 }
 0x25d   : > { %v2100_v19 = vadd.f32 %v7416_v36, %v10021_v39 }
 0x25f   : > { %v7417_v4 = vpop.f32.mrb[100].mxu1 }
 0x260   : > { %v7418_v13 = vpop.f32.mrb[101].mxu1 }
 0x261   : > { %v7419_v30 = vadd.f32 %v7418_v13, %v7417_v4  ;;  %v7420_v42 = vpop.f32.mrb[102].mxu1 }
 0x262   : > { %v7421_v20 = vpop.f32.mrb[103].mxu1 }
 0x263   : > { %v2105_v44 = vadd.f32 %v7419_v30, %v10027_v3 }
 0x267   : > { %v7481_v54 = vpop.f32.mrb[104].mxu1 }
 0x268   : > { %v7482_v28 = vpop.f32.mrb[105].mxu1 }
 0x269   : > { %v7483_v63 = vadd.f32 %v7482_v28, %v7481_v54  ;;  %v7484_v12 = vpop.f32.mrb[106].mxu1 }
 0x26a   : > { %v7485_v32 = vpop.f32.mrb[107].mxu1 }
 0x26b   : > { %v10144_v34 = vadd.f32 %v7483_v63, %v2065_v37  ;;  %v7486_v35 = vadd.f32 %v7485_v32, %v7484_v12 }
 0x26d   : > { %v10146_v46 = vadd.f32 %v7486_v35, %v2068_v45 }
 0x26f   : > { %v7487_v16 = vpop.f32.mrb[108].mxu1 }
 0x270   : > { %v7488_v48 = vpop.f32.mrb[109].mxu1 }
 0x271   : > { %v7489_v39 = vadd.f32 %v7488_v48, %v7487_v16  ;;  %v7490_v29 = vpop.f32.mrb[110].mxu1 }
 0x272   : > { %v7491_v41 = vpop.f32.mrb[111].mxu1 }
 0x273   : > { %v10148_v51 = vadd.f32 %v7489_v39, %v2073_v56  ;;  %v7492_v59 = vadd.f32 %v7491_v41, %v7490_v29 }
 0x275   : > { %v10150_v60 = vadd.f32 %v7492_v59, %v2076_v58 }
 0x277   : > { %v7493_v3 = vpop.f32.mrb[112].mxu1 }
 0x278   : > { %v7494_v1 = vpop.f32.mrb[113].mxu1 }
 0x279   : > { %v7495_v7 = vadd.f32 %v7494_v1, %v7493_v3  ;;  %v7496_v10 = vpop.f32.mrb[114].mxu1 }
 0x27a   : > { %v7497_v31 = vpop.f32.mrb[115].mxu1 }
 0x27b   : > { %v10152_v37 = vadd.f32 %v7495_v7, %v2081_v17  ;;  %v7498_v55 = vadd.f32 %v7497_v31, %v7496_v10 }
 0x27d   : > { %v10154_v45 = vadd.f32 %v7498_v55, %v2084_v21 }
 0x27f   : > { %v7499_v57 = vpop.f32.mrb[116].mxu1 }
 0x280   : > { %v7500_v2 = vpop.f32.mrb[117].mxu1 }
 0x281   : > { %v7501_v40 = vadd.f32 %v7500_v2, %v7499_v57  ;;  %v7502_v61 = vpop.f32.mrb[118].mxu1 }
 0x282   : > { %v7503_v9 = vpop.f32.mrb[119].mxu1 }
 0x283   : > { %v10156_v56 = vadd.f32 %v7501_v40, %v2089_v38  ;;  %v7504_v14 = vadd.f32 %v7503_v9, %v7502_v61 }
 0x285   : > { %v10158_v58 = vadd.f32 %v7504_v14, %v2092_v53 }
 0x287   : > { %v7505_v15 = vpop.f32.mrb[120].mxu1 }
 0x288   : > { %v7506_v18 = vpop.f32.mrb[121].mxu1 }
 0x289   : > { %v7507_v5 = vadd.f32 %v7506_v18, %v7505_v15  ;;  %v7508_v23 = vpop.f32.mrb[122].mxu1 }
 0x28a   : > { %v7509_v24 = vpop.f32.mrb[123].mxu1 }
 0x28b   : > { %v10160_v17 = vadd.f32 %v7507_v5, %v2097_v8  ;;  %v7510_v36 = vadd.f32 %v7509_v24, %v7508_v23 }
 0x28d   : > { %v10162_v21 = vadd.f32 %v7510_v36, %v2100_v19 }
 0x28f   : > { %v7511_v4 = vpop.f32.mrb[124].mxu1 }
 0x290   : > { %v7512_v13 = vpop.f32.mrb[125].mxu1 }
 0x291   : > { %v7513_v30 = vadd.f32 %v7512_v13, %v7511_v4  ;;  %v7514_v42 = vpop.f32.mrb[126].mxu1 }
 0x292   : > { %v7515_v20 = vpop.f32.mrb[127].mxu1 }
 0x293   : > { %v10164_v38 = vadd.f32 %v7513_v30, %v2105_v44 }
 0x297   : > { %v7533_v54 = vpop.f32.mrb[128].mxu1 }
 0x298   : > { %v7534_v53 = vpop.f32.mrb[129].mxu1 }
 0x299   : > { %v7535_v28 = vadd.f32 %v7534_v53, %v7533_v54  ;;  %v7536_v63 = vpop.f32.mrb[130].mxu1 }
 0x29a   : > { %v7537_v12 = vpop.f32.mrb[131].mxu1 }
 0x29b   : > { %v10167_v32 = vadd.f32 %v7535_v28, %v10055_v6  ;;  %v7538_v8 = vadd.f32 %v7537_v12, %v7536_v63 }
 0x29d   : > { %v10170_v35 = vadd.f32 %v7538_v8, %v10059_v25 }
 0x29f   : > { %v2382_v19 = vadd.f32 %v10170_v35, %v10167_v32  ;;  %v7539_v16 = vpop.f32.mrb[132].mxu1 }
 0x2a0   : > { %v7540_v48 = vpop.f32.mrb[133].mxu1 }
 0x2a1   : > { %v7541_v39 = vadd.f32 %v7540_v48, %v7539_v16  ;;  %v7542_v44 = vpop.f32.mrb[134].mxu1 }
 0x2a2   : > { %v7543_v29 = vpop.f32.mrb[135].mxu1 }
 0x2a3   : > { %v10175_v41 = vadd.f32 %v7541_v39, %v10075_v47  ;;  %v7544_v59 = vadd.f32 %v7543_v29, %v7542_v44 }
 0x2a5   : > { %v2383_v3 = vadd.f32 %v2382_v19, %v10175_v41  ;;  %v10179_v6 = vadd.f32 %v7544_v59, %v10079_v52 }
 0x2a7   : > { %v2384_v25 = vadd.f32 %v2383_v3, %v10179_v6  ;;  %v7545_v1 = vpop.f32.mrb[136].mxu1 }
 0x2a8   : > { %v7546_v7 = vpop.f32.mrb[137].mxu1 }
 0x2a9   : > { %v7547_v10 = vadd.f32 %v7546_v7, %v7545_v1  ;;  %v7548_v31 = vpop.f32.mrb[138].mxu1 }
 0x2aa   : > { %v7549_v55 = vpop.f32.mrb[139].mxu1 }
 0x2ab   : > { %v10183_v57 = vadd.f32 %v7547_v10, %v10092_v43  ;;  %v7550_v2 = vadd.f32 %v7549_v55, %v7548_v31 }
 0x2ad   : > { %v2385_v47 = vadd.f32 %v2384_v25, %v10183_v57  ;;  %v10187_v40 = vadd.f32 %v7550_v2, %v10096_v26 }
 0x2af   : > { %v2386_v61 = vadd.f32 %v2385_v47, %v10187_v40  ;;  %v7551_v52 = vpop.f32.mrb[140].mxu1 }
 0x2b0   : > { %v7552_v9 = vpop.f32.mrb[141].mxu1 }
 0x2b1   : > { %v7553_v14 = vadd.f32 %v7552_v9, %v7551_v52  ;;  %v7554_v15 = vpop.f32.mrb[142].mxu1 }
 0x2b2   : > { %v7555_v18 = vpop.f32.mrb[143].mxu1 }
 0x2b3   : > { %v10191_v5 = vadd.f32 %v7553_v14, %v10103_v49  ;;  %v7556_v23 = vadd.f32 %v7555_v18, %v7554_v15 }
 0x2b5   : > { %v2387_v43 = vadd.f32 %v2386_v61, %v10191_v5  ;;  %v10195_v24 = vadd.f32 %v7556_v23, %v10107_v50 }
 0x2b7   : > { %v2388_v36 = vadd.f32 %v2387_v43, %v10195_v24  ;;  %v7557_v26 = vpop.f32.mrb[144].mxu1 }
 0x2b8   : > { %v7558_v4 = vpop.f32.mrb[145].mxu1 }
 0x2b9   : > { %v7559_v13 = vadd.f32 %v7558_v4, %v7557_v26  ;;  %v7560_v30 = vpop.f32.mrb[146].mxu1 }
 0x2ba   : > { %v7561_v42 = vpop.f32.mrb[147].mxu1 }
 0x2bb   : > { %v10199_v20 = vadd.f32 %v7559_v13, %v10111_v11  ;;  %v7562_v54 = vadd.f32 %v7561_v42, %v7560_v30 }
 0x2bd   : > { %v2389_v49 = vadd.f32 %v2388_v36, %v10199_v20  ;;  %v10203_v53 = vadd.f32 %v7562_v54, %v10115_v62 }
 0x2bf   : > { %v2390_v28 = vadd.f32 %v2389_v49, %v10203_v53  ;;  %v7563_v50 = vpop.f32.mrb[148].mxu1 }
 0x2c0   : > { %v7564_v63 = vpop.f32.mrb[149].mxu1 }
 0x2c1   : > { %v7565_v12 = vadd.f32 %v7564_v63, %v7563_v50  ;;  %v7566_v8 = vpop.f32.mrb[150].mxu1 }
 0x2c2   : > { %v7567_v19 = vpop.f32.mrb[151].mxu1 }
 0x2c3   : > { %v10207_v16 = vadd.f32 %v7565_v12, %v10119_v33  ;;  %v7568_v48 = vadd.f32 %v7567_v19, %v7566_v8 }
 0x2c5   : > { %v2391_v11 = vadd.f32 %v2390_v28, %v10207_v16  ;;  %v10211_v39 = vadd.f32 %v7568_v48, %v10123_v22 }
 0x2c7   : > { %v2392_v44 = vadd.f32 %v2391_v11, %v10211_v39  ;;  %v7569_v62 = vpop.f32.mrb[152].mxu1 }
 0x2c8   : > { %v7570_v29 = vpop.f32.mrb[153].mxu1 }
 0x2c9   : > { %v7571_v59 = vadd.f32 %v7570_v29, %v7569_v62  ;;  %v7572_v3 = vpop.f32.mrb[154].mxu1 }
 0x2ca   : > { %v7573_v25 = vpop.f32.mrb[155].mxu1 }
 0x2cb   : > { %v10215_v1 = vadd.f32 %v7571_v59, %v10127_v27  ;;  %v7574_v7 = vadd.f32 %v7573_v25, %v7572_v3 }
 0x2cd   : > { %v2393_v33 = vadd.f32 %v2392_v44, %v10215_v1  ;;  %v10219_v10 = vadd.f32 %v7574_v7, %v10131_v0 }
 0x2cf   : > { %v2394_v31 = vadd.f32 %v2393_v33, %v10219_v10  ;;  %v7575_v22 = vpop.f32.mrb[156].mxu1 }
 0x2d0   : > { %v7576_v55 = vpop.f32.mrb[157].mxu1 }
 0x2d1   : > { %v7577_v2 = vadd.f32 %v7576_v55, %v7575_v22  ;;  %v7578_v47 = vpop.f32.mrb[158].mxu1 }
 0x2d2   : > { %v7579_v61 = vpop.f32.mrb[159].mxu1 }
 0x2d3   : > { %v10223_v52 = vadd.f32 %v7577_v2, %v10144_v34  ;;  %v7580_v9 = vadd.f32 %v7579_v61, %v7578_v47 }
 0x2d5   : > { %v2395_v27 = vadd.f32 %v2394_v31, %v10223_v52  ;;  %v10227_v14 = vadd.f32 %v7580_v9, %v10146_v46 }
 0x2d7   : > { %v2396_v15 = vadd.f32 %v2395_v27, %v10227_v14  ;;  %v7581_v0 = vpop.f32.mrb[160].mxu1  ;;  %v12440_v27 = vmov 0  }
 0x2d8   : > { %v7582_v18 = vpop.f32.mrb[161].mxu1  ;;  %2644 = vst [vmem:[#allocation2 + $0x44] sm:$0xf] %v12440_v27  ;;  %2645 = vst [vmem:[#allocation2 + $0x48] sm:$0xf] %v12440_v27 }
 0x2d9   : > { %v7583_v23 = vadd.f32 %v7582_v18, %v7581_v0  ;;  %v7584_v43 = vpop.f32.mrb[162].mxu1  ;;  %2646 = vst [vmem:[#allocation2 + $0x4c] sm:$0xf] %v12440_v27  ;;  %2647 = vst [vmem:[#allocation2 + $0x50] sm:$0xf] %v12440_v27 }
 0x2da   : > { %v7585_v36 = vpop.f32.mrb[163].mxu1  ;;  %2648 = vst [vmem:[#allocation2 + $0x54] sm:$0xf] %v12440_v27  ;;  %2649 = vst [vmem:[#allocation2 + $0x58] sm:$0xf] %v12440_v27 }
 0x2db   : > { %v10231_v26 = vadd.f32 %v7583_v23, %v10148_v51  ;;  %v7586_v4 = vadd.f32 %v7585_v36, %v7584_v43  ;;  %2650 = vst [vmem:[#allocation2 + $0x5c] sm:$0xf] %v12440_v27  ;;  %2651 = vst [vmem:[#allocation2 + $0x60] sm:$0xf] %v12440_v27 }
 0x2dc   : > { %2652 = vst [vmem:[#allocation2 + $0x64] sm:$0xf] %v12440_v27  ;;  %2653 = vst [vmem:[#allocation2 + $0x68] sm:$0xf] %v12440_v27 }
 0x2dd   : > { %v2397_v34 = vadd.f32 %v2396_v15, %v10231_v26  ;;  %v10235_v13 = vadd.f32 %v7586_v4, %v10150_v60  ;;  %2627 = vst [vmem:[#allocation2] sm:$0xf] %v12440_v27  ;;  %2628 = vst [vmem:[#allocation2 + $0x4] sm:$0xf] %v12440_v27 }
 0x2de   : > { %2629 = vst [vmem:[#allocation2 + $0x8] sm:$0xf] %v12440_v27  ;;  %2630 = vst [vmem:[#allocation2 + $0xc] sm:$0xf] %v12440_v27 }
 0x2df   : > { %v2398_v30 = vadd.f32 %v2397_v34, %v10235_v13  ;;  %v7587_v46 = vpop.f32.mrb[164].mxu1  ;;  %2631 = vst [vmem:[#allocation2 + $0x10] sm:$0xf] %v12440_v27  ;;  %2632 = vst [vmem:[#allocation2 + $0x14] sm:$0xf] %v12440_v27 }
 0x2e0   : > { %v7588_v42 = vpop.f32.mrb[165].mxu1  ;;  %2633 = vst [vmem:[#allocation2 + $0x18] sm:$0xf] %v12440_v27  ;;  %2634 = vst [vmem:[#allocation2 + $0x1c] sm:$0xf] %v12440_v27 }
 0x2e1   : > { %v7589_v54 = vadd.f32 %v7588_v42, %v7587_v46  ;;  %v7590_v49 = vpop.f32.mrb[166].mxu1  ;;  %2635 = vst [vmem:[#allocation2 + $0x20] sm:$0xf] %v12440_v27  ;;  %2636 = vst [vmem:[#allocation2 + $0x24] sm:$0xf] %v12440_v27  ;;  %v8779_v42 = vld [vmem:[%s10297_s23 + $0xc8] sm:$0xff]  }
 0x2e2   : > { %v7591_v28 = vpop.f32.mrb[167].mxu1  ;;  %2637 = vst [vmem:[#allocation2 + $0x28] sm:$0xf] %v12440_v27  ;;  %2638 = vst [vmem:[#allocation2 + $0x2c] sm:$0xf] %v12440_v27 }
 0x2e3   : > { %v10239_v50 = vadd.f32 %v7589_v54, %v10152_v37  ;;  %v7592_v63 = vadd.f32 %v7591_v28, %v7590_v49  ;;  %2639 = vst [vmem:[#allocation2 + $0x30] sm:$0xf] %v12440_v27  ;;  %2640 = vst [vmem:[#allocation2 + $0x34] sm:$0xf] %v12440_v27  ;;  %v8783_v49 = vld [vmem:[%s10297_s23 + $0x100] sm:$0xff]  }
 0x2e4   : > { %2641 = vst [vmem:[#allocation2 + $0x38] sm:$0xf] %v12440_v27  ;;  %2642 = vst [vmem:[#allocation2 + $0x3c] sm:$0xf] %v12440_v27 }
 0x2e5   : > { %v2399_v51 = vadd.f32 %v2398_v30, %v10239_v50  ;;  %v10243_v12 = vadd.f32 %v7592_v63, %v10154_v45  ;;  %2643 = vst [vmem:[#allocation2 + $0x40] sm:$0xf] %v12440_v27  ;;  %2654 = vst [vmem:[#allocation2 + $0x6c] sm:$0xf] %v12440_v27  ;;  %v12443_v30 = vmov 0.0  }
 0x2e6   : > { %2655 = vst [vmem:[#allocation2 + $0x70] sm:$0x1] %v12440_v27  ;;  %7800 = vmatprep.subr.bf16.mxu0 %v12443_v30  ;;  %8004 = vmatprep.subr.bf16.mxu1 %v12443_v30 }
 0x2e7   : > { %v2400_v8 = vadd.f32 %v2399_v51, %v10243_v12  ;;  %v7593_v60 = vpop.f32.mrb[168].mxu1  ;;  %8005 = vmatpush3.bf16.msra.mxu1 %v8783_v49  ;;  %7816 = vmatprep.mubr.msk.bf16.mxu0 %vm8932_vm1, %v12443_v30 }
 0x2e8   : > { %v7594_v19 = vpop.f32.mrb[169].mxu1  ;;  %8006 = vmatprep.subr.bf16.mxu1 %v12443_v30  ;;  %8020 = vmatprep.mubr.msk.bf16.mxu1 %vm8932_vm1, %v12443_v30 }
 0x2e9   : > { %v7595_v48 = vadd.f32 %v7594_v19, %v7593_v60  ;;  %v7596_v11 = vpop.f32.mrb[170].mxu1 }
 0x2ea   : > { %v7597_v44 = vpop.f32.mrb[171].mxu1 }
 0x2eb   : > { %v10247_v62 = vadd.f32 %v7595_v48, %v10156_v56  ;;  %v7598_v29 = vadd.f32 %v7597_v44, %v7596_v11  ;;  %v8780_v48 = vld [vmem:[%s10297_s23 + $0xd0] sm:$0xff]  }
 0x2ec   : > { %v8786_v44 = vld [vmem:[%s10297_s23 + $0x110] sm:$0xff]  }
 0x2ed   : > { %v2401_v37 = vadd.f32 %v2400_v8, %v10247_v62  ;;  %v10251_v59 = vadd.f32 %v7598_v29, %v10158_v58 }
 0x2ef   : > { %v2402_v3 = vadd.f32 %v2401_v37, %v10251_v59  ;;  %v7599_v45 = vpop.f32.mrb[172].mxu1  ;;  %v8782_v37 = vld [vmem:[%s10297_s23 + $0xe0] sm:$0xff]  }
 0x2f0   : > { %v7600_v25 = vpop.f32.mrb[173].mxu1 }
 0x2f1   : > { %v7601_v7 = vadd.f32 %v7600_v25, %v7599_v45  ;;  %v7602_v33 = vpop.f32.mrb[174].mxu1 }
 0x2f2   : > { %v7603_v31 = vpop.f32.mrb[175].mxu1 }
 0x2f3   : > { %v10255_v22 = vadd.f32 %v7601_v7, %v10160_v17  ;;  %v7604_v55 = vadd.f32 %v7603_v31, %v7602_v33  ;;  %v8785_v7 = vld [vmem:[%s10297_s23 + $0xe8] sm:$0xff]   ;;  %v8789_v33 = vld [vmem:[%s10297_s23 + $0x120] sm:$0xff]  }
 0x2f5   : > { %v2403_v56 = vadd.f32 %v2402_v3, %v10255_v22  ;;  %v10259_v2 = vadd.f32 %v7604_v55, %v10162_v21 }
 0x2f7   : > { %v2404_v47 = vadd.f32 %v2403_v56, %v10259_v2  ;;  %v7605_v58 = vpop.f32.mrb[176].mxu1  ;;  %v8788_v56 = vld [vmem:[%s10297_s23 + $0xf0] sm:$0xff]  }
 0x2f8   : > { %v7606_v61 = vpop.f32.mrb[177].mxu1 }
 0x2f9   : > { %v7607_v9 = vadd.f32 %v7606_v61, %v7605_v58  ;;  %v7608_v17 = vpop.f32.mrb[178].mxu1  ;;  %v8790_v58 = vld [vmem:[%s10297_s23 + $0x128] sm:$0xff]  }
 0x2fa   : > { %v7609_v21 = vpop.f32.mrb[179].mxu1  ;;  %v8791_v17 = vld [vmem:[%s10297_s23 + $0xf8] sm:$0xff]  }
 0x2fb   : > { %v2377_v15 = vadd.f32 %v7607_v9, %v10164_v38  ;;  %v8778_v38 = vld [vmem:[%s10297_s23 + $0xc0] sm:$0xff]   ;;  %v8792_v21 = vld [vmem:[%s10297_s23 + $0x130] sm:$0xff]  }
 0x2fc   : > { %7801 = vmatpush3.bf16.msra.mxu0 %v8778_v38 }
 0x2fd   : > { %v2406_v0 = vsel %vm2405_vm0, %v2377_v15, 0.0  ;;  %7802 = vmatprep.subr.bf16.mxu0 %v12443_v30 }
 0x2fe   : > { %v2407_v18 = vadd.f32 %v2406_v0, %v2404_v47 }
 0x300   : > { %v2408_v23 = vrot.slane %v2407_v18, 4  ;;  %7803 = vmatpush3.bf16.msra.mxu0 %v8779_v42 }
 0x301   : > { %7804 = vmatprep.subr.bf16.mxu0 %v12443_v30 }
 0x302   : > { %v2409_v43 = vadd.f32 %v2408_v23, %v2407_v18 }
 0x304   : > { %v2410_v36 = vrot.slane %v2409_v43, 2  ;;  %7805 = vmatpush3.bf16.msra.mxu0 %v8780_v48 }
 0x305   : > { %7806 = vmatprep.subr.bf16.mxu0 %v12443_v30 }
 0x306   : > { %v2411_v4 = vadd.f32 %v2410_v36, %v2409_v43 }
 0x308   : > { %v2412_v34 = vrot.slane %v2411_v4, 1 }
 0x30a   : > { %v2413_v46 = vadd.f32 %v2412_v34, %v2411_v4 }
 0x30c   : > { %v2415_v54 = vmul.f32 0.0051020407, %v2413_v46 }
 0x30e   : > { %v10306_v28 = vsub.f32 %v10167_v32, %v2415_v54  ;;  %v10309_v63 = vsub.f32 %v10170_v35, %v2415_v54  ;;  %v10312_v51 = vsub.f32 %v10175_v41, %v2415_v54  ;;  %v10315_v8 = vsub.f32 %v10179_v6, %v2415_v54  ;;  %v8784_v41 = vld [vmem:[%s10297_s23 + $0x108] sm:$0xff]  }
 0x30f   : > { %v10319_v60 = vsub.f32 %v10183_v57, %v2415_v54  ;;  %v10322_v19 = vsub.f32 %v10187_v40, %v2415_v54  ;;  %v10325_v32 = vsub.f32 %v10191_v5, %v2415_v54  ;;  %v10328_v35 = vsub.f32 %v10195_v24, %v2415_v54  ;;  %8007 = vmatpush3.bf16.msra.mxu1 %v8784_v41 }
 0x310   : > { %v10333_v6 = vsub.f32 %v10199_v20, %v2415_v54  ;;  %v10336_v11 = vsub.f32 %v10203_v53, %v2415_v54  ;;  %v10339_v57 = vsub.f32 %v10207_v16, %v2415_v54  ;;  %v10342_v40 = vsub.f32 %v10211_v39, %v2415_v54  ;;  %8008 = vmatprep.subr.bf16.mxu1 %v12443_v30 }
 0x311   : > { %v10346_v5 = vsub.f32 %v10215_v1, %v2415_v54  ;;  %v10349_v24 = vsub.f32 %v10219_v10, %v2415_v54  ;;  %v10352_v20 = vsub.f32 %v10223_v52, %v2415_v54  ;;  %v10355_v53 = vsub.f32 %v10227_v14, %v2415_v54 }
 0x312   : > { %v10358_v16 = vsub.f32 %v10231_v26, %v2415_v54  ;;  %v10361_v39 = vsub.f32 %v10235_v13, %v2415_v54  ;;  %v10364_v1 = vsub.f32 %v10239_v50, %v2415_v54  ;;  %v10367_v10 = vsub.f32 %v10243_v12, %v2415_v54  ;;  %v8781_v50 = vld [vmem:[%s10297_s23 + $0xd8] sm:$0xff]  }
 0x313   : > { %v10371_v52 = vsub.f32 %v10247_v62, %v2415_v54  ;;  %v10374_v14 = vsub.f32 %v10251_v59, %v2415_v54  ;;  %v10377_v26 = vsub.f32 %v10255_v22, %v2415_v54  ;;  %v10380_v13 = vsub.f32 %v10259_v2, %v2415_v54  ;;  %7807 = vmatpush3.bf16.msra.mxu0 %v8781_v50  ;;  %v8787_v59 = vld [vmem:[%s10297_s23 + $0x118] sm:$0xff]  }
 0x314   : > { %v10384_v12 = vsub.f32 %v2377_v15, %v2415_v54  ;;  %v2441_v62 = vmul.f32 %v10306_v28, %v10306_v28  ;;  %v2442_v29 = vmul.f32 %v10309_v63, %v10309_v63  ;;  %7808 = vmatprep.subr.bf16.mxu0 %v12443_v30  ;;  %8009 = vmatpush3.bf16.msra.mxu1 %v8786_v44 }
 0x315   : > { %8010 = vmatprep.subr.bf16.mxu1 %v12443_v30  ;;  %v2443_v3 = vmul.f32 %v10312_v51, %v10312_v51  ;;  %v2444_v31 = vmul.f32 %v10315_v8, %v10315_v8  ;;  %v2445_v2 = vmul.f32 %v10319_v60, %v10319_v60  ;;  %v2446_v61 = vmul.f32 %v10322_v19, %v10322_v19 }
 0x316   : > { %v2465_v45 = vmul.f32 %v10384_v12, %v10384_v12  ;;  %v2466_v25 = vadd.f32 %v2442_v29, %v2441_v62  ;;  %v2447_v15 = vmul.f32 %v10325_v32, %v10325_v32  ;;  %v2448_v18 = vmul.f32 %v10328_v35, %v10328_v35  ;;  %v8797_v29 = vld [vmem:[%s10297_s23 + $0x138] sm:$0xff]  }
 0x317   : > { %7809 = vmatpush3.bf16.msra.mxu0 %v8782_v37  ;;  %v2449_v43 = vmul.f32 %v10333_v6, %v10333_v6  ;;  %v2450_v4 = vmul.f32 %v10336_v11, %v10336_v11  ;;  %v2451_v34 = vmul.f32 %v10339_v57, %v10339_v57  ;;  %v2452_v42 = vmul.f32 %v10342_v40, %v10342_v40 }
 0x318   : > { %7810 = vmatprep.subr.bf16.mxu0 %v12443_v30  ;;  %8011 = vmatpush3.bf16.msra.mxu1 %v8787_v59  ;;  %v2467_v22 = vadd.f32 %v2466_v25, %v2443_v3  ;;  %v10405_v55 = vsel %vm2405_vm0, %v2465_v45, 0.0  ;;  %v2453_v49 = vmul.f32 %v10346_v5, %v10346_v5  ;;  %v2454_v41 = vmul.f32 %v10349_v24, %v10349_v24 }
 0x319   : > { %8012 = vmatprep.subr.bf16.mxu1 %v12443_v30  ;;  %v2455_v44 = vmul.f32 %v10352_v20, %v10352_v20  ;;  %v2456_v37 = vmul.f32 %v10355_v53, %v10355_v53  ;;  %v2457_v3 = vmul.f32 %v10358_v16, %v10358_v16  ;;  %v2458_v25 = vmul.f32 %v10361_v39, %v10361_v39 }
 0x31a   : > { %v2468_v47 = vadd.f32 %v2467_v22, %v2444_v31  ;;  %v2460_v22 = vmul.f32 %v10367_v10, %v10367_v10  ;;  %vm5418_vm0 = vsmask.f32 5376 }
 0x31b   : > { %7811 = vmatpush3.bf16.msra.mxu0 %v8785_v7 }
 0x31c   : > { %7812 = vmatprep.subr.bf16.mxu0 %v12443_v30  ;;  %8013 = vmatpush3.bf16.msra.mxu1 %v8789_v33  ;;  %v2469_v9 = vadd.f32 %v2468_v47, %v2445_v2  ;;  %v2459_v33 = vmul.f32 %v10364_v1, %v10364_v1  ;;  %v2461_v2 = vmul.f32 %v10371_v52, %v10371_v52 }
 0x31d   : > { %8014 = vmatprep.subr.bf16.mxu1 %v12443_v30 }
 0x31e   : > { %v2470_v0 = vadd.f32 %v2469_v9, %v2446_v61  ;;  %v2463_v9 = vmul.f32 %v10377_v26, %v10377_v26 }
 0x31f   : > { %7813 = vmatpush3.bf16.msra.mxu0 %v8788_v56 }
 0x320   : > { %7814 = vmatprep.subr.bf16.mxu0 %v12443_v30  ;;  %8015 = vmatpush3.bf16.msra.mxu1 %v8790_v58  ;;  %v2471_v23 = vadd.f32 %v2470_v0, %v2447_v15  ;;  %v2462_v58 = vmul.f32 %v10374_v14, %v10374_v14 }
 0x321   : > { %8016 = vmatprep.subr.bf16.mxu1 %v12443_v30 }
 0x322   : > { %v2472_v36 = vadd.f32 %v2471_v23, %v2448_v18 }
 0x323   : > { %7815 = vmatpush3.bf16.msra.mxu0 %v8791_v17 }
 0x324   : > { %7868 = vmatprep.subr.bf16.mxu0 %v12443_v30  ;;  %8017 = vmatpush3.bf16.msra.mxu1 %v8792_v21  ;;  %v2473_v38 = vadd.f32 %v2472_v36, %v2449_v43  ;;  %v2464_v21 = vmul.f32 %v10380_v13, %v10380_v13 }
 0x325   : > { %8018 = vmatprep.subr.bf16.mxu1 %v12443_v30 }
 0x326   : > { %v2474_v46 = vadd.f32 %v2473_v38, %v2450_v4 }
 0x328   : > { %v2475_v54 = vadd.f32 %v2474_v46, %v2451_v34  ;;  %8019 = vmatpush3.bf16.msra.mxu1 %v8797_v29 }
 0x329   : > { %8072 = vmatprep.subr.bf16.mxu1 %v12443_v30 }
 0x32a   : > { %v2476_v48 = vadd.f32 %v2475_v54, %v2452_v42 }
 0x32c   : > { %v2477_v50 = vadd.f32 %v2476_v48, %v2453_v49 }
 0x32e   : > { %v2478_v62 = vadd.f32 %v2477_v50, %v2454_v41 }
 0x330   : > { %v2479_v59 = vadd.f32 %v2478_v62, %v2455_v44 }
 0x332   : > { %v2480_v45 = vadd.f32 %v2479_v59, %v2456_v37 }
 0x334   : > { %v2481_v7 = vadd.f32 %v2480_v45, %v2457_v3  ;;  %v10497_v3 = vld [vmem:[%s810_s29] ss:$0 sm:$0xff] }
 0x336   : > { %v2482_v31 = vadd.f32 %v2481_v7, %v2458_v25  ;;  %v10529_v25 = vld [vmem:[%s813_s15] ss:$0 sm:$0xff] }
 0x338   : > { %v2483_v56 = vadd.f32 %v2482_v31, %v2459_v33 }
 0x33a   : > { %v2484_v47 = vadd.f32 %v2483_v56, %v2460_v22 }
 0x33c   : > { %v2485_v61 = vadd.f32 %v2484_v47, %v2461_v2 }
 0x33e   : > { %v2486_v17 = vadd.f32 %v2485_v61, %v2462_v58 }
 0x340   : > { %v2487_v15 = vadd.f32 %v2486_v17, %v2463_v9 }
 0x342   : > { %v2488_v0 = vadd.f32 %v2487_v15, %v2464_v21 }
 0x344   : > { %v2490_v18 = vadd.f32 %v10405_v55, %v2488_v0 }
 0x346   : > { %v2491_v23 = vrot.slane %v2490_v18, 4 }
 0x348   : > { %v2492_v43 = vadd.f32 %v2491_v23, %v2490_v18 }
 0x34a   : > { %v2493_v36 = vrot.slane %v2492_v43, 2 }
 0x34c   : > { %v2494_v4 = vadd.f32 %v2493_v36, %v2492_v43 }
 0x34e   : > { %v2495_v38 = vrot.slane %v2494_v4, 1 }
 0x350   : > { %v2496_v34 = vadd.f32 %v2495_v38, %v2494_v4 }
 0x352   : > { %v2497_v46 = vmul.f32 0.0051020407, %v2496_v34 }
 0x354   : > { %v2498_v42 = vadd.f32 1e-05, %v2497_v46 }
 0x356   : > { %8902 = vrsqrt.f32 %v2498_v42 }
 0x360   : > { %v8903_v54 = vpop.eup %8902 }
 0x361   : > { %v10474_v55 = vmul.f32 %v8903_v54, %v10306_v28  ;;  %v10477_v49 = vmul.f32 %v8903_v54, %v10309_v63  ;;  %v10480_v48 = vmul.f32 %v8903_v54, %v10312_v51  ;;  %v2503_v41 = vmul.f32 %v8903_v54, %v10315_v8 }
 0x362   : > { %v10484_v50 = vmul.f32 %v8903_v54, %v10319_v60  ;;  %v2505_v44 = vmul.f32 %v8903_v54, %v10322_v19  ;;  %v2506_v62 = vmul.f32 %v8903_v54, %v10325_v32  ;;  %v2507_v29 = vmul.f32 %v8903_v54, %v10328_v35 }
 0x363   : > { %v2508_v28 = vmul.f32 %v8903_v54, %v10333_v6  ;;  %v2509_v63 = vmul.f32 %v8903_v54, %v10336_v11  ;;  %v2510_v37 = vmul.f32 %v8903_v54, %v10339_v57  ;;  %v2511_v51 = vmul.f32 %v8903_v54, %v10342_v40 }
 0x364   : > { %v2512_v8 = vmul.f32 %v8903_v54, %v10346_v5  ;;  %v2513_v60 = vmul.f32 %v8903_v54, %v10349_v24  ;;  %v2514_v59 = vmul.f32 %v8903_v54, %v10352_v20  ;;  %v2515_v19 = vmul.f32 %v8903_v54, %v10355_v53 }
 0x365   : > { %v2516_v32 = vmul.f32 %v8903_v54, %v10358_v16  ;;  %v2517_v35 = vmul.f32 %v8903_v54, %v10361_v39  ;;  %v2518_v6 = vmul.f32 %v8903_v54, %v10364_v1  ;;  %v2519_v11 = vmul.f32 %v8903_v54, %v10367_v10 }
 0x366   : > { %v2520_v57 = vmul.f32 %v8903_v54, %v10371_v52  ;;  %v2521_v40 = vmul.f32 %v8903_v54, %v10374_v14  ;;  %v2522_v5 = vmul.f32 %v8903_v54, %v10377_v26  ;;  %v2523_v24 = vmul.f32 %v8903_v54, %v10380_v13 }
 0x367   : > { %v2524_v20 = vmul.f32 %v8903_v54, %v10384_v12  ;;  %v10513_v53 = vmul.f32 %v10497_v3, %v2503_v41  ;;  %v10516_v16 = vmul.f32 %v10497_v3, %v2505_v44  ;;  %v10519_v39 = vmul.f32 %v10497_v3, %v2506_v62 }
 0x368   : > { %v2539_v1 = vmul.f32 %v10497_v3, %v2507_v29  ;;  %v2540_v10 = vmul.f32 %v10497_v3, %v2508_v28  ;;  %v2541_v52 = vmul.f32 %v10497_v3, %v2509_v63  ;;  %v2542_v14 = vmul.f32 %v10497_v3, %v2510_v37 }
 0x369   : > { %v2543_v26 = vmul.f32 %v10497_v3, %v2511_v51  ;;  %v2544_v13 = vmul.f32 %v10497_v3, %v2512_v8  ;;  %v2545_v12 = vmul.f32 %v10497_v3, %v2513_v60  ;;  %v2546_v45 = vmul.f32 %v10497_v3, %v2514_v59 }
 0x36a   : > { %v2547_v7 = vmul.f32 %v10497_v3, %v2515_v19  ;;  %v2548_v33 = vmul.f32 %v10497_v3, %v2516_v32  ;;  %v2549_v31 = vmul.f32 %v10497_v3, %v2517_v35  ;;  %v2550_v22 = vmul.f32 %v10497_v3, %v2518_v6 }
 0x36b   : > { %v2551_v56 = vmul.f32 %v10497_v3, %v2519_v11  ;;  %v2552_v2 = vmul.f32 %v10497_v3, %v2520_v57  ;;  %v2553_v47 = vmul.f32 %v10497_v3, %v2521_v40  ;;  %v2554_v58 = vmul.f32 %v10497_v3, %v2522_v5 }
 0x36c   : > { %v2555_v61 = vmul.f32 %v10497_v3, %v2523_v24  ;;  %v2556_v9 = vmul.f32 %v10497_v3, %v2524_v20  ;;  %v10542_v17 = vadd.f32 %v10529_v25, %v2539_v1  ;;  %v2572_v21 = vadd.f32 %v10529_v25, %v2540_v10 }
 0x36d   : > { %v2573_v15 = vadd.f32 %v10529_v25, %v2541_v52  ;;  %v2574_v0 = vadd.f32 %v10529_v25, %v2542_v14  ;;  %v2575_v18 = vadd.f32 %v10529_v25, %v2543_v26  ;;  %v2576_v23 = vadd.f32 %v10529_v25, %v2544_v13 }
 0x36e   : > { %v2577_v43 = vadd.f32 %v10529_v25, %v2545_v12  ;;  %v2578_v36 = vadd.f32 %v10529_v25, %v2546_v45  ;;  %v2579_v4 = vadd.f32 %v10529_v25, %v2547_v7  ;;  %v2580_v38 = vadd.f32 %v10529_v25, %v2548_v33 }
 0x36f   : > { %v2581_v34 = vadd.f32 %v10529_v25, %v2549_v31  ;;  %v2582_v46 = vadd.f32 %v10529_v25, %v2550_v22  ;;  %v2583_v42 = vadd.f32 %v10529_v25, %v2551_v56  ;;  %v2584_v54 = vadd.f32 %v10529_v25, %v2552_v2 }
 0x370   : > { %v2585_v41 = vadd.f32 %v10529_v25, %v2553_v47  ;;  %v2586_v44 = vadd.f32 %v10529_v25, %v2554_v58  ;;  %v2587_v62 = vadd.f32 %v10529_v25, %v2555_v61  ;;  %v2588_v29 = vadd.f32 %v10529_v25, %v2556_v9 }
 0x371   : > { %v2596_v28 = vmax.f32 %v10542_v17, 0.0  ;;  %v2597_v63 = vmax.f32 %v2572_v21, 0.0  ;;  %v2598_v37 = vmax.f32 %v2573_v15, 0.0  ;;  %v2599_v51 = vmax.f32 %v2574_v0, 0.0 }
 0x372   : > { %v2600_v8 = vmax.f32 %v2575_v18, 0.0  ;;  %v2601_v60 = vmax.f32 %v2576_v23, 0.0  ;;  %v2602_v59 = vmax.f32 %v2577_v43, 0.0  ;;  %v2603_v19 = vmax.f32 %v2578_v36, 0.0 }
 0x373   : > { %v2604_v32 = vmax.f32 %v2579_v4, 0.0  ;;  %v2605_v35 = vmax.f32 %v2580_v38, 0.0  ;;  %v2606_v6 = vmax.f32 %v2581_v34, 0.0  ;;  %v2607_v11 = vmax.f32 %v2582_v46, 0.0 }
 0x374   : > { %v2608_v57 = vmax.f32 %v2583_v42, 0.0  ;;  %v2609_v40 = vmax.f32 %v2584_v54, 0.0  ;;  %v2610_v5 = vmax.f32 %v2585_v41, 0.0  ;;  %v2611_v24 = vmax.f32 %v2586_v44, 0.0 }
 0x375   : > { %v2612_v20 = vmax.f32 %v2587_v62, 0.0  ;;  %v2613_v1 = vmax.f32 %v2588_v29, 0.0  ;;  %v10562_v10 = vpack.c.bf16 %v2597_v63, %v2597_v63  ;;  %v10564_v52 = vpack.c.bf16 %v2598_v37, %v2598_v37 }
 0x376   : > { %v7220_v14 = vpack.c.bf16 %v2599_v51, %v2599_v51  ;;  %v7221_v26 = vpack.c.bf16 %v2600_v8, %v2600_v8  ;;  %v7222_v13 = vpack.c.bf16 %v2601_v60, %v2601_v60  ;;  %v7223_v12 = vpack.c.bf16 %v2602_v59, %v2602_v59 }
 0x377   : > { %v7224_v45 = vpack.c.bf16 %v2603_v19, %v2603_v19  ;;  %v7225_v7 = vpack.c.bf16 %v2604_v32, %v2604_v32  ;;  %v7226_v33 = vpack.c.bf16 %v2605_v35, %v2605_v35  ;;  %v7227_v31 = vpack.c.bf16 %v2606_v6, %v2606_v6 }
 0x378   : > { %v7228_v22 = vpack.c.bf16 %v2607_v11, %v2607_v11  ;;  %v10566_v56 = vpack.c.bf16 %v2608_v57, %v2608_v57  ;;  %v10568_v2 = vpack.c.bf16 %v2609_v40, %v2609_v40  ;;  %v10570_v47 = vpack.c.bf16 %v2610_v5, %v2610_v5 }
 0x379   : > { %v10572_v58 = vpack.c.bf16 %v2611_v24, %v2611_v24  ;;  %v10574_v61 = vpack.c.bf16 %v2612_v20, %v2612_v20  ;;  %v10576_v9 = vpack.c.bf16 %v2613_v1, %v2613_v1  ;;  %v2816_v21 = vshrl.u32 %v10564_v52, 16 }
 0x37a   : > { %v2822_v15 = vshll.u32 %v7220_v14, 16  ;;  %v2826_v0 = vshrl.u32 %v7220_v14, 16  ;;  %v2832_v18 = vshll.u32 %v7221_v26, 16  ;;  %v2836_v23 = vshrl.u32 %v7221_v26, 16 }
 0x37b   : > { %v10579_v43 = vrot.slane %v2816_v21, 4  ;;  %v2842_v36 = vshll.u32 %v7222_v13, 16  ;;  %v2846_v4 = vshrl.u32 %v7222_v13, 16  ;;  %v2852_v38 = vshll.u32 %v7223_v12, 16 }
 0x37c   : > { %v10581_v34 = vrot.slane %v2822_v15, 5  ;;  %v10583_v46 = vrot.slane %v2826_v0, 4  ;;  %v10585_v42 = vrot.slane %v2832_v18, 5  ;;  %v10587_v54 = vrot.slane %v2836_v23, 4 }
 0x37d   : > { %v10589_v41 = vrot.slane %v2842_v36, 5  ;;  %v2848_v44 = vrot.slane %v2846_v4, 4  ;;  %v10591_v62 = vrot.slane %v2852_v38, 5  ;;  %v2856_v29 = vshrl.u32 %v7223_v12, 16 }
 0x37e   : > { %v2839_v63 = vor.u32 %v10587_v54, %v10585_v42  ;;  %v2862_v37 = vshll.u32 %v7224_v45, 16  ;;  %v2866_v51 = vshrl.u32 %v7224_v45, 16  ;;  %v2872_v8 = vshll.u32 %v7225_v7, 16 }
 0x37f   : > { %v2849_v60 = vor.u32 %v2848_v44, %v10589_v41  ;;  %v2858_v59 = vrot.slane %v2856_v29, 4  ;;  %v2876_v19 = vshrl.u32 %v7225_v7, 16  ;;  %v2882_v32 = vshll.u32 %v7226_v33, 16 }
 0x380   : > { %v10596_v35 = vrot.slane %v2862_v37, 5  ;;  %v2868_v6 = vrot.slane %v2866_v51, 4  ;;  %v2874_v11 = vrot.slane %v2872_v8, 5  ;;  %v2886_v57 = vshrl.u32 %v7226_v33, 16 }
 0x381   : > { %v10598_v40 = vrot.slane %v2849_v60, 4  ;;  %v2859_v5 = vor.u32 %v2858_v59, %v10591_v62  ;;  %v2878_v24 = vrot.slane %v2876_v19, 4  ;;  %v2884_v20 = vrot.slane %v2882_v32, 5 }
 0x382   : > { %v2869_v1 = vor.u32 %v2868_v6, %v10596_v35  ;;  %v2888_v14 = vrot.slane %v2886_v57, 4  ;;  %v2892_v26 = vshll.u32 %v7227_v31, 16  ;;  %v2896_v13 = vshrl.u32 %v7227_v31, 16 }
 0x383   : > { %v10608_v45 = vrot.slane %v2859_v5, 4  ;;  %v2879_v7 = vor.u32 %v2878_v24, %v2874_v11  ;;  %v2902_v33 = vshll.u32 %v7228_v22, 16  ;;  %v2906_v21 = vshrl.u32 %v7228_v22, 16 }
 0x384   : > { %v2870_v15 = vrot.slane %v2869_v1, 4  ;;  %v2889_v0 = vor.u32 %v2888_v14, %v2884_v20  ;;  %v2894_v18 = vrot.slane %v2892_v26, 5  ;;  %v2898_v23 = vrot.slane %v2896_v13, 4 }
 0x385   : > { %v2880_v36 = vrot.slane %v2879_v7, 4  ;;  %v2904_v4 = vrot.slane %v2902_v33, 5  ;;  %v2908_v38 = vrot.slane %v2906_v21, 4  ;;  %v2912_v31 = vshll.u32 %v10566_v56, 16 }
 0x386   : > { %v2875_v44 = vsel %vm10604_vm4, %v2870_v15, %v2874_v11  ;;  %v2890_v29 = vrot.slane %v2889_v0, 4  ;;  %v2899_v37 = vor.u32 %v2898_v23, %v2894_v18  ;;  %v2916_v51 = vshrl.u32 %v10566_v56, 16 }
 0x387   : > { %v2885_v8 = vsel %vm10604_vm4, %v2880_v36, %v2884_v20  ;;  %v2909_v22 = vor.u32 %v2908_v38, %v2904_v4  ;;  %v2914_v60 = vrot.slane %v2912_v31, 5  ;;  %v2922_v59 = vshll.u32 %v10568_v2, 16  ;;  %3017 = vst [vmem:[#allocation2 + $0x40] sm:$0xf] %v2875_v44 }
 0x388   : > { %v2895_v19 = vsel %vm10604_vm4, %v2890_v29, %v2894_v18  ;;  %v2900_v32 = vrot.slane %v2899_v37, 4  ;;  %v2918_v6 = vrot.slane %v2916_v51, 4  ;;  %v2926_v57 = vshrl.u32 %v10568_v2, 16  ;;  %3018 = vst [vmem:[#allocation2 + $0x44] sm:$0xf] %v2885_v8 }
 0x389   : > { %v2910_v11 = vrot.slane %v2909_v22, 4  ;;  %v2924_v56 = vrot.slane %v2922_v59, 5  ;;  %v2932_v5 = vshll.u32 %v10570_v47, 16  ;;  %v2936_v24 = vshrl.u32 %v10570_v47, 16  ;;  %3019 = vst [vmem:[#allocation2 + $0x48] sm:$0xf] %v2895_v19 }
 0x38a   : > { %v2905_v20 = vsel %vm10604_vm4, %v2900_v32, %v2904_v4  ;;  %v2919_v1 = vor.u32 %v2918_v6, %v2914_v60  ;;  %v2928_v14 = vrot.slane %v2926_v57, 4  ;;  %v2942_v26 = vshll.u32 %v10572_v58, 16 }
 0x38b   : > { %v2915_v2 = vsel %vm10604_vm4, %v2910_v11, %v2914_v60  ;;  %v2934_v13 = vrot.slane %v2932_v5, 5  ;;  %v2938_v7 = vrot.slane %v2936_v24, 4  ;;  %v2946_v33 = vshrl.u32 %v10572_v58, 16  ;;  %3020 = vst [vmem:[#allocation2 + $0x4c] sm:$0xf] %v2905_v20 }
 0x38c   : > { %v2920_v21 = vrot.slane %v2919_v1, 4  ;;  %v2929_v15 = vor.u32 %v2928_v14, %v2924_v56  ;;  %v2944_v0 = vrot.slane %v2942_v26, 5  ;;  %v2952_v47 = vshll.u32 %v10574_v61, 16  ;;  %3021 = vst [vmem:[#allocation2 + $0x50] sm:$0xf] %v2915_v2 }
 0x38d   : > { %v2939_v18 = vor.u32 %v2938_v7, %v2934_v13  ;;  %v2948_v23 = vrot.slane %v2946_v33, 4  ;;  %v2956_v36 = vshrl.u32 %v10574_v61, 16  ;;  %v2962_v4 = vshll.u32 %v10576_v9, 16 }
 0x38e   : > { %v2925_v38 = vsel %vm10604_vm4, %v2920_v21, %v2924_v56  ;;  %v2930_v31 = vrot.slane %v2929_v15, 4  ;;  %v2954_v44 = vrot.slane %v2952_v47, 5  ;;  %v2966_v58 = vshrl.u32 %v10576_v9, 16 }
 0x38f   : > { %v2940_v29 = vrot.slane %v2939_v18, 4  ;;  %v2949_v37 = vor.u32 %v2948_v23, %v2944_v0  ;;  %v2958_v51 = vrot.slane %v2956_v36, 4  ;;  %v2964_v8 = vrot.slane %v2962_v4, 5  ;;  %3022 = vst [vmem:[#allocation2 + $0x54] sm:$0xf] %v2925_v38 }
 0x390   : > { %v2935_v22 = vsel %vm10604_vm4, %v2930_v31, %v2934_v13  ;;  %v2968_v61 = vrot.slane %v2966_v58, 4  ;;  %v2532_v60 = vmul.f32 %v10497_v3, %v10474_v55  ;;  %v2533_v59 = vmul.f32 %v10497_v3, %v10477_v49 }
 0x391   : > { %v2945_v9 = vsel %vm10604_vm4, %v2940_v29, %v2944_v0  ;;  %v2950_v19 = vrot.slane %v2949_v37, 4  ;;  %v2959_v32 = vor.u32 %v2958_v51, %v2954_v44  ;;  %3023 = vst [vmem:[#allocation2 + $0x58] sm:$0xf] %v2935_v22  ;;  %v2534_v6 = vmul.f32 %v10497_v3, %v10480_v48  ;;  %v3030_v48 = vld [vmem:[#allocation2 + $0x68] sm:$0x3] }
 0x392   : > { %v2969_v57 = vor.u32 %v2968_v61, %v2964_v8  ;;  %3024 = vst [vmem:[#allocation2 + $0x5c] sm:$0xf] %v2945_v9  ;;  %v2564_v11 = vadd.f32 %v10529_v25, %v2532_v60  ;;  %v2565_v56 = vadd.f32 %v10529_v25, %v2533_v59  ;;  %v2567_v55 = vadd.f32 %v10529_v25, %v10513_v53  ;;  %v3000_v51 = vld [vmem:[#allocation2 + $0x4] sm:$0x8] }
 0x393   : > { %v2955_v49 = vsel %vm10604_vm4, %v2950_v19, %v2954_v44  ;;  %v2960_v5 = vrot.slane %v2959_v32, 4  ;;  %v2566_v20 = vadd.f32 %v10529_v25, %v2534_v6  ;;  %v2536_v1 = vmul.f32 %v10497_v3, %v10484_v50 }
 0x394   : > { %v2970_v14 = vrot.slane %v2969_v57, 4  ;;  %3025 = vst [vmem:[#allocation2 + $0x60] sm:$0xf] %v2955_v49  ;;  %v2589_v26 = vmax.f32 %v2564_v11, 0.0  ;;  %v2590_v53 = vmax.f32 %v2565_v56, 0.0  ;;  %v2592_v2 = vmax.f32 %v2567_v55, 0.0 }
 0x395   : > { %v2965_v13 = vsel %vm10604_vm4, %v2960_v5, %v2964_v8  ;;  %v2591_v7 = vmax.f32 %v2566_v20, 0.0  ;;  %v2568_v33 = vadd.f32 %v10529_v25, %v2536_v1  ;;  %v2569_v21 = vadd.f32 %v10529_v25, %v10516_v16 }
 0x396   : > { %3026 = vst [vmem:[#allocation2 + $0x64] sm:$0xf] %v2965_v13  ;;  %v3031_v15 = vsel %vm10652_vm9, %v2970_v14, %v3030_v48  ;;  %v7210_v0 = vpack.c.bf16 %v2589_v26, %v2589_v26  ;;  %v7211_v50 = vpack.c.bf16 %v2590_v53, %v2590_v53  ;;  %v7213_v3 = vpack.c.bf16 %v2592_v2, %v2592_v2 }
 0x397   : > { %3032 = vst [vmem:[#allocation2 + $0x68] sm:$0x3] %v3031_v15  ;;  %v7212_v47 = vpack.c.bf16 %v2591_v7, %v2591_v7  ;;  %v2593_v18 = vmax.f32 %v2568_v33, 0.0  ;;  %v2594_v23 = vmax.f32 %v2569_v21, 0.0  ;;  %v2570_v36 = vadd.f32 %v10529_v25, %v10519_v39 }
 0x398   : > { %v2723_v4 = vshll.u32 %v7210_v0, 16  ;;  %v2726_v38 = vshrl.u32 %v7210_v0, 16  ;;  %v2732_v31 = vshll.u32 %v7211_v50, 16  ;;  %v2736_v44 = vshrl.u32 %v7211_v50, 16 }
 0x399   : > { %v2742_v58 = vshll.u32 %v7212_v47, 16  ;;  %v2746_v16 = vshrl.u32 %v7212_v47, 16  ;;  %v2752_v29 = vshll.u32 %v7213_v3, 16  ;;  %v7214_v8 = vpack.c.bf16 %v2593_v18, %v2593_v18 }
 0x39a   : > { %v2725_v22 = vrot.slane %v2723_v4, 5  ;;  %v2728_v61 = vrot.slane %v2726_v38, 4  ;;  %v2734_v60 = vrot.slane %v2732_v31, 5  ;;  %v2738_v59 = vrot.slane %v2736_v44, 4 }
 0x39b   : > { %v2744_v39 = vrot.slane %v2742_v58, 5  ;;  %v2748_v25 = vrot.slane %v2746_v16, 4  ;;  %v2754_v9 = vrot.slane %v2752_v29, 5  ;;  %v7215_v19 = vpack.c.bf16 %v2594_v23, %v2594_v23 }
 0x39c   : > { %v2729_v32 = vor.u32 %v2728_v61, %v2725_v22  ;;  %v2739_v6 = vor.u32 %v2738_v59, %v2734_v60  ;;  %v3001_v57 = vsel %vm10670_vm10, %v2725_v22, %v3000_v51  ;;  %v2756_v11 = vshrl.u32 %v7213_v3, 16 }
 0x39d   : > { %v2749_v56 = vor.u32 %v2748_v25, %v2744_v39  ;;  %3002 = vst [vmem:[#allocation2 + $0x4] sm:$0x8] %v3001_v57  ;;  %v2762_v55 = vshll.u32 %v7214_v8, 16  ;;  %v2766_v49 = vshrl.u32 %v7214_v8, 16  ;;  %v2772_v5 = vshll.u32 %v7215_v19, 16 }
 0x39e   : > { %v2730_v24 = vrot.slane %v2729_v32, 4  ;;  %v2740_v48 = vrot.slane %v2739_v6, 4  ;;  %v2758_v20 = vrot.slane %v2756_v11, 4  ;;  %v2595_v1 = vmax.f32 %v2570_v36, 0.0 }
 0x39f   : > { %v2750_v14 = vrot.slane %v2749_v56, 4  ;;  %v2764_v26 = vrot.slane %v2762_v55, 5  ;;  %v2768_v53 = vrot.slane %v2766_v49, 4  ;;  %v2774_v2 = vrot.slane %v2772_v5, 5 }
 0x3a0   : > { %v2735_v13 = vsel %vm10604_vm4, %v2730_v24, %v2734_v60  ;;  %v2745_v7 = vsel %vm10604_vm4, %v2740_v48, %v2744_v39  ;;  %v2759_v33 = vor.u32 %v2758_v20, %v2754_v9  ;;  %v7216_v21 = vpack.c.bf16 %v2595_v1, %v2595_v1  ;;  %v8796_v48 = vld [vmem:[%s10297_s23] sm:$0xff]  }
 0x3a1   : > { %v2755_v15 = vsel %vm10604_vm4, %v2750_v14, %v2754_v9  ;;  %3003 = vst [vmem:[#allocation2 + $0x8] sm:$0xf] %v2735_v13  ;;  %3004 = vst [vmem:[#allocation2 + $0xc] sm:$0xf] %v2745_v7  ;;  %v2769_v0 = vor.u32 %v2768_v53, %v2764_v26  ;;  %v7217_v50 = vpack.c.bf16 %v2596_v28, %v2596_v28  ;;  %v2776_v3 = vshrl.u32 %v7215_v19, 16 }
 0x3a2   : > { %3005 = vst [vmem:[#allocation2 + $0x10] sm:$0xf] %v2755_v15  ;;  %v2760_v47 = vrot.slane %v2759_v33, 4  ;;  %v2782_v18 = vshll.u32 %v7216_v21, 16  ;;  %v2786_v23 = vshrl.u32 %v7216_v21, 16  ;;  %v2802_v36 = vshll.u32 %v10562_v10, 16 }
 0x3a3   : > { %v2770_v4 = vrot.slane %v2769_v0, 4  ;;  %v2778_v38 = vrot.slane %v2776_v3, 4  ;;  %v2792_v31 = vshll.u32 %v7217_v50, 16  ;;  %v2796_v44 = vshrl.u32 %v7217_v50, 16 }
 0x3a4   : > { %v2765_v58 = vsel %vm10604_vm4, %v2760_v47, %v2764_v26  ;;  %v2784_v16 = vrot.slane %v2782_v18, 5  ;;  %v2788_v29 = vrot.slane %v2786_v23, 4  ;;  %v2804_v17 = vrot.slane %v2802_v36, 5  ;;  %v3725_v22 = vld [vmem:[#allocation2 + $0x4] sm:$0x8]  ;;  %v8799_v23 = vld [vmem:[%s10297_s23 + $0x8] sm:$0xff]  }
 0x3a5   : > { %v2775_v28 = vsel %vm10604_vm4, %v2770_v4, %v2774_v2  ;;  %3006 = vst [vmem:[#allocation2 + $0x14] sm:$0xf] %v2765_v58  ;;  %v2779_v37 = vor.u32 %v2778_v38, %v2774_v2  ;;  %v2794_v51 = vrot.slane %v2792_v31, 5  ;;  %v2798_v8 = vrot.slane %v2796_v44, 4 }
 0x3a6   : > { %3007 = vst [vmem:[#allocation2 + $0x18] sm:$0xf] %v2775_v28  ;;  %v2789_v61 = vor.u32 %v2788_v29, %v2784_v16  ;;  %v2806_v60 = vshrl.u32 %v10562_v10, 16  ;;  %v2812_v59 = vshll.u32 %v10564_v52, 16  ;;  %v10695_v9 = vrot.slane %v2839_v63, 4 }
 0x3a7   : > { %v2780_v39 = vrot.slane %v2779_v37, 4  ;;  %v2799_v25 = vor.u32 %v2798_v8, %v2794_v51  ;;  %v2855_v19 = vsel %vm10604_vm4, %v10598_v40, %v10591_v62  ;;  %v2829_v10 = vor.u32 %v10583_v46, %v10581_v34  ;;  %v10750_v8 = vld [vmem:[#allocation2 + $0x40] sm:$0xf] }
 0x3a8   : > { %v3686_v32 = vld [vmem:[#allocation2 + $0x8] sm:$0xf]  ;;  %v3687_v6 = vld [vmem:[#allocation2 + $0xc] sm:$0xf]  ;;  %v2790_v57 = vrot.slane %v2789_v61, 4  ;;  %v2808_v11 = vrot.slane %v2806_v60, 4  ;;  %v2865_v52 = vsel %vm10604_vm4, %v10608_v45, %v10596_v35 }
 0x3a9   : > { %3015 = vst [vmem:[#allocation2 + $0x38] sm:$0xf] %v2855_v19  ;;  %v3688_v54 = vld [vmem:[#allocation2 + $0x10] sm:$0xf]  ;;  %v6964_v63 = vcombine.low %v3725_v22, %v3686_v32  ;;  %v10707_v56 = vcombine.low %v3686_v32, %v3687_v6  ;;  %v2785_v62 = vsel %vm10604_vm4, %v2780_v39, %v2784_v16  ;;  %v2800_v40 = vrot.slane %v2799_v25, 4  ;;  %v8815_v22 = vld [vmem:[%s10297_s23 + $0x40] sm:$0xff]  }
 0x3aa   : > { %3016 = vst [vmem:[#allocation2 + $0x3c] sm:$0xf] %v2865_v52  ;;  %v10711_v55 = vcombine.low %v3687_v6, %v3688_v54  ;;  %v2795_v46 = vsel %vm10604_vm4, %v2790_v57, %v2794_v51  ;;  %3008 = vst [vmem:[#allocation2 + $0x1c] sm:$0xf] %v2785_v62  ;;  %v2809_v49 = vor.u32 %v2808_v11, %v2804_v17  ;;  %v2814_v5 = vrot.slane %v2812_v59, 5  ;;  %v8802_v19 = vld [vmem:[%s10297_s23 + $0x10] sm:$0xff]  }
 0x3ab   : > { %v3812_v24 = vrot.slane %v6964_v63, 3  ;;  %v4694_v35 = vshrl.u32 %v6964_v63, 16  ;;  %v4697_v45 = vshll.u32 %v6964_v63, 16  ;;  %3009 = vst [vmem:[#allocation2 + $0x20] sm:$0xf] %v2795_v46  ;;  %v2805_v20 = vsel %vm10604_vm4, %v2800_v40, %v2804_v17  ;;  %v8819_v57 = vld [vmem:[%s10297_s23 + $0x48] sm:$0xff]  }
 0x3ac   : > { %v3813_v1 = vrot.slane %v10711_v55, 3  ;;  %v4702_v14 = vshrl.u32 %v10711_v55, 16  ;;  %v4705_v26 = vshll.u32 %v10711_v55, 16  ;;  %v3689_v53 = vld [vmem:[#allocation2 + $0x14] sm:$0xf]  ;;  %v2810_v2 = vrot.slane %v2809_v49, 4 }
 0x3ad   : > { %3010 = vst [vmem:[#allocation2 + $0x24] sm:$0xf] %v2805_v20  ;;  %v4696_v13 = vrot.slane %v4694_v35, 3  ;;  %v4699_v7 = vrot.slane %v4697_v45, 4  ;;  %v3690_v33 = vld [vmem:[#allocation2 + $0x18] sm:$0xf]  ;;  %v10721_v21 = vcombine.low %v3688_v54, %v3689_v53  ;;  %v2819_v15 = vor.u32 %v10579_v43, %v2814_v5 }
 0x3ae   : > { %v3814_v0 = vsel %vm3811_vm11, %v3812_v24, %v3813_v1  ;;  %v4704_v50 = vrot.slane %v4702_v14, 3  ;;  %v4707_v3 = vrot.slane %v4705_v26, 4  ;;  %v10725_v47 = vcombine.low %v3689_v53, %v3690_v33  ;;  %v10762_v25 = vld [vmem:[#allocation2 + $0x44] sm:$0xf]  ;;  %v10771_v6 = vld [vmem:[#allocation2 + $0x48] sm:$0xf] }
 0x3af   : > { %7817 = vmatmul.mubr.bf16.vlgmr.msra.gmra.mrb[28].mxu0 %v3814_v0  ;;  %v4700_v18 = vor.u32 %v4699_v7, %v4696_v13  ;;  %v2815_v36 = vsel %vm10604_vm4, %v2810_v2, %v2814_v5  ;;  %v2820_v4 = vrot.slane %v2819_v15, 4  ;;  %v2830_v38 = vrot.slane %v2829_v10, 4  ;;  %v10780_v63 = vld [vmem:[#allocation2 + $0x4c] sm:$0xf]  ;;  %v8805_v55 = vld [vmem:[%s10297_s23 + $0x18] sm:$0xff]   ;;  %v8807_v53 = vld [vmem:[%s10297_s23 + $0x20] sm:$0xff]  }
 0x3b0   : > { %7869 = vmatpush3.bf16.msra.mxu0 %v8796_v48  ;;  %v4708_v31 = vor.u32 %v4707_v3, %v4704_v50  ;;  %7820 = vmatprep.mubr.msk.bf16.mxu0 %vm8932_vm1, %v12443_v30  ;;  %v4711_v43 = vshrl.u32 %v10725_v47, 16  ;;  %v4714_v44 = vshll.u32 %v10725_v47, 16  ;;  %3011 = vst [vmem:[#allocation2 + $0x28] sm:$0xf] %v2815_v36  ;;  %v10734_v58 = vld [vmem:[#allocation2 + $0x38] sm:$0xf]  ;;  %v2845_v51 = vsel %vm10604_vm4, %v10695_v9, %v10589_v41 }
 0x3b1   : > { %v10736_v16 = vld [vmem:[#allocation2 + $0x3c] sm:$0xf]  ;;  %v3815_v29 = vrot.slane %v10725_v47, 3  ;;  %7870 = vmatprep.subr.bf16.mxu0 %v12443_v30  ;;  %v2825_v28 = vsel %vm10604_vm4, %v2820_v4, %v10581_v34  ;;  %v2835_v37 = vsel %vm10604_vm4, %v2830_v38, %v10585_v42  ;;  %3014 = vst [vmem:[#allocation2 + $0x34] sm:$0xf] %v2845_v51  ;;  %v10778_v54 = vcombine.low %v10750_v8, %v10762_v25  ;;  %v8812_v3 = vld [vmem:[%s10297_s23 + $0x28] sm:$0xff]  }
 0x3b2   : > { %v3691_v17 = vld [vmem:[#allocation2 + $0x1c] sm:$0xf]  ;;  %v4709_v61 = vsel %vm4692_vm12, %v4700_v18, %v4708_v31  ;;  %v4713_v60 = vrot.slane %v4711_v43, 3  ;;  %v4716_v59 = vrot.slane %v4714_v44, 4  ;;  %v3692_v39 = vld [vmem:[#allocation2 + $0x20] sm:$0xf]  ;;  %v10760_v41 = vcombine.low %v10734_v58, %v10736_v16 }
 0x3b3   : > { %3012 = vst [vmem:[#allocation2 + $0x2c] sm:$0xf] %v2825_v28  ;;  %3013 = vst [vmem:[#allocation2 + $0x30] sm:$0xf] %v2835_v37  ;;  %8021 = vmatmul.mubr.bf16.vlgmr.msra.gmra.mrb[180].mxu1 %v4709_v61  ;;  %v10754_v34 = vcombine.low %v3691_v17, %v3692_v39  ;;  %v10756_v42 = vcombine.low %v3690_v33, %v3691_v17  ;;  %v3816_v32 = vsel %vm3811_vm11, %v3813_v1, %v3815_v29  ;;  %v8820_v1 = vld [vmem:[%s10297_s23 + $0x50] sm:$0xff]   ;;  %v8822_v15 = vld [vmem:[%s10297_s23 + $0x58] sm:$0xff]  }
 0x3b4   : > { %v3693_v12 = vld [vmem:[#allocation2 + $0x24] sm:$0xf]  ;;  %8024 = vmatprep.mubr.msk.bf16.mxu1 %vm8932_vm1, %v12443_v30  ;;  %7871 = vmatpush3.bf16.msra.mxu0 %v8799_v23  ;;  %v4717_v11 = vor.u32 %v4716_v59, %v4713_v60  ;;  %v10790_v24 = vcombine.low %v10771_v6, %v10780_v63  ;;  %v10809_v0 = vld [vmem:[#allocation2 + $0x50] sm:$0xf]  ;;  %v10811_v50 = vld [vmem:[#allocation2 + $0x54] sm:$0xf] }
 0x3b5   : > { %v10766_v9 = vcombine.low %v3692_v39, %v3693_v12  ;;  %7872 = vmatprep.subr.bf16.mxu0 %v12443_v30  ;;  %8073 = vmatpush3.bf16.msra.mxu1 %v8815_v22  ;;  %v4720_v10 = vshrl.u32 %v10754_v34, 16  ;;  %v4723_v52 = vshll.u32 %v10754_v34, 16  ;;  %v3817_v40 = vrot.slane %v10754_v34, 3  ;;  %v8825_v23 = vld [vmem:[%s10297_s23 + $0x60] sm:$0xff]   ;;  %v10825_v43 = vld [vmem:[#allocation2 + $0x58] sm:$0xf] }
 0x3b6   : > { %8074 = vmatprep.subr.bf16.mxu1 %v12443_v30  ;;  %v4718_v48 = vsel %vm4692_vm12, %v4708_v31, %v4717_v11  ;;  %v10823_v31 = vcombine.low %v10809_v0, %v10811_v50  ;;  %v10827_v44 = vld [vmem:[#allocation2 + $0x5c] sm:$0xf]  ;;  %v8826_v61 = vld [vmem:[%s10297_s23 + $0x68] sm:$0xff]  }
 0x3b7   : > { %7821 = vmatmul.mubr.bf16.gmra.mrb[32].mxu0 %v3816_v32  ;;  %v3694_v62 = vld [vmem:[#allocation2 + $0x28] sm:$0xf]  ;;  %v4722_v35 = vrot.slane %v4720_v10, 3  ;;  %v4725_v45 = vrot.slane %v4723_v52, 4  ;;  %v3818_v2 = vsel %vm3811_vm11, %v3815_v29, %v3817_v40  ;;  %v8816_v29 = vld [vmem:[%s10297_s23 + $0x30] sm:$0xff]   ;;  %v10837_v22 = vcombine.low %v10825_v43, %v10827_v44  ;;  %v8823_v60 = vld [vmem:[%s10297_s23 + $0x38] sm:$0xff]  }
 0x3b8   : > { %7824 = vmatprep.mubr.msk.bf16.mxu0 %vm8932_vm1, %v12443_v30  ;;  %7873 = vmatpush3.bf16.msra.mxu0 %v8802_v19  ;;  %v3697_v5 = vld [vmem:[#allocation2 + $0x34] sm:$0xf]  ;;  %v10793_v20 = vcombine.low %v3693_v12, %v3694_v62  ;;  %12465 = vst [vmem:[#allocation5_spill] sm:$0xff] %v10823_v31  ;;  %v8830_v52 = vld [vmem:[%s10297_s23 + $0x78] sm:$0xff]  }
 0x3b9   : > { %7874 = vmatprep.subr.bf16.mxu0 %v12443_v30  ;;  %8075 = vmatpush3.bf16.msra.mxu1 %v8819_v57  ;;  %v4726_v13 = vor.u32 %v4725_v45, %v4722_v35  ;;  %12466 = vst [vmem:[#allocation6_spill] sm:$0xff] %v10837_v22  ;;  %v6970_v59 = vcombine.low %v3697_v5, %v10734_v58  ;;  %v8827_v32 = vld [vmem:[%s10297_s23 + $0x70] sm:$0xff]  }
 0x3ba   : > { %v3695_v46 = vld [vmem:[#allocation2 + $0x2c] sm:$0xf]  ;;  %v3696_v49 = vld [vmem:[#allocation2 + $0x30] sm:$0xf]  ;;  %8076 = vmatprep.subr.bf16.mxu1 %v12443_v30  ;;  %v4729_v7 = vshrl.u32 %v10793_v20, 16  ;;  %v4732_v33 = vshll.u32 %v10793_v20, 16 }
 0x3bb   : > { %8025 = vmatmul.mubr.bf16.gmra.mrb[184].mxu1 %v4718_v48  ;;  %v10796_v14 = vcombine.low %v3694_v62, %v3695_v46  ;;  %v10798_v26 = vcombine.low %v3696_v49, %v3697_v5  ;;  %v3819_v47 = vrot.slane %v10793_v20, 3  ;;  %v6969_v18 = vcombine.low %v3695_v46, %v3696_v49 }
 0x3bc   : > { %8028 = vmatprep.mubr.msk.bf16.mxu1 %vm8932_vm1, %v12443_v30  ;;  %7875 = vmatpush3.bf16.msra.mxu0 %v8805_v55  ;;  %v4727_v36 = vsel %vm4692_vm12, %v4717_v11, %v4726_v13  ;;  %v4731_v4 = vrot.slane %v4729_v7, 3  ;;  %v4734_v38 = vrot.slane %v4732_v33, 4  ;;  %v4747_v11 = vshrl.u32 %v6970_v59, 16 }
 0x3bd   : > { %7876 = vmatprep.subr.bf16.mxu0 %v12443_v30  ;;  %8077 = vmatpush3.bf16.msra.mxu1 %v8820_v1  ;;  %v3820_v17 = vsel %vm3811_vm11, %v3817_v40, %v3819_v47  ;;  %v4738_v37 = vshrl.u32 %v6969_v18, 16  ;;  %v4741_v51 = vshll.u32 %v6969_v18, 16  ;;  %v3821_v34 = vrot.slane %v6969_v18, 3 }
 0x3be   : > { %8078 = vmatprep.subr.bf16.mxu1 %v12443_v30  ;;  %v4735_v28 = vor.u32 %v4734_v38, %v4731_v4  ;;  %v4750_v10 = vshll.u32 %v6970_v59, 16  ;;  %v6971_v62 = vcombine.low %v10736_v16, %v10750_v8  ;;  %v3823_v55 = vrot.slane %v6970_v59, 3 }
 0x3bf   : > { %7825 = vmatmul.mubr.bf16.gmra.mrb[36].mxu0 %v3818_v2  ;;  %v4740_v12 = vrot.slane %v4738_v37, 3  ;;  %v4743_v19 = vrot.slane %v4741_v51, 4  ;;  %v3822_v58 = vsel %vm3811_vm11, %v3819_v47, %v3821_v34  ;;  %v4749_v46 = vrot.slane %v4747_v11, 3 }
 0x3c0   : > { %7828 = vmatprep.mubr.msk.bf16.mxu0 %vm8932_vm1, %v12443_v30  ;;  %7877 = vmatpush3.bf16.msra.mxu0 %v8807_v53  ;;  %v4736_v39 = vsel %vm4692_vm12, %v4726_v13, %v4735_v28  ;;  %v4752_v49 = vrot.slane %v4750_v10, 4  ;;  %v3824_v5 = vsel %vm3811_vm11, %v3821_v34, %v3823_v55  ;;  %v4756_v35 = vshrl.u32 %v6971_v62, 16  ;;  %v3728_v10 = vld [vmem:[#allocation2 + $0x68] sm:$0x1] }
 0x3c1   : > { %7878 = vmatprep.subr.bf16.mxu0 %v12443_v30  ;;  %8079 = vmatpush3.bf16.msra.mxu1 %v8822_v15  ;;  %v4744_v57 = vor.u32 %v4743_v19, %v4740_v12  ;;  %v4759_v45 = vshll.u32 %v6971_v62, 16  ;;  %v6972_v16 = vcombine.low %v10762_v25, %v10771_v6  ;;  %v3825_v20 = vrot.slane %v6971_v62, 3 }
 0x3c2   : > { %8080 = vmatprep.subr.bf16.mxu1 %v12443_v30  ;;  %v4753_v48 = vor.u32 %v4752_v49, %v4749_v46  ;;  %v4758_v1 = vrot.slane %v4756_v35, 3  ;;  %v6973_v47 = vcombine.low %v10780_v63, %v10809_v0  ;;  %v6974_v38 = vcombine.low %v10811_v50, %v10825_v43  ;;  %v10896_v43 = vld [vmem:[#allocation2 + $0x64] sm:$0xf] }
 0x3c3   : > { %8029 = vmatmul.mubr.bf16.gmra.mrb[188].mxu1 %v4727_v36  ;;  %v4745_v40 = vsel %vm4692_vm12, %v4735_v28, %v4744_v57  ;;  %v4761_v53 = vrot.slane %v4759_v45, 4  ;;  %v3826_v2 = vsel %vm3811_vm11, %v3823_v55, %v3825_v20  ;;  %v4765_v7 = vshrl.u32 %v6972_v16, 16  ;;  %v10885_v28 = vld [vmem:[#allocation2 + $0x60] sm:$0xf] }
 0x3c4   : > { %8032 = vmatprep.mubr.msk.bf16.mxu1 %vm8932_vm1, %v12443_v30  ;;  %7879 = vmatpush3.bf16.msra.mxu0 %v8812_v3  ;;  %v4754_v8 = vsel %vm4692_vm12, %v4744_v57, %v4753_v48  ;;  %v4768_v33 = vshll.u32 %v6972_v16, 16  ;;  %v3827_v15 = vrot.slane %v6972_v16, 3  ;;  %v4774_v36 = vshrl.u32 %v6973_v47, 16  ;;  %v10907_v55 = vld [vmem:[#allocation2 + $0x60] ss:$0 sps:$4 sm:$0x77]  }
 0x3c5   : > { %7880 = vmatprep.subr.bf16.mxu0 %v12443_v30  ;;  %8081 = vmatpush3.bf16.msra.mxu1 %v8825_v23  ;;  %v4762_v13 = vor.u32 %v4761_v53, %v4758_v1  ;;  %v4767_v6 = vrot.slane %v4765_v7, 3  ;;  %v4777_v4 = vshll.u32 %v6973_v47, 16  ;;  %v10891_v37 = vcombine.low %v10827_v44, %v10885_v28  ;;  %12467 = vst [vmem:[#allocation7_spill] sm:$0xff] %v10907_v55  ;;  %v10917_v16 = vld [vmem:[#allocation2 + $0x10] sm:$0xf]  ;;  %v10922_v53 = vld [vmem:[#allocation2 + $0x1c] sm:$0xff]  }
 0x3c6   : > { %8082 = vmatprep.subr.bf16.mxu1 %v12443_v30  ;;  %v4770_v3 = vrot.slane %v4768_v33, 4  ;;  %v3828_v18 = vsel %vm3811_vm11, %v3825_v20, %v3827_v15  ;;  %v4776_v63 = vrot.slane %v4774_v36, 3  ;;  %v4786_v50 = vshll.u32 %v6974_v38, 16  ;;  %v6231_v20 = vld [vmem:[#allocation2 + $0xc] sm:$0x8]  ;;  %v10928_v7 = vld [vmem:[#allocation2 + $0x34] sm:$0xff]  }
 0x3c7   : > { %7829 = vmatmul.mubr.bf16.gmra.mrb[40].mxu0 %v3820_v17  ;;  %v4763_v25 = vsel %vm4692_vm12, %v4753_v48, %v4762_v13  ;;  %v3829_v17 = vrot.slane %v6973_v47, 3  ;;  %v4779_v0 = vrot.slane %v4777_v4, 4  ;;  %v4792_v59 = vshrl.u32 %v10891_v37, 16  ;;  %v10930_v33 = vld [vmem:[#allocation2 + $0x3c] sm:$0xff]  }
 0x3c8   : > { %7832 = vmatprep.mubr.msk.bf16.mxu0 %vm8932_vm1, %v12443_v30  ;;  %7881 = vmatpush3.bf16.msra.mxu0 %v8816_v29  ;;  %v4771_v23 = vor.u32 %v4770_v3, %v4767_v6  ;;  %v3831_v12 = vrot.slane %v6974_v38, 3  ;;  %v4788_v19 = vrot.slane %v4786_v50, 4  ;;  %v3833_v46 = vrot.slane %v10891_v37, 3 }
 0x3c9   : > { %7882 = vmatprep.subr.bf16.mxu0 %v12443_v30  ;;  %8083 = vmatpush3.bf16.msra.mxu1 %v8826_v61  ;;  %v3830_v51 = vsel %vm3811_vm11, %v3827_v15, %v3829_v17  ;;  %v4780_v61 = vor.u32 %v4779_v0, %v4776_v63  ;;  %v4794_v57 = vrot.slane %v4792_v59, 3  ;;  %v6976_v49 = vcombine.low %v10896_v43, %v3728_v10  ;;  %v10932_v15 = vld [vmem:[#allocation2 + $0x4c] sm:$0xff]   ;;  %v10954_v0 = vld [vmem:[#allocation2 + $0x5c] sm:$0xff]  }
 0x3ca   : > { %8084 = vmatprep.subr.bf16.mxu1 %v12443_v30  ;;  %v4772_v29 = vsel %vm4692_vm12, %v4762_v13, %v4771_v23  ;;  %v3832_v62 = vsel %vm3811_vm11, %v3829_v17, %v3831_v12  ;;  %v10926_v13 = vld [vmem:[#allocation2 + $0x2c] sm:$0xff]   ;;  %v12438_v6 = vrot.slane %v10907_v55, 1  ;;  %v3834_v3 = vsel %vm3811_vm11, %v3831_v12, %v3833_v46 }
 0x3cb   : > { %8033 = vmatmul.mubr.bf16.gmra.mrb[192].mxu1 %v4736_v39  ;;  %v4795_v39 = vshll.u32 %v10891_v37, 16  ;;  %v4781_v34 = vsel %vm4692_vm12, %v4771_v23, %v4780_v61  ;;  %v3835_v47 = vrot.slane %v6976_v49, 3  ;;  %v10945_v17 = vld [vmem:[#allocation2 + $0x6c] sm:$0x1f]   ;;  %v10956_v37 = vld [vmem:[#allocation2 + $0x64] sm:$0xff]   ;;  %v6259_v50 = vrot.slane %v10926_v13, 3 }
 0x3cc   : > { %8036 = vmatprep.mubr.msk.bf16.mxu1 %vm8932_vm1, %v12443_v30  ;;  %7883 = vmatpush3.bf16.msra.mxu0 %v8823_v60  ;;  %v4783_v60 = vshrl.u32 %v6974_v38, 16  ;;  %12468 = vst [vmem:[#allocation8_spill] sm:$0xff] %v10945_v17  ;;  %v6261_v59 = vrot.slane %v10928_v7, 3  ;;  %v6267_v12 = vrot.slane %v10932_v15, 3  ;;  %v6271_v49 = vrot.slane %v10954_v0, 3 }
 0x3cd   : > { %7936 = vmatprep.subr.bf16.mxu0 %v12443_v30  ;;  %8085 = vmatpush3.bf16.msra.mxu1 %v8827_v32  ;;  %v4671_v32 = vld [vmem:[#allocation2 + $0x68] sm:$0x3]  ;;  %v4797_v11 = vrot.slane %v4795_v39, 4  ;;  %v6263_v39 = vrot.slane %v10930_v33, 3 }
 0x3ce   : > { %8086 = vmatprep.subr.bf16.mxu1 %v12443_v30  ;;  %v4785_v44 = vrot.slane %v4783_v60, 3 }
 0x3cf   : > { %7833 = vmatmul.mubr.bf16.gmra.mrb[44].mxu0 %v3822_v58  ;;  %v10915_v48 = vor.u32 %v4797_v11, %v4794_v57  ;;  %v10980_v11 = vsel %vm3811_vm11, %v6259_v50, %v6261_v59  ;;  %v10983_v10 = vsel %vm3811_vm11, %v6261_v59, %v6263_v39 }
 0x3d0   : > { %7836 = vmatprep.mubr.msk.bf16.mxu0 %vm8932_vm1, %v12443_v30  ;;  %12474 = vst [vmem:[#allocation14_spill] sm:$0xff] %v10980_v11  ;;  %12475 = vst [vmem:[#allocation15_spill] sm:$0xff] %v10983_v10 }
 0x3d1   : > { %8087 = vmatpush3.bf16.msra.mxu1 %v8830_v52  ;;  %v7075_v52 = vcombine.low %v10896_v43, %v4671_v32 }
 0x3d2   : > { %8140 = vmatprep.subr.bf16.mxu1 %v12443_v30 }
 0x3d3   : > { %8037 = vmatmul.mubr.bf16.gmra.mrb[196].mxu1 %v4745_v40  ;;  %v4789_v40 = vor.u32 %v4788_v19, %v4785_v44  ;;  %v4801_v35 = vshrl.u32 %v7075_v52, 16  ;;  %v4804_v45 = vshll.u32 %v7075_v52, 16 }
 0x3d4   : > { %8040 = vmatprep.mubr.msk.bf16.mxu1 %vm8932_vm1, %v12443_v30 }
 0x3d5   : > { %v4790_v1 = vsel %vm4692_vm12, %v4780_v61, %v4789_v40  ;;  %v4799_v36 = vsel %vm4692_vm12, %v4789_v40, %v10915_v48  ;;  %v4803_v4 = vrot.slane %v4801_v35, 3  ;;  %v4806_v38 = vrot.slane %v4804_v45, 4 }
 0x3d6   : > { %v6255_v61 = vrot.slane %v10922_v53, 3  ;;  %v6273_v35 = vrot.slane %v10956_v37, 3  ;;  %v12437_v45 = vrot.slane %v10945_v17, 3 }
 0x3d7   : > { %7837 = vmatmul.mubr.bf16.gmra.mrb[48].mxu0 %v3824_v5  ;;  %v10913_v5 = vld [vmem:[#allocation2 + $0x14] sm:$0xff]  }
 0x3d8   : > { %7840 = vmatprep.mubr.msk.bf16.mxu0 %vm8932_vm1, %v12443_v30  ;;  %v6253_v23 = vrot.slane %v10913_v5, 3 }
 0x3da   : > { %v10971_v19 = vsel %vm3811_vm11, %v6253_v23, %v6255_v61 }
 0x3db   : > { %8041 = vmatmul.mubr.bf16.gmra.mrb[200].mxu1 %v4754_v8  ;;  %v10919_v8 = vld [vmem:[#allocation2 + $0x44] sm:$0xff]   ;;  %12471 = vst [vmem:[#allocation11_spill] sm:$0xff] %v10971_v19 }
 0x3dc   : > { %8044 = vmatprep.mubr.msk.bf16.mxu1 %vm8932_vm1, %v12443_v30 }
 0x3df   : > { %7841 = vmatmul.mubr.bf16.gmra.mrb[52].mxu0 %v3826_v2  ;;  %v10924_v2 = vld [vmem:[#allocation2 + $0x24] sm:$0xff]  }
 0x3e0   : > { %7844 = vmatprep.mubr.msk.bf16.mxu0 %vm8932_vm1, %v12443_v30  ;;  %v6257_v60 = vrot.slane %v10924_v2, 3 }
 0x3e2   : > { %v10974_v32 = vsel %vm3811_vm11, %v6255_v61, %v6257_v60  ;;  %v10977_v57 = vsel %vm3811_vm11, %v6257_v60, %v6259_v50  ;;  %v3685_v61 = vld [vmem:[#allocation2 + $0x4] sm:$0xf] }
 0x3e3   : > { %8045 = vmatmul.mubr.bf16.gmra.mrb[204].mxu1 %v4763_v25  ;;  %v12439_v25 = vrot.slane %v10837_v22, 1  ;;  %12472 = vst [vmem:[#allocation12_spill] sm:$0xff] %v10974_v32  ;;  %12473 = vst [vmem:[#allocation13_spill] sm:$0xff] %v10977_v57 }
 0x3e4   : > { %8048 = vmatprep.mubr.msk.bf16.mxu1 %vm8932_vm1, %v12443_v30 }
 0x3e5   : > { %v10952_v63 = vsel %vm6008_vm13, %v12439_v25, %v12438_v6 }
 0x3e6   : > { %12469 = vst [vmem:[#allocation9_spill] sm:$0xff] %v10952_v63 }
 0x3e7   : > { %7845 = vmatmul.mubr.bf16.gmra.mrb[56].mxu0 %v3828_v18  ;;  %v7197_v18 = vcombine.low %v6231_v20, %v10917_v16 }
 0x3e8   : > { %7848 = vmatprep.mubr.msk.bf16.mxu0 %vm8932_vm1, %v12443_v30 }
 0x3eb   : > { %8049 = vmatmul.mubr.bf16.gmra.mrb[208].mxu1 %v4772_v29  ;;  %v10943_v29 = vld [vmem:[#allocation2 + $0x54] sm:$0xff]  }
 0x3ec   : > { %8052 = vmatprep.mubr.msk.bf16.mxu1 %vm8932_vm1, %v12443_v30  ;;  %v6269_v40 = vrot.slane %v10943_v29, 3 }
 0x3ee   : > { %v10998_v20 = vsel %vm3811_vm11, %v6267_v12, %v6269_v40 }
 0x3ef   : > { %7849 = vmatmul.mubr.bf16.gmra.mrb[60].mxu0 %v3830_v51  ;;  %v6252_v51 = vrot.slane %v7197_v18, 3  ;;  %12478 = vst [vmem:[#allocation18_spill] sm:$0xff] %v10998_v20  ;;  %v11009_v18 = vsel %vm3811_vm11, %v6273_v35, %v12437_v45  ;;  %v12484_v20 = vmov 0  }
 0x3f0   : > { %7852 = vmatprep.mubr.msk.bf16.mxu0 %vm8932_vm1, %v12443_v30  ;;  %12481 = vst [vmem:[#allocation21_spill] sm:$0xff] %v11009_v18 }
 0x3f1   : > { %v10968_v44 = vsel %vm3811_vm11, %v6252_v51, %v6253_v23  ;;  %v3836_v23 = vsel %vm3811_vm11, %v3833_v46, %v3835_v47  ;;  %v3684_v51 = vld [vmem:[#allocation2] sm:$0xf] }
 0x3f2   : > { %12470 = vst [vmem:[#allocation10_spill] sm:$0xff] %v10968_v44  ;;  %v6985_v50 = vcombine.low %v3684_v51, %v3685_v61 }
 0x3f3   : > { %8053 = vmatmul.mubr.bf16.gmra.mrb[212].mxu1 %v4781_v34  ;;  %v6265_v34 = vrot.slane %v10919_v8, 3 }
 0x3f4   : > { %8056 = vmatprep.mubr.msk.bf16.mxu1 %vm8932_vm1, %v12443_v30  ;;  %v5013_v46 = vshll.u32 %v6985_v50, 16  ;;  %v5011_v59 = vshrl.u32 %v6985_v50, 16 }
 0x3f5   : > { %v10986_v52 = vsel %vm3811_vm11, %v6263_v39, %v6265_v34 }
 0x3f6   : > { %12476 = vst [vmem:[#allocation16_spill] sm:$0xff] %v10986_v52 }
 0x3f7   : > { %7853 = vmatmul.mubr.bf16.gmra.mrb[64].mxu0 %v3832_v62  ;;  %v10989_v62 = vsel %vm3811_vm11, %v6265_v34, %v6267_v12  ;;  %v8831_v34 = vld [vmem:[%s10297_s23 + $0x188] sm:$0xff]   ;;  %v8836_v12 = vld [vmem:[%s10297_s23 + $0x1c0] sm:$0xff]  }
 0x3f8   : > { %7856 = vmatprep.mubr.msk.bf16.mxu0 %vm8932_vm1, %v12443_v30  ;;  %12477 = vst [vmem:[#allocation17_spill] sm:$0xff] %v10989_v62 }
 0x3fb   : > { %8057 = vmatmul.mubr.bf16.gmra.mrb[216].mxu1 %v4790_v1  ;;  %v11001_v1 = vsel %vm3811_vm11, %v6269_v40, %v6271_v49 }
 0x3fc   : > { %8060 = vmatprep.mubr.msk.bf16.mxu1 %vm8932_vm1, %v12443_v30  ;;  %12479 = vst [vmem:[#allocation19_spill] sm:$0xff] %v11001_v1 }
 0x3ff   : > { %7857 = vmatmul.mubr.bf16.gmra.mrb[68].mxu0 %v3834_v3  ;;  %v11004_v3 = vsel %vm3811_vm11, %v6271_v49, %v6273_v35  ;;  %v5022_v49 = vshrl.u32 %v10707_v56, 16  ;;  %v5026_v35 = vshll.u32 %v10721_v21, 16 }
 0x400   : > { %7860 = vmatprep.mubr.msk.bf16.mxu0 %vm8932_vm1, %v12443_v30  ;;  %12480 = vst [vmem:[#allocation20_spill] sm:$0xff] %v11004_v3 }
 0x401   : > { %v5028_v61 = vrot.slane %v5026_v35, 1  ;;  %v5042_v35 = vshll.u32 %v10766_v9, 16 }
 0x403   : > { %8061 = vmatmul.mubr.bf16.gmra.mrb[220].mxu1 %v4799_v36  ;;  %v4807_v36 = vor.u32 %v4806_v38, %v4803_v4  ;;  %v5018_v4 = vshll.u32 %v10707_v56, 16  ;;  %v8829_v38 = vld [vmem:[%s10297_s23 + $0x180] sm:$0xff]  }
 0x404   : > { %8064 = vmatprep.mubr.msk.bf16.mxu1 %vm8932_vm1, %v12443_v30 }
 0x405   : > { %v4808_v60 = vsel %vm4692_vm12, %v10915_v48, %v4807_v36  ;;  %v5015_v48 = vrot.slane %v5013_v46, 1  ;;  %v5020_v39 = vrot.slane %v5018_v4, 1  ;;  %v5030_v4 = vshrl.u32 %v10721_v21, 16 }
 0x407   : > { %7861 = vmatmul.mubr.bf16.gmra.mrb[72].mxu0 %v3836_v23  ;;  %v8832_v23 = vld [vmem:[%s10297_s23 + $0x190] sm:$0xff]   ;;  %v5024_v51 = vor.u32 %v5022_v49, %v5020_v39  ;;  %v5038_v49 = vshrl.u32 %v10756_v42, 16 }
 0x408   : > { %7864 = vmatprep.mubr.msk.bf16.mxu0 %vm8932_vm1, %v12443_v30 }
 0x409   : > { %v5029_v46 = vsel %vm5009_vm14, %v5024_v51, %v5028_v61 }
 0x40b   : > { %8065 = vmatmul.mubr.bf16.gmra.mrb[224].mxu1 %v4808_v60  ;;  %v8833_v60 = vld [vmem:[%s10297_s23 + $0x198] sm:$0xff]  }
 0x40c   : > { %8068 = vmatprep.mubr.msk.bf16.mxu1 %vm8932_vm1, %v12443_v30 }
 0x40f   : > { %7865 = vmatmul.mubr.bf16.gmra.mrb[76].mxu0 %v3835_v47  ;;  %v5016_v47 = vor.u32 %v5015_v48, %v5011_v59  ;;  %v8834_v48 = vld [vmem:[%s10297_s23 + $0x1a0] sm:$0xff]   ;;  %v8840_v59 = vld [vmem:[%s10297_s23 + $0x1d8] sm:$0xff]  }
 0x410   : > { %7884 = vmatprep.mubr.msk.bf16.mxu0 %vm8932_vm1, %v12443_v30 }
 0x411   : > { %v5021_v40 = vsel %vm5009_vm14, %v5016_v47, %v5020_v39  ;;  %v5032_v39 = vor.u32 %v5030_v4, %v5028_v61  ;;  %v5044_v61 = vrot.slane %v5042_v35, 1  ;;  %v5046_v4 = vshrl.u32 %v10766_v9, 16 }
 0x413   : > { %8069 = vmatmul.mubr.bf16.gmra.mrb[228].mxu1 %v4807_v36  ;;  %v8838_v36 = vld [vmem:[%s10297_s23 + $0x1c8] sm:$0xff]  }
 0x414   : > { %8088 = vmatprep.mubr.msk.bf16.mxu1 %vm8932_vm1, %v12443_v30 }
 0x417   : > { %7885 = vmatmul.mubr.bf16.vlgmr.msra.gmra.mrb[28].mxu0 %v6985_v50  ;;  %v8839_v50 = vld [vmem:[%s10297_s23 + $0x1d0] sm:$0xff]  }
 0x418   : > { %7937 = vmatpush3.bf16.msra.mxu0 %v8829_v38  ;;  %7888 = vmatprep.mubr.msk.bf16.mxu0 %vm8932_vm1, %v12443_v30  ;;  %v5034_v38 = vshll.u32 %v10756_v42, 16 }
 0x419   : > { %7938 = vmatprep.subr.bf16.mxu0 %v12443_v30 }
 0x41a   : > { %v5036_v47 = vrot.slane %v5034_v38, 1  ;;  %v5050_v38 = vshll.u32 %v10796_v14, 16 }
 0x41b   : > { %8089 = vmatmul.mubr.bf16.vlgmr.msra.gmra.mrb[232].mxu1 %v5021_v40 }
 0x41c   : > { %8092 = vmatprep.mubr.msk.bf16.mxu1 %vm8932_vm1, %v12443_v30  ;;  %7939 = vmatpush3.bf16.msra.mxu0 %v8831_v34  ;;  %v8835_v34 = vld [vmem:[%s10297_s23 + $0x1a8] sm:$0xff]   ;;  %v5037_v40 = vsel %vm5009_vm14, %v5032_v39, %v5036_v47  ;;  %v5040_v51 = vor.u32 %v5038_v49, %v5036_v47  ;;  %v5052_v39 = vrot.slane %v5050_v38, 1 }
 0x41d   : > { %7940 = vmatprep.subr.bf16.mxu0 %v12443_v30  ;;  %8141 = vmatpush3.bf16.msra.mxu1 %v8836_v12  ;;  %v8843_v12 = vld [vmem:[%s10297_s23 + $0x1e0] sm:$0xff]  }
 0x41e   : > { %8142 = vmatprep.subr.bf16.mxu1 %v12443_v30 }
 0x41f   : > { %7889 = vmatmul.mubr.bf16.gmra.mrb[32].mxu0 %v10707_v56 }
 0x420   : > { %7892 = vmatprep.mubr.msk.bf16.mxu0 %vm8932_vm1, %v12443_v30  ;;  %7941 = vmatpush3.bf16.msra.mxu0 %v8832_v23  ;;  %v8837_v23 = vld [vmem:[%s10297_s23 + $0x1b0] sm:$0xff]  }
 0x421   : > { %7942 = vmatprep.subr.bf16.mxu0 %v12443_v30  ;;  %8143 = vmatpush3.bf16.msra.mxu1 %v8838_v36  ;;  %v8845_v36 = vld [vmem:[%s10297_s23 + $0x1e8] sm:$0xff]  }
 0x422   : > { %8144 = vmatprep.subr.bf16.mxu1 %v12443_v30 }
 0x423   : > { %8093 = vmatmul.mubr.bf16.gmra.mrb[236].mxu1 %v5029_v46  ;;  %v5045_v46 = vsel %vm5009_vm14, %v5040_v51, %v5044_v61 }
 0x424   : > { %8096 = vmatprep.mubr.msk.bf16.mxu1 %vm8932_vm1, %v12443_v30  ;;  %7943 = vmatpush3.bf16.msra.mxu0 %v8833_v60  ;;  %v8841_v60 = vld [vmem:[%s10297_s23 + $0x1b8] sm:$0xff]  }
 0x425   : > { %7944 = vmatprep.subr.bf16.mxu0 %v12443_v30  ;;  %8145 = vmatpush3.bf16.msra.mxu1 %v8839_v50  ;;  %v8846_v50 = vld [vmem:[%s10297_s23 + $0x1f0] sm:$0xff]  }
 0x426   : > { %8146 = vmatprep.subr.bf16.mxu1 %v12443_v30 }
 0x427   : > { %7893 = vmatmul.mubr.bf16.gmra.mrb[36].mxu0 %v10721_v21 }
 0x428   : > { %7896 = vmatprep.mubr.msk.bf16.mxu0 %vm8932_vm1, %v12443_v30  ;;  %7945 = vmatpush3.bf16.msra.mxu0 %v8834_v48  ;;  %v8849_v48 = vld [vmem:[%s10297_s23 + $0x1f8] sm:$0xff]  }
 0x429   : > { %7946 = vmatprep.subr.bf16.mxu0 %v12443_v30  ;;  %8147 = vmatpush3.bf16.msra.mxu1 %v8840_v59  ;;  %v5048_v59 = vor.u32 %v5046_v4, %v5044_v61 }
 0x42a   : > { %8148 = vmatprep.subr.bf16.mxu1 %v12443_v30 }
 0x42b   : > { %8097 = vmatmul.mubr.bf16.gmra.mrb[240].mxu1 %v5037_v40  ;;  %v5053_v47 = vsel %vm5009_vm14, %v5048_v59, %v5052_v39  ;;  %v5078_v59 = vshrl.u32 %v10778_v54, 16 }
 0x42c   : > { %8100 = vmatprep.mubr.msk.bf16.mxu1 %vm8932_vm1, %v12443_v30  ;;  %7947 = vmatpush3.bf16.msra.mxu0 %v8835_v34  ;;  %v5054_v34 = vshrl.u32 %v10796_v14, 16 }
 0x42d   : > { %7948 = vmatprep.subr.bf16.mxu0 %v12443_v30  ;;  %8149 = vmatpush3.bf16.msra.mxu1 %v8843_v12  ;;  %v5058_v12 = vshll.u32 %v10798_v26, 16 }
 0x42e   : > { %8150 = vmatprep.subr.bf16.mxu1 %v12443_v30  ;;  %v5056_v40 = vor.u32 %v5054_v34, %v5052_v39  ;;  %v5082_v39 = vshll.u32 %v10790_v24, 16 }
 0x42f   : > { %7897 = vmatmul.mubr.bf16.gmra.mrb[40].mxu0 %v10756_v42  ;;  %v5060_v49 = vrot.slane %v5058_v12, 1 }
 0x430   : > { %7900 = vmatprep.mubr.msk.bf16.mxu0 %vm8932_vm1, %v12443_v30  ;;  %7949 = vmatpush3.bf16.msra.mxu0 %v8837_v23  ;;  %v5062_v23 = vshrl.u32 %v10798_v26, 16  ;;  %v5084_v34 = vrot.slane %v5082_v39, 1 }
 0x431   : > { %7950 = vmatprep.subr.bf16.mxu0 %v12443_v30  ;;  %8151 = vmatpush3.bf16.msra.mxu1 %v8845_v36  ;;  %v5061_v35 = vsel %vm5009_vm14, %v5056_v40, %v5060_v49  ;;  %v5066_v36 = vshll.u32 %v10760_v41, 16  ;;  %v5086_v40 = vshrl.u32 %v10790_v24, 16 }
 0x432   : > { %8152 = vmatprep.subr.bf16.mxu1 %v12443_v30  ;;  %v5064_v51 = vor.u32 %v5062_v23, %v5060_v49  ;;  %v5090_v49 = vshll.u32 %v10823_v31, 16 }
 0x433   : > { %8101 = vmatmul.mubr.bf16.gmra.mrb[244].mxu1 %v5045_v46  ;;  %v5068_v61 = vrot.slane %v5066_v36, 1  ;;  %v5074_v46 = vshll.u32 %v10778_v54, 16 }
 0x434   : > { %8104 = vmatprep.mubr.msk.bf16.mxu1 %vm8932_vm1, %v12443_v30  ;;  %7951 = vmatpush3.bf16.msra.mxu0 %v8841_v60  ;;  %v5092_v23 = vrot.slane %v5090_v49, 1  ;;  %v8848_v49 = vld [vmem:[#allocation2 + $0x14] sm:$0xff]  }
 0x435   : > { %8153 = vmatpush3.bf16.msra.mxu1 %v8846_v50  ;;  %8208 = vmatprep.subr.bf16.mxu0 %v12443_v30  ;;  %v5069_v60 = vsel %vm5009_vm14, %v5064_v51, %v5068_v61  ;;  %v5070_v50 = vshrl.u32 %v10760_v41, 16  ;;  %v5076_v38 = vrot.slane %v5074_v46, 1  ;;  %v5094_v51 = vshrl.u32 %v10823_v31, 16 }
 0x436   : > { %8154 = vmatprep.subr.bf16.mxu1 %v12443_v30 }
 0x437   : > { %7901 = vmatmul.mubr.bf16.gmra.mrb[44].mxu0 %v10766_v9  ;;  %v5072_v4 = vor.u32 %v5070_v50, %v5068_v61  ;;  %v5098_v61 = vshll.u32 %v10837_v22, 16 }
 0x438   : > { %7904 = vmatprep.mubr.msk.bf16.mxu0 %vm8932_vm1, %v12443_v30 }
 0x439   : > { %8155 = vmatpush3.bf16.msra.mxu1 %v8849_v48  ;;  %v5077_v48 = vsel %vm5009_vm14, %v5072_v4, %v5076_v38  ;;  %v5100_v50 = vrot.slane %v5098_v61, 1  ;;  %v5102_v4 = vshrl.u32 %v10837_v22, 16  ;;  %v5110_v61 = vshrl.u32 %v10907_v55, 16 }
 0x43b   : > { %8105 = vmatmul.mubr.bf16.gmra.mrb[248].mxu1 %v5053_v47  ;;  %v5080_v47 = vor.u32 %v5078_v59, %v5076_v38  ;;  %v5106_v38 = vshll.u32 %v10907_v55, 16  ;;  %v5310_v59 = vld [vmem:[#allocation2 + $0xc] sm:$0xc]  ;;  %v5782_v55 = vld [vmem:[#allocation2] sm:$0xe] }
 0x43c   : > { %8108 = vmatprep.mubr.msk.bf16.mxu1 %vm8932_vm1, %v12443_v30 }
 0x43d   : > { %v5085_v12 = vsel %vm5009_vm14, %v5080_v47, %v5084_v34  ;;  %v5108_v39 = vrot.slane %v5106_v38, 1 }
 0x43f   : > { %7905 = vmatmul.mubr.bf16.gmra.mrb[48].mxu0 %v10796_v14 }
 0x440   : > { %7908 = vmatprep.mubr.msk.bf16.mxu0 %vm8932_vm1, %v12443_v30 }
 0x443   : > { %8109 = vmatmul.mubr.bf16.gmra.mrb[252].mxu1 %v5061_v35  ;;  %v5088_v35 = vor.u32 %v5086_v40, %v5084_v34  ;;  %v7109_v34 = vcombine.low %v5310_v59, %v10917_v16  ;;  %v8847_v40 = vld [vmem:[#allocation2 + $0xc] sm:$0xfc]   ;;  %v5112_v16 = vor.u32 %v5110_v61, %v5108_v39  ;;  %v8850_v59 = vld [vmem:[%s10297_s23 + $0x140] sm:$0xff]  }
 0x444   : > { %8112 = vmatprep.mubr.msk.bf16.mxu1 %vm8932_vm1, %v12443_v30 }
 0x445   : > { %v5093_v36 = vsel %vm5009_vm14, %v5088_v35, %v5092_v23  ;;  %v5420_v35 = vshrl.u32 %v7109_v34, 16 }
 0x447   : > { %7909 = vmatmul.mubr.bf16.gmra.mrb[52].mxu0 %v10798_v26 }
 0x448   : > { %7912 = vmatprep.mubr.msk.bf16.mxu0 %vm8932_vm1, %v12443_v30 }
 0x44b   : > { %8113 = vmatmul.mubr.bf16.gmra.mrb[0].mxu1 %v5069_v60  ;;  %v5096_v60 = vor.u32 %v5094_v51, %v5092_v23  ;;  %v5423_v23 = vshll.u32 %v7109_v34, 16  ;;  %v5431_v51 = vshll.u32 %v10913_v5, 16 }
 0x44c   : > { %8116 = vmatprep.mubr.msk.bf16.mxu1 %vm8932_vm1, %v12443_v30 }
 0x44d   : > { %v5101_v46 = vsel %vm5009_vm14, %v5096_v60, %v5100_v50  ;;  %v4356_v60 = vrot.slane %v8847_v40, 2  ;;  %v5440_v40 = vshll.u32 %v10922_v53, 16 }
 0x44f   : > { %7913 = vmatmul.mubr.bf16.gmra.mrb[56].mxu0 %v10760_v41 }
 0x450   : > { %7916 = vmatprep.mubr.msk.bf16.mxu0 %vm8932_vm1, %v12443_v30 }
 0x453   : > { %8117 = vmatmul.mubr.bf16.gmra.mrb[4].mxu1 %v5077_v48  ;;  %v5104_v48 = vor.u32 %v5102_v4, %v5100_v50  ;;  %v4357_v50 = vrot.slane %v8848_v49, 2  ;;  %v5425_v4 = vrot.slane %v5423_v23, 3  ;;  %v8855_v49 = vld [vmem:[%s10297_s23 + $0x148] sm:$0xff]  }
 0x454   : > { %8120 = vmatprep.mubr.msk.bf16.mxu1 %vm8932_vm1, %v12443_v30 }
 0x455   : > { %v5109_v47 = vsel %vm5009_vm14, %v5104_v48, %v5108_v39  ;;  %v5433_v48 = vrot.slane %v5431_v51, 3  ;;  %v5437_v39 = vshrl.u32 %v10922_v53, 16  ;;  %v5442_v51 = vrot.slane %v5440_v40, 3  ;;  %v8859_v53 = vld [vmem:[%s10297_s23 + $0x150] sm:$0xff]  }
 0x457   : > { %7917 = vmatmul.mubr.bf16.gmra.mrb[60].mxu0 %v10778_v54 }
 0x458   : > { %7920 = vmatprep.mubr.msk.bf16.mxu0 %vm8932_vm1, %v12443_v30 }
 0x45b   : > { %8121 = vmatmul.mubr.bf16.gmra.mrb[8].mxu1 %v5085_v12  ;;  %v8844_v12 = vld [vmem:[#allocation2 + $0x60] ss:$0 sps:$4 sm:$0x33]  }
 0x45c   : > { %8124 = vmatprep.mubr.msk.bf16.mxu1 %vm8932_vm1, %v12443_v30 }
 0x45f   : > { %7921 = vmatmul.mubr.bf16.gmra.mrb[64].mxu0 %v10790_v24 }
 0x460   : > { %7924 = vmatprep.mubr.msk.bf16.mxu0 %vm8932_vm1, %v12443_v30 }
 0x463   : > { %8125 = vmatmul.mubr.bf16.gmra.mrb[12].mxu1 %v5093_v36  ;;  %v5428_v36 = vshrl.u32 %v10913_v5, 16  ;;  %v4358_v5 = vsel %vm4355_vm15, %v4356_v60, %v4357_v50 }
 0x464   : > { %8128 = vmatprep.mubr.msk.bf16.mxu1 %vm8932_vm1, %v12443_v30 }
 0x465   : > { %v5430_v38 = vrot.slane %v5428_v36, 2  ;;  %v5439_v36 = vrot.slane %v5437_v39, 2 }
 0x467   : > { %7925 = vmatmul.mubr.bf16.gmra.mrb[68].mxu0 %v10823_v31  ;;  %v5434_v34 = vor.u32 %v5433_v48, %v5430_v38  ;;  %v5443_v60 = vor.u32 %v5442_v51, %v5439_v36  ;;  %v5449_v38 = vshll.u32 %v10924_v2, 16  ;;  %v8858_v51 = vld [vmem:[#allocation2 + $0x2c] sm:$0xff]  }
 0x468   : > { %7928 = vmatprep.mubr.msk.bf16.mxu0 %vm8932_vm1, %v12443_v30 }
 0x469   : > { %v5451_v40 = vrot.slane %v5449_v38, 3 }
 0x46b   : > { %8129 = vmatmul.mubr.bf16.gmra.mrb[16].mxu1 %v5101_v46  ;;  %v5422_v46 = vrot.slane %v5420_v35, 2 }
 0x46c   : > { %8132 = vmatprep.mubr.msk.bf16.mxu1 %vm8932_vm1, %v12443_v30 }
 0x46f   : > { %7929 = vmatmul.mubr.bf16.gmra.mrb[72].mxu0 %v10837_v22 }
 0x470   : > { %7932 = vmatprep.mubr.msk.bf16.mxu0 %vm8932_vm1, %v12443_v30 }
 0x473   : > { %8133 = vmatmul.mubr.bf16.gmra.mrb[20].mxu1 %v5109_v47  ;;  %v5426_v47 = vor.u32 %v5425_v4, %v5422_v46  ;;  %v8856_v46 = vld [vmem:[#allocation2 + $0x24] sm:$0xff]   ;;  %v5446_v4 = vshrl.u32 %v10924_v2, 16 }
 0x474   : > { %8136 = vmatprep.mubr.msk.bf16.mxu1 %vm8932_vm1, %v12443_v30  ;;  %v8868_v2 = vld [vmem:[%s10297_s23 + $0x160] sm:$0xff]  }
 0x475   : > { %v5435_v35 = vsel %vm5418_vm0, %v5426_v47, %v5434_v34  ;;  %v5448_v39 = vrot.slane %v5446_v4, 2  ;;  %v8872_v4 = vld [vmem:[%s10297_s23 + $0x168] sm:$0xff]  }
 0x477   : > { %7933 = vmatmul.mubr.bf16.gmra.mrb[76].mxu0 %v8844_v12  ;;  %v8853_v12 = vld [vmem:[#allocation2 + $0x1c] sm:$0xff]   ;;  %v5452_v36 = vor.u32 %v5451_v40, %v5448_v39 }
 0x478   : > { %7952 = vmatprep.mubr.msk.bf16.mxu0 %vm8932_vm1, %v12443_v30  ;;  %v4359_v23 = vrot.slane %v8853_v12, 2  ;;  %v4361_v12 = vrot.slane %v8856_v46, 2 }
 0x47b   : > { %8137 = vmatmul.mubr.bf16.gmra.mrb[24].mxu1 %v5112_v16  ;;  %v4360_v16 = vsel %vm4355_vm15, %v4357_v50, %v4359_v23  ;;  %v5444_v50 = vsel %vm5418_vm0, %v5434_v34, %v5443_v60  ;;  %v5455_v34 = vshrl.u32 %v10926_v13, 16 }
 0x47c   : > { %8156 = vmatprep.mubr.msk.bf16.mxu1 %vm8932_vm1, %v12443_v30 }
 0x47f   : > { %7953 = vmatmul.mubr.bf16.vlgmr.msra.gmra.mrb[28].mxu0 %v4358_v5  ;;  %v8864_v5 = vld [vmem:[%s10297_s23 + $0x158] sm:$0xff]  }
 0x480   : > { %8209 = vmatpush3.bf16.msra.mxu0 %v8850_v59  ;;  %7956 = vmatprep.mubr.msk.bf16.mxu0 %vm8932_vm1, %v12443_v30 }
 0x481   : > { %8210 = vmatprep.subr.bf16.mxu0 %v12443_v30 }
 0x483   : > { %8157 = vmatmul.mubr.bf16.vlgmr.msra.gmra.mrb[28].mxu1 %v5435_v35  ;;  %v4362_v35 = vsel %vm4355_vm15, %v4359_v23, %v4361_v12  ;;  %v5453_v23 = vsel %vm5418_vm0, %v5443_v60, %v5452_v36  ;;  %v5464_v60 = vshrl.u32 %v10928_v7, 16 }
 0x484   : > { %8160 = vmatprep.mubr.msk.bf16.mxu1 %vm8932_vm1, %v12443_v30  ;;  %8211 = vmatpush3.bf16.msra.mxu0 %v8855_v49 }
 0x485   : > { %8212 = vmatprep.subr.bf16.mxu0 %v12443_v30 }
 0x486   : > { %v11168_v61 = vpop.f32.mrb[180].mxu1 }
 0x487   : > { %7957 = vmatmul.mubr.bf16.gmra.mrb[32].mxu0 %v4360_v16  ;;  %v8022_v48 = vpop.f32.mrb[181].mxu1 }
 0x488   : > { %v11173_v59 = vpop.f32.mrb[182].mxu1  ;;  %7960 = vmatprep.mubr.msk.bf16.mxu0 %vm8932_vm1, %v12443_v30  ;;  %8213 = vmatpush3.bf16.msra.mxu0 %v8859_v53  ;;  %v5458_v53 = vshll.u32 %v10926_v13, 16  ;;  %v4363_v48 = vrot.slane %v8858_v51, 2  ;;  %v8876_v13 = vld [vmem:[%s10297_s23 + $0x170] sm:$0xff]  }
 0x489   : > { %v8023_v47 = vpop.f32.mrb[183].mxu1  ;;  %8214 = vmatprep.subr.bf16.mxu0 %v12443_v30 }
 0x48a   : > { %v5460_v47 = vrot.slane %v5458_v53, 3  ;;  %v4364_v39 = vsel %vm4355_vm15, %v4361_v12, %v4363_v48  ;;  %v8881_v53 = vld [vmem:[%s10297_s23 + $0x178] sm:$0xff]  }
 0x48b   : > { %8161 = vmatmul.mubr.bf16.gmra.mrb[32].mxu1 %v5444_v50 }
 0x48c   : > { %8164 = vmatprep.mubr.msk.bf16.mxu1 %vm8932_vm1, %v12443_v30  ;;  %8215 = vmatpush3.bf16.msra.mxu0 %v8864_v5  ;;  %v5457_v5 = vrot.slane %v5455_v34, 2 }
 0x48d   : > { %8216 = vmatprep.subr.bf16.mxu0 %v12443_v30 }
 0x48e   : > { %v11184_v49 = vpop.f32.mrb[184].mxu1  ;;  %v5461_v40 = vor.u32 %v5460_v47, %v5457_v5 }
 0x48f   : > { %7961 = vmatmul.mubr.bf16.gmra.mrb[36].mxu0 %v4362_v35  ;;  %v8026_v16 = vpop.f32.mrb[185].mxu1  ;;  %v5467_v35 = vshll.u32 %v10928_v7, 16 }
 0x490   : > { %v11189_v46 = vpop.f32.mrb[186].mxu1  ;;  %7964 = vmatprep.mubr.msk.bf16.mxu0 %vm8932_vm1, %v12443_v30  ;;  %8217 = vmatpush3.bf16.msra.mxu0 %v8868_v2  ;;  %v8861_v2 = vld [vmem:[#allocation2 + $0x34] sm:$0xff]   ;;  %v5462_v12 = vsel %vm5418_vm0, %v5452_v36, %v5461_v40  ;;  %v5476_v36 = vshll.u32 %v10930_v33, 16 }
 0x491   : > { %v8027_v38 = vpop.f32.mrb[187].mxu1  ;;  %8218 = vmatprep.subr.bf16.mxu0 %v12443_v30 }
 0x492   : > { %v5466_v38 = vrot.slane %v5464_v60, 2 }
 0x493   : > { %8165 = vmatmul.mubr.bf16.gmra.mrb[36].mxu1 %v5453_v23  ;;  %v5469_v23 = vrot.slane %v5467_v35, 3 }
 0x494   : > { %8168 = vmatprep.mubr.msk.bf16.mxu1 %vm8932_vm1, %v12443_v30  ;;  %8219 = vmatpush3.bf16.msra.mxu0 %v8872_v4  ;;  %v4365_v4 = vrot.slane %v8861_v2, 2 }
 0x495   : > { %8220 = vmatprep.subr.bf16.mxu0 %v12443_v30  ;;  %v5470_v47 = vor.u32 %v5469_v23, %v5466_v38  ;;  %v8866_v23 = vld [vmem:[#allocation2 + $0x44] sm:$0xff]  }
 0x496   : > { %v11200_v50 = vpop.f32.mrb[188].mxu1  ;;  %v4366_v5 = vsel %vm4355_vm15, %v4363_v48, %v4365_v4 }
 0x497   : > { %7965 = vmatmul.mubr.bf16.gmra.mrb[40].mxu0 %v4364_v39  ;;  %v8030_v51 = vpop.f32.mrb[189].mxu1  ;;  %v5473_v39 = vshrl.u32 %v10930_v33, 16 }
 0x498   : > { %v11205_v34 = vpop.f32.mrb[190].mxu1  ;;  %7968 = vmatprep.mubr.msk.bf16.mxu0 %vm8932_vm1, %v12443_v30  ;;  %8221 = vmatpush3.bf16.msra.mxu0 %v8876_v13  ;;  %v8863_v13 = vld [vmem:[#allocation2 + $0x3c] sm:$0xff]   ;;  %v5471_v51 = vsel %vm5418_vm0, %v5461_v40, %v5470_v47 }
 0x499   : > { %v8031_v16 = vpop.f32.mrb[191].mxu1  ;;  %8222 = vmatprep.subr.bf16.mxu0 %v12443_v30 }
 0x49a   : > { %v5475_v16 = vrot.slane %v5473_v39, 2 }
 0x49b   : > { %8169 = vmatmul.mubr.bf16.gmra.mrb[40].mxu1 %v5462_v12  ;;  %v5478_v12 = vrot.slane %v5476_v36, 3  ;;  %v4369_v36 = vrot.slane %v8866_v23, 2 }
 0x49c   : > { %8172 = vmatprep.mubr.msk.bf16.mxu1 %vm8932_vm1, %v12443_v30  ;;  %8223 = vmatpush3.bf16.msra.mxu0 %v8881_v53  ;;  %v4367_v53 = vrot.slane %v8863_v13, 2 }
 0x49d   : > { %8276 = vmatprep.subr.bf16.mxu0 %v12443_v30  ;;  %v5479_v38 = vor.u32 %v5478_v12, %v5475_v16  ;;  %v8869_v12 = vld [vmem:[#allocation2 + $0x4c] sm:$0xff]  }
 0x49e   : > { %v11215_v7 = vpop.f32.mrb[192].mxu1  ;;  %v4368_v33 = vsel %vm4355_vm15, %v4365_v4, %v4367_v53 }
 0x49f   : > { %7969 = vmatmul.mubr.bf16.gmra.mrb[44].mxu0 %v4366_v5  ;;  %v8034_v2 = vpop.f32.mrb[193].mxu1  ;;  %v5482_v5 = vshrl.u32 %v10919_v8, 16  ;;  %v5480_v39 = vsel %vm5418_vm0, %v5470_v47, %v5479_v38 }
 0x4a0   : > { %v11220_v60 = vpop.f32.mrb[194].mxu1  ;;  %7972 = vmatprep.mubr.msk.bf16.mxu0 %vm8932_vm1, %v12443_v30  ;;  %v5485_v2 = vshll.u32 %v10919_v8, 16  ;;  %v4370_v8 = vsel %vm4355_vm15, %v4367_v53, %v4369_v36 }
 0x4a1   : > { %v8035_v35 = vpop.f32.mrb[195].mxu1 }
 0x4a2   : > { %v5487_v45 = vrot.slane %v5485_v2, 3  ;;  %v4371_v2 = vrot.slane %v8869_v12, 2 }
 0x4a3   : > { %8173 = vmatmul.mubr.bf16.gmra.mrb[44].mxu1 %v5471_v51  ;;  %v5484_v51 = vrot.slane %v5482_v5, 2 }
 0x4a4   : > { %8176 = vmatprep.mubr.msk.bf16.mxu1 %vm8932_vm1, %v12443_v30 }
 0x4a5   : > { %v5488_v16 = vor.u32 %v5487_v45, %v5484_v51  ;;  %v8871_v51 = vld [vmem:[#allocation2 + $0x54] sm:$0xff]  }
 0x4a6   : > { %v11227_v48 = vpop.f32.mrb[196].mxu1 }
 0x4a7   : > { %7973 = vmatmul.mubr.bf16.gmra.mrb[48].mxu0 %v4368_v33  ;;  %v8038_v35 = vpop.f32.mrb[197].mxu1  ;;  %v5491_v33 = vshrl.u32 %v10932_v15, 16  ;;  %v5489_v5 = vsel %vm5418_vm0, %v5479_v38, %v5488_v16 }
 0x4a8   : > { %v11232_v40 = vpop.f32.mrb[198].mxu1  ;;  %7976 = vmatprep.mubr.msk.bf16.mxu0 %vm8932_vm1, %v12443_v30  ;;  %v5494_v35 = vshll.u32 %v10932_v15, 16  ;;  %v4372_v15 = vsel %vm4355_vm15, %v4369_v36, %v4371_v2 }
 0x4a9   : > { %v8039_v13 = vpop.f32.mrb[199].mxu1 }
 0x4aa   : > { %v5496_v6 = vrot.slane %v5494_v35, 3  ;;  %v4373_v35 = vrot.slane %v8871_v51, 2 }
 0x4ab   : > { %8177 = vmatmul.mubr.bf16.gmra.mrb[48].mxu1 %v5480_v39  ;;  %v5493_v39 = vrot.slane %v5491_v33, 2 }
 0x4ac   : > { %8180 = vmatprep.mubr.msk.bf16.mxu1 %vm8932_vm1, %v12443_v30 }
 0x4ad   : > { %v5497_v53 = vor.u32 %v5496_v6, %v5493_v39  ;;  %v8874_v39 = vld [vmem:[#allocation2 + $0x5c] sm:$0xff]  }
 0x4ae   : > { %v11239_v4 = vpop.f32.mrb[200].mxu1 }
 0x4af   : > { %7977 = vmatmul.mubr.bf16.gmra.mrb[52].mxu0 %v4370_v8  ;;  %v8042_v13 = vpop.f32.mrb[201].mxu1  ;;  %v5500_v8 = vshrl.u32 %v10943_v29, 16  ;;  %v5498_v33 = vsel %vm5418_vm0, %v5488_v16, %v5497_v53 }
 0x4b0   : > { %v11244_v47 = vpop.f32.mrb[202].mxu1  ;;  %7980 = vmatprep.mubr.msk.bf16.mxu0 %vm8932_vm1, %v12443_v30  ;;  %v5503_v13 = vshll.u32 %v10943_v29, 16  ;;  %v4374_v29 = vsel %vm4355_vm15, %v4371_v2, %v4373_v35 }
 0x4b1   : > { %v8043_v23 = vpop.f32.mrb[203].mxu1 }
 0x4b2   : > { %v5505_v25 = vrot.slane %v5503_v13, 3  ;;  %v4375_v13 = vrot.slane %v8874_v39, 2 }
 0x4b3   : > { %8181 = vmatmul.mubr.bf16.gmra.mrb[52].mxu1 %v5489_v5  ;;  %v5502_v5 = vrot.slane %v5500_v8, 2 }
 0x4b4   : > { %8184 = vmatprep.mubr.msk.bf16.mxu1 %vm8932_vm1, %v12443_v30 }
 0x4b5   : > { %v5506_v36 = vor.u32 %v5505_v25, %v5502_v5  ;;  %v8877_v5 = vld [vmem:[#allocation2 + $0x64] sm:$0xff]  }
 0x4b6   : > { %v11251_v45 = vpop.f32.mrb[204].mxu1 }
 0x4b7   : > { %7981 = vmatmul.mubr.bf16.gmra.mrb[56].mxu0 %v4372_v15  ;;  %v8046_v23 = vpop.f32.mrb[205].mxu1  ;;  %v5509_v15 = vshrl.u32 %v10954_v0, 16  ;;  %v5507_v8 = vsel %vm5418_vm0, %v5497_v53, %v5506_v36 }
 0x4b8   : > { %v11256_v38 = vpop.f32.mrb[206].mxu1  ;;  %7984 = vmatprep.mubr.msk.bf16.mxu0 %vm8932_vm1, %v12443_v30  ;;  %v5512_v23 = vshll.u32 %v10954_v0, 16  ;;  %v4376_v0 = vsel %vm4355_vm15, %v4373_v35, %v4375_v13 }
 0x4b9   : > { %v8047_v12 = vpop.f32.mrb[207].mxu1 }
 0x4ba   : > { %v5514_v58 = vrot.slane %v5512_v23, 3  ;;  %v4377_v23 = vrot.slane %v8877_v5, 2 }
 0x4bb   : > { %8185 = vmatmul.mubr.bf16.gmra.mrb[56].mxu1 %v5498_v33  ;;  %v5511_v33 = vrot.slane %v5509_v15, 2 }
 0x4bc   : > { %8188 = vmatprep.mubr.msk.bf16.mxu1 %vm8932_vm1, %v12443_v30 }
 0x4bd   : > { %v5515_v2 = vor.u32 %v5514_v58, %v5511_v33  ;;  %v8879_v33 = vld [vmem:[#allocation2 + $0x6c] ss:$0 sps:$4 sm:$0xff]  }
 0x4be   : > { %v11263_v6 = vpop.f32.mrb[208].mxu1 }
 0x4bf   : > { %7985 = vmatmul.mubr.bf16.gmra.mrb[60].mxu0 %v4374_v29  ;;  %v8050_v12 = vpop.f32.mrb[209].mxu1  ;;  %v5518_v29 = vshrl.u32 %v10956_v37, 16  ;;  %v5516_v15 = vsel %vm5418_vm0, %v5506_v36, %v5515_v2 }
 0x4c0   : > { %v11268_v16 = vpop.f32.mrb[210].mxu1  ;;  %7988 = vmatprep.mubr.msk.bf16.mxu0 %vm8932_vm1, %v12443_v30  ;;  %v5521_v12 = vshll.u32 %v10956_v37, 16  ;;  %v4378_v37 = vsel %vm4355_vm15, %v4375_v13, %v4377_v23 }
 0x4c1   : > { %v8051_v51 = vpop.f32.mrb[211].mxu1 }
 0x4c2   : > { %v5523_v27 = vrot.slane %v5521_v12, 3  ;;  %v4379_v12 = vrot.slane %v8879_v33, 2 }
 0x4c3   : > { %8189 = vmatmul.mubr.bf16.gmra.mrb[60].mxu1 %v5507_v8  ;;  %v5520_v8 = vrot.slane %v5518_v29, 2 }
 0x4c4   : > { %8192 = vmatprep.mubr.msk.bf16.mxu1 %vm8932_vm1, %v12443_v30  ;;  %v4380_v13 = vsel %vm4355_vm15, %v4377_v23, %v4379_v12 }
 0x4c5   : > { %v5524_v35 = vor.u32 %v5523_v27, %v5520_v8 }
 0x4c6   : > { %v11275_v25 = vpop.f32.mrb[212].mxu1 }
 0x4c7   : > { %7989 = vmatmul.mubr.bf16.gmra.mrb[64].mxu0 %v4376_v0  ;;  %v8054_v51 = vpop.f32.mrb[213].mxu1  ;;  %v5527_v0 = vshrl.u32 %v10945_v17, 16  ;;  %v5525_v29 = vsel %vm5418_vm0, %v5515_v2, %v5524_v35 }
 0x4c8   : > { %v11280_v53 = vpop.f32.mrb[214].mxu1  ;;  %7992 = vmatprep.mubr.msk.bf16.mxu0 %vm8932_vm1, %v12443_v30  ;;  %v5530_v51 = vshll.u32 %v10945_v17, 16 }
 0x4c9   : > { %v8055_v39 = vpop.f32.mrb[215].mxu1 }
 0x4ca   : > { %v5532_v18 = vrot.slane %v5530_v51, 3 }
 0x4cb   : > { %8193 = vmatmul.mubr.bf16.gmra.mrb[64].mxu1 %v5516_v15  ;;  %v5529_v15 = vrot.slane %v5527_v0, 2 }
 0x4cc   : > { %8196 = vmatprep.mubr.msk.bf16.mxu1 %vm8932_vm1, %v12443_v30 }
 0x4cd   : > { %v5533_v8 = vor.u32 %v5532_v18, %v5529_v15 }
 0x4ce   : > { %v11287_v58 = vpop.f32.mrb[216].mxu1 }
 0x4cf   : > { %7993 = vmatmul.mubr.bf16.gmra.mrb[68].mxu0 %v4378_v37  ;;  %v8058_v39 = vpop.f32.mrb[217].mxu1  ;;  %v5534_v33 = vsel %vm5418_vm0, %v5524_v35, %v5533_v8 }
 0x4d0   : > { %v11292_v36 = vpop.f32.mrb[218].mxu1  ;;  %7996 = vmatprep.mubr.msk.bf16.mxu0 %vm8932_vm1, %v12443_v30 }
 0x4d1   : > { %v8059_v5 = vpop.f32.mrb[219].mxu1 }
 0x4d2   : > { %v8882_v5 = vld [vmem:[%s10297_s23 + $0x80] sm:$0xff]  }
 0x4d3   : > { %8197 = vmatmul.mubr.bf16.gmra.mrb[68].mxu1 %v5525_v29 }
 0x4d4   : > { %8200 = vmatprep.mubr.msk.bf16.mxu1 %vm8932_vm1, %v12443_v30 }
 0x4d6   : > { %v11299_v27 = vpop.f32.mrb[220].mxu1 }
 0x4d7   : > { %7997 = vmatmul.mubr.bf16.gmra.mrb[72].mxu0 %v4380_v13  ;;  %v8062_v37 = vpop.f32.mrb[221].mxu1 }
 0x4d8   : > { %v11302_v39 = vpop.f32.mrb[222].mxu1  ;;  %8000 = vmatprep.mubr.msk.bf16.mxu0 %vm8932_vm1, %v12443_v30  ;;  %v8884_v37 = vld [vmem:[%s10297_s23 + $0x90] sm:$0xff]  }
 0x4d9   : > { %v8063_v2 = vpop.f32.mrb[223].mxu1 }
 0x4db   : > { %8201 = vmatmul.mubr.bf16.gmra.mrb[72].mxu1 %v5534_v33 }
 0x4dc   : > { %8204 = vmatprep.mubr.msk.bf16.mxu1 %vm8932_vm1, %v12443_v30 }
 0x4de   : > { %v11309_v0 = vpop.f32.mrb[224].mxu1 }
 0x4df   : > { %8001 = vmatmul.mubr.bf16.gmra.mrb[76].mxu0 %v4379_v12  ;;  %v8066_v18 = vpop.f32.mrb[225].mxu1  ;;  %v8883_v12 = vld [vmem:[%s10297_s23 + $0x88] sm:$0xff]  }
 0x4e0   : > { %v11311_v23 = vpop.f32.mrb[226].mxu1  ;;  %8224 = vmatprep.mubr.msk.bf16.mxu0 %vm8932_vm1, %v12443_v30 }
 0x4e1   : > { %v8067_v51 = vpop.f32.mrb[227].mxu1 }
 0x4e2   : > { %v8885_v51 = vld [vmem:[%s10297_s23 + $0x98] sm:$0xff]  }
 0x4e3   : > { %8205 = vmatmul.mubr.bf16.gmra.mrb[76].mxu1 %v5533_v8 }
 0x4e6   : > { %v11316_v29 = vpop.f32.mrb[228].mxu1 }
 0x4e7   : > { %v8070_v35 = vpop.f32.mrb[229].mxu1  ;;  %8225 = vmatmul.mubr.bf16.vlgmr.msra.gmra.mrb[80].mxu0 %v10707_v56 }
 0x4e8   : > { %v5003_v15 = vpop.f32.mrb[230].mxu1  ;;  %8277 = vmatpush3.bf16.msra.mxu0 %v8882_v5  ;;  %8228 = vmatprep.mubr.msk.bf16.mxu0 %vm8932_vm1, %v12443_v30 }
 0x4e9   : > { %v8071_v13 = vpop.f32.mrb[231].mxu1  ;;  %8278 = vmatprep.subr.bf16.mxu0 %v12443_v30 }
 0x4ec   : > { %8279 = vmatpush3.bf16.msra.mxu0 %v8883_v12 }
 0x4ed   : > { %8280 = vmatprep.subr.bf16.mxu0 %v12443_v30 }
 0x4ee   : > { %v5208_v8 = vpop.f32.mrb[232].mxu1 }
 0x4ef   : > { %v11326_v2 = vadd.f32 %v5208_v8, %v11168_v61  ;;  %v8090_v33 = vpop.f32.mrb[233].mxu1  ;;  %8229 = vmatmul.mubr.bf16.gmra.mrb[84].mxu0 %v10721_v21  ;;  %v8886_v61 = vld [vmem:[%s10297_s23 + $0xa0] sm:$0xff]  }
 0x4f0   : > { %v5211_v18 = vpop.f32.mrb[234].mxu1  ;;  %8232 = vmatprep.mubr.msk.bf16.mxu0 %vm8932_vm1, %v12443_v30  ;;  %8281 = vmatpush3.bf16.msra.mxu0 %v8884_v37 }
 0x4f1   : > { %v11333_v5 = vadd.f32 %v5211_v18, %v11173_v59  ;;  %v8091_v35 = vpop.f32.mrb[235].mxu1  ;;  %8282 = vmatprep.subr.bf16.mxu0 %v12443_v30  ;;  %v8887_v59 = vld [vmem:[%s10297_s23 + $0xa8] sm:$0xff]   ;;  %v8888_v18 = vld [vmem:[%s10297_s23 + $0xb0] sm:$0xff]  }
 0x4f4   : > { %8283 = vmatpush3.bf16.msra.mxu0 %v8885_v51 }
 0x4f5   : > { %8284 = vmatprep.subr.bf16.mxu0 %v12443_v30 }
 0x4f6   : > { %v5216_v15 = vpop.f32.mrb[236].mxu1 }
 0x4f7   : > { %v11339_v12 = vadd.f32 %v5216_v15, %v11184_v49  ;;  %v8094_v13 = vpop.f32.mrb[237].mxu1  ;;  %8233 = vmatmul.mubr.bf16.gmra.mrb[88].mxu0 %v10756_v42 }
 0x4f8   : > { %v5219_v37 = vpop.f32.mrb[238].mxu1  ;;  %8236 = vmatprep.mubr.msk.bf16.mxu0 %vm8932_vm1, %v12443_v30  ;;  %8285 = vmatpush3.bf16.msra.mxu0 %v8886_v61 }
 0x4f9   : > { %v11346_v8 = vadd.f32 %v5219_v37, %v11189_v46  ;;  %v8095_v33 = vpop.f32.mrb[239].mxu1  ;;  %8286 = vmatprep.subr.bf16.mxu0 %v12443_v30  ;;  %v8890_v46 = vld [vmem:[%s10297_s23 + $0xb8] sm:$0xff]  }
 0x4fc   : > { %8287 = vmatpush3.bf16.msra.mxu0 %v8887_v59 }
 0x4fd   : > { %8288 = vmatprep.subr.bf16.mxu0 %v12443_v30 }
 0x4fe   : > { %v5224_v49 = vpop.f32.mrb[240].mxu1 }
 0x4ff   : > { %v11352_v51 = vadd.f32 %v5224_v49, %v11200_v50  ;;  %v8098_v35 = vpop.f32.mrb[241].mxu1  ;;  %8237 = vmatmul.mubr.bf16.gmra.mrb[92].mxu0 %v10766_v9 }
 0x500   : > { %v5227_v15 = vpop.f32.mrb[242].mxu1  ;;  %8240 = vmatprep.mubr.msk.bf16.mxu0 %vm8932_vm1, %v12443_v30  ;;  %8289 = vmatpush3.bf16.msra.mxu0 %v8888_v18 }
 0x501   : > { %v11359_v61 = vadd.f32 %v5227_v15, %v11205_v34  ;;  %v8099_v13 = vpop.f32.mrb[243].mxu1  ;;  %8290 = vmatprep.subr.bf16.mxu0 %v12443_v30 }
 0x504   : > { %8291 = vmatpush3.bf16.msra.mxu0 %v8890_v46 }
 0x505   : > { %8344 = vmatprep.subr.bf16.mxu0 %v12443_v30 }
 0x506   : > { %v5232_v50 = vpop.f32.mrb[244].mxu1 }
 0x507   : > { %v11364_v37 = vadd.f32 %v5232_v50, %v11215_v7  ;;  %v8102_v59 = vpop.f32.mrb[245].mxu1  ;;  %8241 = vmatmul.mubr.bf16.gmra.mrb[96].mxu0 %v10796_v14 }
 0x508   : > { %v5235_v33 = vpop.f32.mrb[246].mxu1  ;;  %8244 = vmatprep.mubr.msk.bf16.mxu0 %vm8932_vm1, %v12443_v30 }
 0x509   : > { %v11370_v34 = vadd.f32 %v5235_v33, %v11220_v60  ;;  %v8103_v18 = vpop.f32.mrb[247].mxu1 }
 0x50e   : > { %v5240_v49 = vpop.f32.mrb[248].mxu1 }
 0x50f   : > { %v11373_v35 = vadd.f32 %v5240_v49, %v11227_v48  ;;  %v8106_v15 = vpop.f32.mrb[249].mxu1  ;;  %8245 = vmatmul.mubr.bf16.gmra.mrb[100].mxu0 %v10798_v26  ;;  %v3033_v49 = vlaneseq }
 0x510   : > { %v5243_v7 = vpop.f32.mrb[250].mxu1  ;;  %8248 = vmatprep.mubr.msk.bf16.mxu0 %vm8932_vm1, %v12443_v30 }
 0x511   : > { %v11379_v46 = vadd.f32 %v5243_v7, %v11232_v40  ;;  %v8107_v13 = vpop.f32.mrb[251].mxu1 }
 0x512   : > { %v11396_v13 = vshrl.u32 %v3033_v49, 7 }
 0x514   : > { %v11422_v17 = vadd.s32 24, %v11396_v13 }
 0x516   : > { %v5248_v50 = vpop.f32.mrb[252].mxu1 }
 0x517   : > { %v11382_v60 = vadd.f32 %v5248_v50, %v11239_v4  ;;  %v8110_v59 = vpop.f32.mrb[253].mxu1  ;;  %8249 = vmatmul.mubr.bf16.gmra.mrb[104].mxu0 %v10760_v41 }
 0x518   : > { %v5251_v48 = vpop.f32.mrb[254].mxu1  ;;  %8252 = vmatprep.mubr.msk.bf16.mxu0 %vm8932_vm1, %v12443_v30  ;;  %v11402_v59 = vadd.s32 8, %v11396_v13 }
 0x519   : > { %v11388_v33 = vadd.f32 %v5251_v48, %v11244_v47  ;;  %v8111_v18 = vpop.f32.mrb[255].mxu1 }
 0x51e   : > { %v5256_v15 = vpop.f32.mrb[0].mxu1 }
 0x51f   : > { %v11391_v40 = vadd.f32 %v5256_v15, %v11251_v45  ;;  %v8114_v7 = vpop.f32.mrb[1].mxu1  ;;  %8253 = vmatmul.mubr.bf16.gmra.mrb[108].mxu0 %v10778_v54  ;;  %v11405_v45 = vmul.u32.u64.low 2454267026, %v11396_v13  ;;  %v11406_v18 = vmul.u32.u64.high 2454267026, %v11396_v13, %v11405_v45  ;;  %v11409_v15 = vadd.s32 16, %v11396_v13 }
 0x520   : > { %v5259_v4 = vpop.f32.mrb[2].mxu1  ;;  %8256 = vmatprep.mubr.msk.bf16.mxu0 %vm8932_vm1, %v12443_v30 }
 0x521   : > { %v11399_v50 = vadd.f32 %v5259_v4, %v11256_v38  ;;  %v8115_v47 = vpop.f32.mrb[3].mxu1  ;;  %vm3065_vm2 = vc.u32 %v11405_v45, 2454267026  ;;  %v11442_v45 = vadd.s32 32, %v11396_v13 }
 0x522   : > { %v11418_v4 = vmul.u32.u64.low 2454267026, %v11402_v59  ;;  %v11419_v47 = vmul.u32.u64.high 2454267026, %v11402_v59, %v11418_v4  ;;  %v3066_v62 = vsel %vm3065_vm2, 1, %v12484_v20 }
 0x523   : > { %v3067_v11 = vadd.s32 %v11406_v18, %v3066_v62  ;;  %v11457_v19 = vmul.u32.u64.low 2454267026, %v11442_v45  ;;  %v11458_v44 = vmul.u32.u64.high 2454267026, %v11442_v45, %v11457_v19 }
 0x524   : > { %vm3079_vm3 = vc.u32 %v11418_v4, 2454267026  ;;  %v12486_v4 = vmov 0.0  }
 0x525   : > { %v3068_v62 = vshrl.u32 %v3067_v11, 3  ;;  %v8904_v11 = vld [vmem:[#allocation2 + $0x4] sm:$0xf]  ;;  %vm3121_vm6 = vc.u32 %v11457_v19, 2454267026 }
 0x526   : > { %v5264_v48 = vpop.f32.mrb[4].mxu1 }
 0x527   : > { %v11412_v7 = vadd.f32 %v5264_v48, %v11263_v6  ;;  %v8118_v49 = vpop.f32.mrb[5].mxu1  ;;  %8257 = vmatmul.mubr.bf16.gmra.mrb[112].mxu0 %v10790_v24  ;;  %v11428_v6 = vmul.u32.u64.low 2454267026, %v11409_v15  ;;  %v11429_v48 = vmul.u32.u64.high 2454267026, %v11409_v15, %v11428_v6 }
 0x528   : > { %v5267_v38 = vpop.f32.mrb[6].mxu1  ;;  %8260 = vmatprep.mubr.msk.bf16.mxu0 %vm8932_vm1, %v12443_v30  ;;  %v11432_v49 = vmul.u32.u64.low 2454267026, %v11422_v17  ;;  %v11433_v30 = vmul.u32.u64.high 2454267026, %v11422_v17, %v11432_v49 }
 0x529   : > { %12482 = vst [vmem:[#allocation22_spill] sm:$0xff] %v11412_v7  ;;  %v11425_v3 = vadd.f32 %v5267_v38, %v11268_v16  ;;  %v8119_v1 = vpop.f32.mrb[7].mxu1  ;;  %vm3093_vm4 = vc.u32 %v11428_v6, 2454267026 }
 0x52a   : > { %v3080_v1 = vsel %vm3079_vm3, 1, %v12484_v20  ;;  %vm3107_vm5 = vc.u32 %v11432_v49, 2454267026 }
 0x52b   : > { %12483 = vst [vmem:[#allocation23_spill] sm:$0xff] %v11425_v3  ;;  %v3081_v57 = vadd.s32 %v11419_v47, %v3080_v1  ;;  %v3108_v32 = vsel %vm3107_vm5, 1, %v12484_v20  ;;  %v3069_v3 = vmul.u32 14, %v3068_v62  ;;  %v8905_v62 = vld [vmem:[#allocation2 + $0x68] sm:$0x3] }
 0x52c   : > { %v3109_v47 = vadd.s32 %v11433_v30, %v3108_v32 }
 0x52d   : > { %v3082_v63 = vshrl.u32 %v3081_v57, 3  ;;  %v11477_v57 = vadd.s32 56, %v11396_v13 }
 0x52e   : > { %v5272_v52 = vpop.f32.mrb[8].mxu1 }
 0x52f   : > { %v11437_v10 = vadd.f32 %v5272_v52, %v11275_v25  ;;  %v8122_v16 = vpop.f32.mrb[9].mxu1  ;;  %8261 = vmatmul.mubr.bf16.gmra.mrb[116].mxu0 %v10823_v31  ;;  %v3094_v25 = vsel %vm3093_vm4, 1, %v12484_v20  ;;  %v3083_v19 = vmul.u32 14, %v3082_v63 }
 0x530   : > { %v5275_v38 = vpop.f32.mrb[10].mxu1  ;;  %8264 = vmatprep.mubr.msk.bf16.mxu0 %vm8932_vm1, %v12486_v4  ;;  %v11452_v16 = vadd.s32 40, %v11396_v13  ;;  %v3095_v18 = vadd.s32 %v11429_v48, %v3094_v25  ;;  %v6010_v25 = vrot.slane %v10707_v56, 1  ;;  %v3122_v56 = vsel %vm3121_vm6, 1, %v12484_v20 }
 0x531   : > { %12485 = vst [vmem:[#allocation24_spill] sm:$0xff] %v11437_v10  ;;  %v11448_v6 = vadd.f32 %v5275_v38, %v11280_v53  ;;  %v8123_v52 = vpop.f32.mrb[11].mxu1  ;;  %v11466_v38 = vadd.s32 48, %v11396_v13  ;;  %v7172_v10 = vcombine.low %v5782_v55, %v8904_v11  ;;  %v3123_v63 = vadd.s32 %v11458_v44, %v3122_v56 }
 0x532   : > { %v11462_v53 = vmul.u32.u64.low 2454267026, %v11452_v16  ;;  %v11463_v49 = vmul.u32.u64.high 2454267026, %v11452_v16, %v11462_v53  ;;  %v3096_v7 = vshrl.u32 %v3095_v18, 3  ;;  %v7163_v18 = vcombine.low %v8905_v62, %v8905_v62 }
 0x533   : > { %12487 = vst [vmem:[#allocation25_spill] sm:$0xff] %v11448_v6  ;;  %v6009_v11 = vrot.slane %v7172_v10, 1  ;;  %v3084_v62 = vsub.s32 %v11402_v59, %v3083_v19  ;;  %v6020_v59 = vrot.slane %v10798_v26, 1 }
 0x534   : > { %vm3135_vm7 = vc.u32 %v11462_v53, 2454267026 }
 0x535   : > { %vm3410_vm12 = vcmp.ne.s32.totalorder %v3084_v62, 0  ;;  %vm3435_vm14 = vcmp.lt.s32.totalorder %v3084_v62, 0 }
 0x536   : > { %v5280_v52 = vpop.f32.mrb[12].mxu1  ;;  %vm11546_vm3 = vmand %vm3435_vm14, %vm3410_vm12 }
 0x537   : > { %v11470_v1 = vadd.f32 %v5280_v52, %v11287_v58  ;;  %v8126_v6 = vpop.f32.mrb[13].mxu1  ;;  %8265 = vmatmul.mubr.bf16.gmra.mrb[120].mxu0 %v10837_v22  ;;  %v11483_v58 = vmul.u32.u64.low 2454267026, %v11466_v38  ;;  %v11484_v55 = vmul.u32.u64.high 2454267026, %v11466_v38, %v11483_v58  ;;  %v3110_v52 = vshrl.u32 %v3109_v47, 3 }
 0x538   : > { %v5283_v48 = vpop.f32.mrb[14].mxu1  ;;  %8268 = vmatprep.mubr.msk.bf16.mxu0 %vm8932_vm1, %v12486_v4  ;;  %v6012_v6 = vrot.slane %v10721_v21, 1  ;;  %v3097_v22 = vmul.u32 14, %v3096_v7  ;;  %v6016_v21 = vrot.slane %v10766_v9, 1  ;;  %v6018_v7 = vrot.slane %v10796_v14, 1 }
 0x539   : > { %12488 = vst [vmem:[#allocation26_spill] sm:$0xff] %v11470_v1  ;;  %v11480_v30 = vadd.f32 %v5283_v48, %v11292_v36  ;;  %v8127_v32 = vpop.f32.mrb[15].mxu1  ;;  %v6014_v1 = vrot.slane %v10756_v42, 1  ;;  %v3136_v36 = vsel %vm3135_vm7, 1, %v12484_v20  ;;  %vm3149_vm8 = vc.u32 %v11483_v58, 2454267026 }
 0x53a   : > { %v11491_v53 = vmul.u32.u64.low 2454267026, %v11477_v57  ;;  %v11492_v48 = vmul.u32.u64.high 2454267026, %v11477_v57, %v11491_v53  ;;  %v3070_v32 = vsub.s32 %v11396_v13, %v3069_v3  ;;  %v11499_v10 = vsel %vm6008_vm13, %v6010_v25, %v6012_v6 }
 0x53b   : > { %12489 = vst [vmem:[#allocation27_spill] sm:$0xff] %v11480_v30  ;;  %v3111_v42 = vmul.u32 14, %v3110_v52  ;;  %v12490_v3 = vcombine.low %v10885_v28, %v10896_v43  ;;  %v11509_v9 = vsel %vm6008_vm13, %v6009_v11, %v6010_v25  ;;  %v3137_v44 = vadd.s32 %v11463_v49, %v3136_v36 }
 0x53c   : > { %v3098_v14 = vsub.s32 %v11409_v15, %v3097_v22  ;;  %vm3163_vm9 = vc.u32 %v11491_v53, 2454267026  ;;  %v11519_v28 = vadd.s32 64, %v11396_v13  ;;  %vm3409_vm10 = vcmp.ne.s32.totalorder %v3070_v32, 0 }
 0x53d   : > { %v11525_v49 = vsel %vm6008_vm13, %v6012_v6, %v6014_v1  ;;  %v3124_v25 = vshrl.u32 %v3123_v63, 3  ;;  %vm3434_vm11 = vcmp.lt.s32.totalorder %v3070_v32, 0  ;;  %v3484_v52 = vadd.s32 14, %v3070_v32 }
 0x53e   : > { %v5288_v47 = vpop.f32.mrb[16].mxu1  ;;  %v3112_v22 = vsub.s32 %v11422_v17, %v3111_v42  ;;  %v3138_v15 = vshrl.u32 %v3137_v44, 3  ;;  %v3164_v56 = vsel %vm3163_vm9, 1, %v12484_v20  ;;  %vm3411_vm15 = vcmp.ne.s32.totalorder %v3098_v14, 0  ;;  %vm11535_vm2 = vmand %vm3434_vm11, %vm3409_vm10 }
 0x53f   : > { %v11503_v30 = vadd.f32 %v5288_v47, %v11299_v27  ;;  %v8130_v31 = vpop.f32.mrb[17].mxu1  ;;  %8269 = vmatmul.mubr.bf16.gmra.mrb[124].mxu0 %v12490_v3  ;;  %vm3436_vm0 = vcmp.lt.s32.totalorder %v3098_v14, 0  ;;  %v3485_v36 = vadd.s32 14, %v3084_v62  ;;  %v3125_v53 = vmul.u32 14, %v3124_v25  ;;  %v8893_v47 = vld [vmem:[%s10297_s23 + $0x200] sm:$0xff]  }
 0x540   : > { %v5291_v19 = vpop.f32.mrb[18].mxu1  ;;  %8272 = vmatprep.mubr.msk.bf16.mxu0 %vm8932_vm1, %v12486_v4  ;;  %v3150_v31 = vsel %vm3149_vm8, 1, %v12484_v20  ;;  %v11540_v17 = vsel %vm6008_vm13, %v6014_v1, %v6016_v21  ;;  %v3486_v42 = vadd.s32 14, %v3098_v14  ;;  %vm3412_vm4 = vcmp.ne.s32.totalorder %v3112_v22, 0  ;;  %vm3461_vm5 = vmand %vm3436_vm0, %vm3411_vm15 }
 0x541   : > { %v11522_v43 = vadd.f32 %v5291_v19, %v11302_v39  ;;  %v8131_v27 = vpop.f32.mrb[19].mxu1  ;;  %v3151_v58 = vadd.s32 %v11484_v55, %v3150_v31  ;;  %v11531_v39 = vmul.u32.u64.low 2454267026, %v11519_v28  ;;  %v11532_v11 = vmul.u32.u64.high 2454267026, %v11519_v28, %v11531_v39 }
 0x542   : > { %v11543_v55 = vsel %vm6008_vm13, %v6016_v21, %v6018_v7  ;;  %v3165_v3 = vadd.s32 %v11492_v48, %v3164_v56  ;;  %v11552_v44 = vadd.s32 72, %v11396_v13  ;;  %vm3437_vm6 = vcmp.lt.s32.totalorder %v3112_v22, 0 }
 0x543   : > { %v3139_v21 = vmul.u32 14, %v3138_v15  ;;  %v3152_v31 = vshrl.u32 %v3151_v58, 3  ;;  %v11563_v48 = vsel %vm11535_vm2, %v3484_v52, %v3070_v32  ;;  %vm3177_vm7 = vc.u32 %v11531_v39, 2454267026  ;;  %vm3462_vm8 = vmand %vm3437_vm6, %vm3412_vm4 }
 0x544   : > { %12495 = vst [vmem:[#allocation28_spill] sm:$0xff] %v11563_v48  ;;  %v11576_v58 = vsel %vm11546_vm3, %v3485_v36, %v3084_v62  ;;  %v3487_v56 = vadd.s32 14, %v3112_v22  ;;  %v11579_v32 = vsub.s32 %v11442_v45, %v3125_v53  ;;  %v11581_v52 = vsel %vm3461_vm5, %v3486_v42, %v3098_v14  ;;  %v8895_v36 = vld [vmem:[%s10297_s23 + $0x210] sm:$0xff]  }
 0x545   : > { %12497 = vst [vmem:[#allocation30_spill] sm:$0xff] %v11576_v58  ;;  %12498 = vst [vmem:[#allocation31_spill] sm:$0xff] %v11581_v52  ;;  %v11586_v39 = vmul.u32.u64.low 2454267026, %v11552_v44  ;;  %v11587_v6 = vmul.u32.u64.high 2454267026, %v11552_v44, %v11586_v39  ;;  %v3178_v62 = vsel %vm3177_vm7, 1, %v12484_v20  ;;  %vm3534_vm9 = vcmp.ge.s32.totalorder %v11563_v48, 1 }
 0x546   : > { %v5296_v63 = vpop.f32.mrb[20].mxu1  ;;  %v11595_v45 = vadd.s32 80, %v11396_v13  ;;  %v11598_v14 = vadd.s32 88, %v11396_v13  ;;  %vm3535_vm10 = vcmp.ge.s32.totalorder %v11576_v58, 1  ;;  %vm3536_vm11 = vcmp.ge.s32.totalorder %v11581_v52, 1 }
 0x547   : > { %v11555_v19 = vadd.f32 %v5296_v63, %v11309_v0  ;;  %v8134_v1 = vpop.f32.mrb[21].mxu1  ;;  %8273 = vmatmul.mubr.bf16.gmra.mrb[128].mxu0 %v7163_v18  ;;  %v11568_v0 = vsel %vm6008_vm13, %v6018_v7, %v6020_v59  ;;  %v12449_v18 = vrot.slane %v10760_v41, 1  ;;  %v3166_v7 = vshrl.u32 %v3165_v3, 3 }
 0x548   : > { %v5299_v27 = vpop.f32.mrb[22].mxu1  ;;  %8292 = vmatprep.mubr.msk.bf16.mxu0 %vm8932_vm1, %v12486_v4  ;;  %v3153_v63 = vmul.u32 14, %v3152_v31  ;;  %vm3413_vm12 = vcmp.ne.s32.totalorder %v11579_v32, 0  ;;  %vm3438_vm14 = vcmp.lt.s32.totalorder %v11579_v32, 0  ;;  %v3179_v1 = vadd.s32 %v11532_v11, %v3178_v62 }
 0x549   : > { %v11572_v25 = vadd.f32 %v5299_v27, %v11311_v23  ;;  %v8135_v15 = vpop.f32.mrb[23].mxu1  ;;  %v3140_v23 = vsub.s32 %v11452_v16, %v3139_v21  ;;  %v11603_v16 = vsel %vm3462_vm8, %v3487_v56, %v3112_v22  ;;  %v3167_v3 = vmul.u32 14, %v3166_v7  ;;  %vm11631_vm3 = vmand %vm3438_vm14, %vm3413_vm12 }
 0x54a   : > { %12499 = vst [vmem:[#allocation32_spill] sm:$0xff] %v11603_v16  ;;  %vm3191_vm15 = vc.u32 %v11586_v39, 2454267026  ;;  %v11613_v22 = vsub.s32 %v11466_v38, %v3153_v63  ;;  %v8894_v15 = vld [vmem:[%s10297_s23 + $0x208] sm:$0xff]   ;;  %v11619_v11 = vmul.u32.u64.low 2454267026, %v11595_v45  ;;  %v11620_v56 = vmul.u32.u64.high 2454267026, %v11595_v45, %v11619_v11 }
 0x54b   : > { %12496 = vst [vmem:[#allocation29_spill] sm:$0xff] %v11572_v25  ;;  %vm3414_vm0 = vcmp.ne.s32.totalorder %v3140_v23, 0  ;;  %vm3439_vm2 = vcmp.lt.s32.totalorder %v3140_v23, 0  ;;  %v3488_v63 = vadd.s32 14, %v11579_v32  ;;  %v3489_v62 = vadd.s32 14, %v3140_v23 }
 0x54c   : > { %vm3537_vm4 = vcmp.ge.s32.totalorder %v11603_v16, 1  ;;  %vm11651_vm5 = vmand %vm3439_vm2, %vm3414_vm0  ;;  %v11656_v39 = vsub.s32 %v11477_v57, %v3167_v3  ;;  %v3180_v26 = vshrl.u32 %v3179_v1, 3  ;;  %vm3415_vm6 = vcmp.ne.s32.totalorder %v11613_v22, 0 }
 0x54d   : > { %vm3440_vm7 = vcmp.lt.s32.totalorder %v11613_v22, 0  ;;  %vm3205_vm8 = vc.u32 %v11619_v11, 2454267026  ;;  %v11676_v1 = vsel %vm3537_vm4, 1.0, %v12486_v4  ;;  %v11681_v52 = vsel %vm11631_vm3, %v3488_v63, %v11579_v32 }
 0x54e   : > { %v5304_v42 = vpop.f32.mrb[24].mxu1  ;;  %v11692_v16 = vadd.s32 104, %v11396_v13  ;;  %vm11700_vm12 = vmand %vm3440_vm7, %vm3415_vm6  ;;  %vm3538_vm14 = vcmp.ge.s32.totalorder %v11681_v52, 1 }
 0x54f   : > { %v11609_v21 = vadd.f32 %v5304_v42, %v11316_v29  ;;  %v8138_v31 = vpop.f32.mrb[25].mxu1  ;;  %8293 = vmatmul.mubr.bf16.vlgmr.msra.gmra.mrb[80].mxu0 %v11509_v9  ;;  %v11623_v29 = vmul.u32.u64.low 2454267026, %v11598_v14  ;;  %v11624_v7 = vmul.u32.u64.high 2454267026, %v11598_v14, %v11623_v29  ;;  %v11643_v42 = vsel %vm6008_vm13, %v6020_v59, %v12449_v18 }
 0x550   : > { %v5307_v27 = vpop.f32.mrb[26].mxu1  ;;  %8345 = vmatpush3.bf16.msra.mxu0 %v8893_v47  ;;  %8296 = vmatprep.mubr.msk.bf16.mxu0 %vm8932_vm1, %v12486_v4  ;;  %v3192_v47 = vsel %vm3191_vm15, 1, %v12484_v20  ;;  %v6898_v31 = vsel %vm3534_vm9, 1.0, %v12486_v4  ;;  %v6899_v59 = vsel %vm3535_vm10, 1.0, %v12486_v4  ;;  %v11664_v18 = vsel %vm3536_vm11, 1.0, %v12486_v4 }
 0x551   : > { %12500 = vst [vmem:[#allocation33_spill] sm:$0xff] %v11609_v21  ;;  %v8139_v9 = vpop.f32.mrb[27].mxu1  ;;  %8346 = vmatprep.subr.bf16.mxu0 %v12486_v4  ;;  %v3193_v57 = vadd.s32 %v11587_v6, %v3192_v47  ;;  %vm3219_vm9 = vc.u32 %v11623_v29, 2454267026  ;;  %v3490_v6 = vadd.s32 14, %v11613_v22  ;;  %vm3416_vm10 = vcmp.ne.s32.totalorder %v11656_v39, 0 }
 0x552   : > { %v4476_v27 = vpop.f32.mrb[28].mxu0  ;;  %vm3441_vm11 = vcmp.lt.s32.totalorder %v11656_v39, 0  ;;  %v3220_v9 = vsel %vm3219_vm9, 1, %v12484_v20  ;;  %v11721_v21 = vadd.s32 112, %v11396_v13 }
 0x553   : > { %v7954_v53 = vpop.f32.mrb[29].mxu0  ;;  %v4603_v32 = vmul.f32 %v6898_v31, %v4476_v27  ;;  %v8896_v27 = vld [vmem:[%s10297_s23 + $0x218] sm:$0xff]   ;;  %vm3466_vm15 = vmand %vm3441_vm11, %vm3416_vm10 }
 0x554   : > { %v4479_v48 = vpop.f32.mrb[30].mxu0  ;;  %8347 = vmatpush3.bf16.msra.mxu0 %v8894_v15  ;;  %v11671_v53 = vadd.s32 96, %v11396_v13  ;;  %v11685_v15 = vsel %vm11651_vm5, %v3489_v62, %v3140_v23  ;;  %v3206_v62 = vsel %vm3205_vm8, 1, %v12484_v20 }
 0x555   : > { %v7955_v3 = vpop.f32.mrb[31].mxu0  ;;  %12505 = vst [vmem:[#allocation34_spill] sm:$0xff] %v11685_v15  ;;  %8348 = vmatprep.subr.bf16.mxu0 %v12486_v4  ;;  %vm3539_vm2 = vcmp.ge.s32.totalorder %v11685_v15, 1 }
 0x556   : > { %v5630_v47 = vpop.f32.mrb[28].mxu1  ;;  %v3181_v3 = vmul.u32 14, %v3180_v26 }
 0x557   : > { %v5732_v38 = vadd.f32 %v5630_v47, %v11326_v2  ;;  %v8158_v63 = vpop.f32.mrb[29].mxu1  ;;  %8297 = vmatmul.mubr.bf16.gmra.mrb[84].mxu0 %v11499_v10  ;;  %v3491_v2 = vadd.s32 14, %v11656_v39  ;;  %v3194_v10 = vshrl.u32 %v3193_v57, 3  ;;  %v11726_v57 = vsel %vm11700_vm12, %v3490_v6, %v11613_v22 }
 0x558   : > { %v5633_v31 = vpop.f32.mrb[30].mxu1  ;;  %8300 = vmatprep.mubr.msk.bf16.mxu0 %vm8932_vm1, %v12486_v4  ;;  %8349 = vmatpush3.bf16.msra.mxu0 %v8895_v36  ;;  %v11713_v26 = vmul.u32.u64.low 2454267026, %v11671_v53  ;;  %v11714_v47 = vmul.u32.u64.high 2454267026, %v11671_v53, %v11713_v26  ;;  %v4604_v63 = vmul.f32 %v6899_v59, %v4479_v48  ;;  %12508 = vst [vmem:[#allocation35_spill] sm:$0xff] %v11726_v57  ;;  %v11729_v25 = vsub.s32 %v11519_v28, %v3181_v3 }
 0x559   : > { %v11716_v58 = vadd.f32 %v5732_v38, %v4603_v32  ;;  %v5733_v11 = vadd.f32 %v5633_v31, %v11333_v5  ;;  %v8159_v29 = vpop.f32.mrb[31].mxu1  ;;  %8350 = vmatprep.subr.bf16.mxu0 %v12486_v4  ;;  %v3207_v48 = vadd.s32 %v11620_v56, %v3206_v62  ;;  %v3221_v5 = vadd.s32 %v11624_v7, %v3220_v9  ;;  %v8897_v56 = vld [vmem:[%s10297_s23 + $0x220] sm:$0xff]  }
 0x55a   : > { %v4484_v36 = vpop.f32.mrb[32].mxu0  ;;  %v11741_v22 = vmul.u32.u64.low 2454267026, %v11692_v16  ;;  %v11742_v6 = vmul.u32.u64.high 2454267026, %v11692_v16, %v11741_v22  ;;  %v3195_v3 = vmul.u32 14, %v3194_v10  ;;  %vm3233_vm0 = vc.u32 %v11713_v26, 2454267026 }
 0x55b   : > { %v11733_v59 = vadd.f32 %v5733_v11, %v4604_v63  ;;  %v7958_v32 = vpop.f32.mrb[33].mxu0  ;;  %v12509_v7 = vrot.slane %v10778_v54, 1  ;;  %v12510_v38 = vrot.slane %v10760_v41, 1  ;;  %v11753_v62 = vadd.s32 120, %v11396_v13 }
 0x55c   : > { %v4487_v28 = vpop.f32.mrb[34].mxu0  ;;  %8351 = vmatpush3.bf16.msra.mxu0 %v8896_v27  ;;  %vm3540_vm3 = vcmp.ge.s32.totalorder %v11726_v57, 1  ;;  %v11759_v31 = vmul.u32.u64.low 2454267026, %v11721_v21  ;;  %v11760_v10 = vmul.u32.u64.high 2454267026, %v11721_v21, %v11759_v31  ;;  %v11763_v41 = vsel %vm3466_vm15, %v3491_v2, %v11656_v39  ;;  %v8898_v2 = vld [vmem:[%s10297_s23 + $0x228] sm:$0xff]  }
 0x55d   : > { %v11750_v23 = vsel %vm6008_vm13, %v12510_v38, %v12509_v7  ;;  %v7959_v9 = vpop.f32.mrb[35].mxu0  ;;  %8352 = vmatprep.subr.bf16.mxu0 %v12486_v4  ;;  %vm3417_vm4 = vcmp.ne.s32.totalorder %v11729_v25, 0  ;;  %v3208_v63 = vshrl.u32 %v3207_v48, 3  ;;  %v3222_v11 = vshrl.u32 %v3221_v5, 3 }
 0x55e   : > { %v5638_v27 = vpop.f32.mrb[32].mxu1  ;;  %v4605_v29 = vmul.f32 %v11664_v18, %v4484_v36  ;;  %v3234_v38 = vsel %vm3233_vm0, 1, %v12484_v20  ;;  %vm3247_vm5 = vc.u32 %v11741_v22, 2454267026  ;;  %vm3442_vm6 = vcmp.lt.s32.totalorder %v11729_v25, 0 }
 0x55f   : > { %v5734_v32 = vadd.f32 %v5638_v27, %v11339_v12  ;;  %v8162_v7 = vpop.f32.mrb[33].mxu1  ;;  %8301 = vmatmul.mubr.bf16.gmra.mrb[88].mxu0 %v11525_v49  ;;  %v11775_v39 = vsub.s32 %v11552_v44, %v3195_v3  ;;  %v11778_v18 = vmul.u32.u64.low 2454267026, %v11753_v62  ;;  %v11779_v12 = vmul.u32.u64.high 2454267026, %v11753_v62, %v11778_v18  ;;  %vm11803_vm8 = vmand %vm3442_vm6, %vm3417_vm4 }
 0x560   : > { %v5641_v9 = vpop.f32.mrb[34].mxu1  ;;  %8304 = vmatprep.mubr.msk.bf16.mxu0 %vm8932_vm1, %v12486_v4  ;;  %8353 = vmatpush3.bf16.msra.mxu0 %v8897_v56  ;;  %v4606_v49 = vmul.f32 %v11676_v1, %v4487_v28  ;;  %vm3261_vm7 = vc.u32 %v11759_v31, 2454267026  ;;  %v3492_v44 = vadd.s32 14, %v11729_v25  ;;  %v3209_v3 = vmul.u32 14, %v3208_v63 }
 0x561   : > { %v11783_v26 = vadd.f32 %v5734_v32, %v4605_v29  ;;  %v5735_v36 = vadd.f32 %v5641_v9, %v11346_v8  ;;  %v8163_v48 = vpop.f32.mrb[35].mxu1  ;;  %8354 = vmatprep.subr.bf16.mxu0 %v12486_v4  ;;  %v3235_v56 = vadd.s32 %v11714_v47, %v3234_v38  ;;  %v3248_v27 = vsel %vm3247_vm5, 1, %v12484_v20  ;;  %v8899_v9 = vld [vmem:[%s10297_s23 + $0x230] sm:$0xff]  }
 0x562   : > { %v4492_v5 = vpop.f32.mrb[36].mxu0  ;;  %v6902_v8 = vsel %vm3538_vm14, 1.0, %v12486_v4  ;;  %v6903_v28 = vsel %vm3539_vm2, 1.0, %v12486_v4  ;;  %v3223_v22 = vmul.u32 14, %v3222_v11  ;;  %v11810_v29 = vsel %vm3540_vm3, 1.0, %v12486_v4 }
 0x563   : > { %v11791_v7 = vadd.f32 %v5735_v36, %v4606_v49  ;;  %v7962_v1 = vpop.f32.mrb[37].mxu0  ;;  %vm3541_vm9 = vcmp.ge.s32.totalorder %v11763_v41, 1  ;;  %v3262_v32 = vsel %vm3261_vm7, 1, %v12484_v20  ;;  %v11816_v38 = vadd.s32 128, %v11396_v13 }
 0x564   : > { %v4495_v63 = vpop.f32.mrb[38].mxu0  ;;  %8355 = vmatpush3.bf16.msra.mxu0 %v8898_v2  ;;  %vm3418_vm10 = vcmp.ne.s32.totalorder %v11775_v39, 0  ;;  %vm3443_vm11 = vcmp.lt.s32.totalorder %v11775_v39, 0  ;;  %v3249_v11 = vadd.s32 %v11742_v6, %v3248_v27  ;;  %vm3275_vm12 = vc.u32 %v11778_v18, 2454267026 }
 0x565   : > { %v7963_v49 = vpop.f32.mrb[39].mxu0  ;;  %8356 = vmatprep.subr.bf16.mxu0 %v12486_v4  ;;  %v11826_v31 = vsel %vm11803_vm8, %v3492_v44, %v11729_v25  ;;  %v3493_v2 = vadd.s32 14, %v11775_v39  ;;  %v3210_v48 = vsub.s32 %v11595_v45, %v3209_v3  ;;  %v3236_v1 = vshrl.u32 %v3235_v56, 3  ;;  %vm11842_vm14 = vmand %vm3443_vm11, %vm3418_vm10 }
 0x566   : > { %v5646_v36 = vpop.f32.mrb[36].mxu1  ;;  %v4607_v49 = vmul.f32 %v6902_v8, %v4492_v5  ;;  %v11833_v6 = vsub.s32 %v11598_v14, %v3223_v22  ;;  %v3263_v27 = vadd.s32 %v11760_v10, %v3262_v32  ;;  %v11853_v14 = vadd.s32 136, %v11396_v13 }
 0x567   : > { %v5736_v57 = vadd.f32 %v5646_v36, %v11352_v51  ;;  %v8166_v15 = vpop.f32.mrb[37].mxu1  ;;  %8305 = vmatmul.mubr.bf16.gmra.mrb[92].mxu0 %v11540_v17  ;;  %v3276_v51 = vsel %vm3275_vm12, 1, %v12484_v20  ;;  %v11849_v17 = vmul.u32.u64.low 2454267026, %v11816_v38  ;;  %v11850_v45 = vmul.u32.u64.high 2454267026, %v11816_v38, %v11849_v17 }
 0x568   : > { %v5649_v47 = vpop.f32.mrb[38].mxu1  ;;  %8308 = vmatprep.mubr.msk.bf16.mxu0 %vm8932_vm1, %v12486_v4  ;;  %8357 = vmatpush3.bf16.msra.mxu0 %v8899_v9  ;;  %v8900_v15 = vld [vmem:[%s10297_s23 + $0x238] sm:$0xff]   ;;  %v4608_v10 = vmul.f32 %v6903_v28, %v4495_v63  ;;  %v3250_v56 = vshrl.u32 %v3249_v11, 3  ;;  %vm3542_vm15 = vcmp.ge.s32.totalorder %v11826_v31, 1  ;;  %vm3419_vm0 = vcmp.ne.s32.totalorder %v3210_v48, 0 }
 0x569   : > { %v11856_v5 = vadd.f32 %v5736_v57, %v4607_v49  ;;  %v5737_v44 = vadd.f32 %v5649_v47, %v11359_v61  ;;  %v8167_v3 = vpop.f32.mrb[39].mxu1  ;;  %8358 = vmatprep.subr.bf16.mxu0 %v12486_v4  ;;  %vm3444_vm2 = vcmp.lt.s32.totalorder %v3210_v48, 0  ;;  %v3237_v8 = vmul.u32 14, %v3236_v1 }
 0x56a   : > { %v4500_v18 = vpop.f32.mrb[40].mxu0  ;;  %v11866_v57 = vsel %vm11842_vm14, %v3493_v2, %v11775_v39  ;;  %v3494_v28 = vadd.s32 14, %v3210_v48  ;;  %v3277_v61 = vadd.s32 %v11779_v12, %v3276_v51  ;;  %v3264_v9 = vshrl.u32 %v3263_v27, 3  ;;  %vm11877_vm4 = vmand %vm3444_vm2, %vm3419_vm0 }
 0x56b   : > { %v11861_v22 = vadd.f32 %v5737_v44, %v4608_v10  ;;  %v7966_v32 = vpop.f32.mrb[41].mxu0  ;;  %vm3289_vm3 = vc.u32 %v11849_v17, 2454267026  ;;  %v11870_v11 = vmul.u32.u64.low 2454267026, %v11853_v14  ;;  %v11871_v36 = vmul.u32.u64.high 2454267026, %v11853_v14, %v11870_v11 }
 0x56c   : > { %v4503_v63 = vpop.f32.mrb[42].mxu0  ;;  %8359 = vmatpush3.bf16.msra.mxu0 %v8900_v15  ;;  %v6905_v1 = vsel %vm3541_vm9, 1.0, %v12486_v4  ;;  %vm3420_vm5 = vcmp.ne.s32.totalorder %v11833_v6, 0  ;;  %vm3445_vm6 = vcmp.lt.s32.totalorder %v11833_v6, 0  ;;  %v3251_v12 = vmul.u32 14, %v3250_v56 }
 0x56d   : > { %v7967_v49 = vpop.f32.mrb[43].mxu0  ;;  %v6906_v27 = vsel %vm3542_vm15, 1.0, %v12486_v4  ;;  %vm3543_vm7 = vcmp.ge.s32.totalorder %v11866_v57, 1  ;;  %v3495_v47 = vadd.s32 14, %v11833_v6  ;;  %v3238_v25 = vsub.s32 %v11671_v53, %v3237_v8  ;;  %vm11904_vm8 = vmand %vm3445_vm6, %vm3420_vm5 }
 0x56e   : > { %v5654_v2 = vpop.f32.mrb[40].mxu1  ;;  %v4609_v51 = vmul.f32 %v11810_v29, %v4500_v18  ;;  %v3278_v44 = vshrl.u32 %v3277_v61, 3  ;;  %v3290_v3 = vsel %vm3289_vm3, 1, %v12484_v20  ;;  %v11898_v32 = vsel %vm11877_vm4, %v3494_v28, %v3210_v48 }
 0x56f   : > { %v5738_v15 = vadd.f32 %v5654_v2, %v11364_v37  ;;  %v8170_v10 = vpop.f32.mrb[41].mxu1  ;;  %8309 = vmatmul.mubr.bf16.gmra.mrb[96].mxu0 %v11543_v55  ;;  %v3265_v55 = vmul.u32 14, %v3264_v9  ;;  %vm3303_vm9 = vc.u32 %v11870_v11, 2454267026  ;;  %v11909_v53 = vadd.s32 144, %v11396_v13 }
 0x570   : > { %v5657_v56 = vpop.f32.mrb[42].mxu1  ;;  %8312 = vmatprep.mubr.msk.bf16.mxu0 %vm8932_vm1, %v12486_v4  ;;  %v4610_v29 = vmul.f32 %v6905_v1, %v4503_v63  ;;  %v3252_v8 = vsub.s32 %v11692_v16, %v3251_v12  ;;  %vm3421_vm10 = vcmp.ne.s32.totalorder %v3238_v25, 0  ;;  %vm3446_vm11 = vcmp.lt.s32.totalorder %v3238_v25, 0 }
 0x571   : > { %v11911_v17 = vadd.f32 %v5738_v15, %v4609_v51  ;;  %v5739_v18 = vadd.f32 %v5657_v56, %v11370_v34  ;;  %v8171_v48 = vpop.f32.mrb[43].mxu1  ;;  %v3291_v61 = vadd.s32 %v11850_v45, %v3290_v3  ;;  %v11917_v49 = vadd.s32 152, %v11396_v13  ;;  %vm3471_vm14 = vmand %vm3446_vm11, %vm3421_vm10 }
 0x572   : > { %v4508_v28 = vpop.f32.mrb[44].mxu0  ;;  %v11924_v63 = vsel %vm11904_vm8, %v3495_v47, %v11833_v6  ;;  %v3279_v34 = vmul.u32 14, %v3278_v44  ;;  %v3304_v16 = vsel %vm3303_vm9, 1, %v12484_v20  ;;  %v3496_v12 = vadd.s32 14, %v3238_v25 }
 0x573   : > { %v11919_v9 = vadd.f32 %v5739_v18, %v4610_v29  ;;  %v7970_v39 = vpop.f32.mrb[45].mxu0  ;;  %v11929_v2 = vsub.s32 %v11721_v21, %v3265_v55  ;;  %v11932_v45 = vmul.u32.u64.low 2454267026, %v11909_v53  ;;  %v11933_v51 = vmul.u32.u64.high 2454267026, %v11909_v53, %v11932_v45 }
 0x574   : > { %v4511_v1 = vpop.f32.mrb[46].mxu0  ;;  %v6907_v15 = vsel %vm3543_vm7, 1.0, %v12486_v4  ;;  %vm3544_vm12 = vcmp.ge.s32.totalorder %v11898_v32, 1  ;;  %vm3422_vm15 = vcmp.ne.s32.totalorder %v3252_v8, 0  ;;  %vm3447_vm0 = vcmp.lt.s32.totalorder %v3252_v8, 0 }
 0x575   : > { %v7971_v10 = vpop.f32.mrb[47].mxu0  ;;  %v3292_v11 = vshrl.u32 %v3291_v61, 3  ;;  %v3305_v21 = vadd.s32 %v11871_v36, %v3304_v16  ;;  %v11943_v47 = vmul.u32.u64.low 2454267026, %v11917_v49  ;;  %v11944_v44 = vmul.u32.u64.high 2454267026, %v11917_v49, %v11943_v47  ;;  %vm3472_vm5 = vmand %vm3447_vm0, %vm3422_vm15 }
 0x576   : > { %v5662_v6 = vpop.f32.mrb[44].mxu1  ;;  %v4611_v3 = vmul.f32 %v6906_v27, %v4508_v28  ;;  %vm3545_vm2 = vcmp.ge.s32.totalorder %v11924_v63, 1  ;;  %v3280_v55 = vsub.s32 %v11753_v62, %v3279_v34  ;;  %v11952_v18 = vsel %vm3471_vm14, %v3496_v12, %v3238_v25 }
 0x577   : > { %v5740_v56 = vadd.f32 %v5662_v6, %v11373_v35  ;;  %v8174_v37 = vpop.f32.mrb[45].mxu1  ;;  %8313 = vmatmul.mubr.bf16.gmra.mrb[100].mxu0 %v11568_v0  ;;  %v3497_v36 = vadd.s32 14, %v3252_v8  ;;  %vm3423_vm3 = vcmp.ne.s32.totalorder %v11929_v2, 0  ;;  %vm3317_vm4 = vc.u32 %v11932_v45, 2454267026 }
 0x578   : > { %v5665_v29 = vpop.f32.mrb[46].mxu1  ;;  %8316 = vmatprep.mubr.msk.bf16.mxu0 %vm8932_vm1, %v12486_v4  ;;  %v4612_v27 = vmul.f32 %v6907_v15, %v4511_v1  ;;  %vm3448_vm6 = vcmp.lt.s32.totalorder %v11929_v2, 0  ;;  %v3293_v28 = vmul.u32 14, %v3292_v11  ;;  %v3306_v61 = vshrl.u32 %v3305_v21, 3 }
 0x579   : > { %v11955_v48 = vadd.f32 %v5740_v56, %v4611_v3  ;;  %v5741_v35 = vadd.f32 %v5665_v29, %v11379_v46  ;;  %v8175_v0 = vpop.f32.mrb[47].mxu1  ;;  %vm3331_vm7 = vc.u32 %v11943_v47, 2454267026  ;;  %v11962_v25 = vadd.s32 160, %v11396_v13  ;;  %vm11985_vm11 = vmand %vm3448_vm6, %vm3423_vm3 }
 0x57a   : > { %v4516_v62 = vpop.f32.mrb[48].mxu0  ;;  %vm3424_vm8 = vcmp.ne.s32.totalorder %v3280_v55, 0  ;;  %vm3449_vm9 = vcmp.lt.s32.totalorder %v3280_v55, 0  ;;  %v3318_v46 = vsel %vm3317_vm4, 1, %v12484_v20  ;;  %v6908_v16 = vsel %vm3544_vm12, 1.0, %v12486_v4 }
 0x57b   : > { %v11964_v39 = vadd.f32 %v5741_v35, %v4612_v27  ;;  %v7974_v34 = vpop.f32.mrb[49].mxu0  ;;  %v11971_v12 = vsel %vm3472_vm5, %v3497_v36, %v3252_v8  ;;  %v3498_v15 = vadd.s32 14, %v11929_v2  ;;  %v11975_v10 = vadd.s32 168, %v11396_v13  ;;  %vm11993_vm12 = vmand %vm3449_vm9, %vm3424_vm8 }
 0x57c   : > { %v4519_v1 = vpop.f32.mrb[50].mxu0  ;;  %12519 = vst [vmem:[#allocation36_spill] sm:$0xff] %v11971_v12  ;;  %v6909_v6 = vsel %vm3545_vm2, 1.0, %v12486_v4  ;;  %vm3546_vm10 = vcmp.ge.s32.totalorder %v11952_v18, 1  ;;  %v3499_v8 = vadd.s32 14, %v3280_v55  ;;  %v3332_v21 = vsel %vm3331_vm7, 1, %v12484_v20 }
 0x57d   : > { %v7975_v11 = vpop.f32.mrb[51].mxu0  ;;  %v3307_v37 = vmul.u32 14, %v3306_v61  ;;  %v3319_v29 = vadd.s32 %v11933_v51, %v3318_v46  ;;  %v11999_v36 = vmul.u32.u64.low 2454267026, %v11962_v25  ;;  %v12000_v27 = vmul.u32.u64.high 2454267026, %v11962_v25, %v11999_v36 }
 0x57e   : > { %v5670_v3 = vpop.f32.mrb[48].mxu1  ;;  %v4613_v35 = vmul.f32 %v6908_v16, %v4516_v62  ;;  %vm3547_vm14 = vcmp.ge.s32.totalorder %v11971_v12, 1  ;;  %v3294_v47 = vsub.s32 %v11816_v38, %v3293_v28  ;;  %v12011_v51 = vsel %vm11985_vm11, %v3498_v15, %v11929_v2 }
 0x57f   : > { %v5742_v0 = vadd.f32 %v5670_v3, %v11382_v60  ;;  %v8178_v34 = vpop.f32.mrb[49].mxu1  ;;  %8317 = vmatmul.mubr.bf16.gmra.mrb[104].mxu0 %v11643_v42  ;;  %v3333_v62 = vadd.s32 %v11944_v44, %v3332_v21  ;;  %v12015_v60 = vmul.u32.u64.low 2454267026, %v11975_v10  ;;  %v12016_v61 = vmul.u32.u64.high 2454267026, %v11975_v10, %v12015_v60 }
 0x580   : > { %v5673_v11 = vpop.f32.mrb[50].mxu1  ;;  %8320 = vmatprep.mubr.msk.bf16.mxu0 %vm8932_vm1, %v12486_v4  ;;  %v4614_v42 = vmul.f32 %v6909_v6, %v4519_v1  ;;  %v12023_v16 = vsel %vm11993_vm12, %v3499_v8, %v3280_v55  ;;  %v12026_v2 = vsub.s32 %v11853_v14, %v3307_v37  ;;  %v3320_v15 = vshrl.u32 %v3319_v29, 3 }
 0x581   : > { %v12018_v46 = vadd.f32 %v5742_v0, %v4613_v35  ;;  %v5743_v38 = vadd.f32 %v5673_v11, %v11388_v33  ;;  %v8179_v28 = vpop.f32.mrb[51].mxu1  ;;  %12524 = vst [vmem:[#allocation37_spill] sm:$0xff] %v12023_v16  ;;  %vm3345_vm15 = vc.u32 %v11999_v36, 2454267026  ;;  %v12029_v44 = vadd.s32 176, %v11396_v13 }
 0x582   : > { %v4524_v3 = vpop.f32.mrb[52].mxu0  ;;  %v6910_v33 = vsel %vm3546_vm10, 1.0, %v12486_v4  ;;  %vm3425_vm0 = vcmp.ne.s32.totalorder %v3294_v47, 0  ;;  %vm3450_vm2 = vcmp.lt.s32.totalorder %v3294_v47, 0  ;;  %v6911_v55 = vsel %vm3547_vm14, 1.0, %v12486_v4 }
 0x583   : > { %v12031_v45 = vadd.f32 %v5743_v38, %v4614_v42  ;;  %v7978_v1 = vpop.f32.mrb[53].mxu0  ;;  %v3334_v6 = vshrl.u32 %v3333_v62, 3  ;;  %vm3359_vm3 = vc.u32 %v12015_v60, 2454267026  ;;  %v12040_v8 = vadd.s32 184, %v11396_v13  ;;  %vm12046_vm6 = vmand %vm3450_vm2, %vm3425_vm0 }
 0x584   : > { %v4527_v14 = vpop.f32.mrb[54].mxu0  ;;  %vm3548_vm4 = vcmp.ge.s32.totalorder %v12011_v51, 1  ;;  %vm3549_vm5 = vcmp.ge.s32.totalorder %v12023_v16, 1  ;;  %v3500_v56 = vadd.s32 14, %v3294_v47  ;;  %v3346_v37 = vsel %vm3345_vm15, 1, %v12484_v20 }
 0x585   : > { %v7979_v21 = vpop.f32.mrb[55].mxu0  ;;  %vm3426_vm7 = vcmp.ne.s32.totalorder %v12026_v2, 0  ;;  %v3321_v0 = vmul.u32 14, %v3320_v15  ;;  %v12052_v34 = vmul.u32.u64.low 2454267026, %v12029_v44  ;;  %v12053_v11 = vmul.u32.u64.high 2454267026, %v12029_v44, %v12052_v34 }
 0x586   : > { %v5678_v29 = vpop.f32.mrb[52].mxu1  ;;  %v4615_v62 = vmul.f32 %v6910_v33, %v4524_v3  ;;  %vm3451_vm8 = vcmp.lt.s32.totalorder %v12026_v2, 0  ;;  %v3360_v36 = vsel %vm3359_vm3, 1, %v12484_v20  ;;  %v3335_v15 = vmul.u32 14, %v3334_v6 }
 0x587   : > { %v5744_v42 = vadd.f32 %v5678_v29, %v11391_v40  ;;  %v8182_v38 = vpop.f32.mrb[53].mxu1  ;;  %8321 = vmatmul.mubr.bf16.gmra.mrb[108].mxu0 %v11750_v23  ;;  %v3347_v1 = vadd.s32 %v12000_v27, %v3346_v37  ;;  %v12064_v21 = vmul.u32.u64.low 2454267026, %v12040_v8  ;;  %v12065_v3 = vmul.u32.u64.high 2454267026, %v12040_v8, %v12064_v21  ;;  %vm3476_vm10 = vmand %vm3451_vm8, %vm3426_vm7 }
 0x588   : > { %v5681_v28 = vpop.f32.mrb[54].mxu1  ;;  %8324 = vmatprep.mubr.msk.bf16.mxu0 %vm8932_vm1, %v12486_v4  ;;  %v4616_v40 = vmul.f32 %v6911_v55, %v4527_v14  ;;  %v12072_v60 = vsel %vm12046_vm6, %v3500_v56, %v3294_v47  ;;  %v3501_v12 = vadd.s32 14, %v12026_v2  ;;  %v3361_v6 = vadd.s32 %v12016_v61, %v3360_v36 }
 0x589   : > { %v12067_v33 = vadd.f32 %v5744_v42, %v4615_v62  ;;  %v5745_v23 = vadd.f32 %v5681_v28, %v11399_v50  ;;  %v8183_v29 = vpop.f32.mrb[55].mxu1  ;;  %vm3373_vm9 = vc.u32 %v12052_v34, 2454267026  ;;  %v12077_v27 = vadd.s32 192, %v11396_v13  ;;  %v12527_v50 = vld [vmem:[#allocation5_spill] sm:$0xff] }
 0x58a   : > { %v4532_v38 = vpop.f32.mrb[56].mxu0  ;;  %v3322_v14 = vsub.s32 %v11909_v53, %v3321_v0  ;;  %v6912_v61 = vsel %vm3548_vm4, 1.0, %v12486_v4  ;;  %v3336_v13 = vsub.s32 %v11917_v49, %v3335_v15  ;;  %v3348_v35 = vshrl.u32 %v3347_v1, 3 }
 0x58b   : > { %v12079_v37 = vadd.f32 %v5745_v23, %v4616_v40  ;;  %v7982_v55 = vpop.f32.mrb[57].mxu0  ;;  %vm3387_vm11 = vc.u32 %v12064_v21, 2454267026  ;;  %v6913_v62 = vsel %vm3549_vm5, 1.0, %v12486_v4  ;;  %v12528_v36 = vrot.slane %v10790_v24, 1 }
 0x58c   : > { %v4535_v56 = vpop.f32.mrb[58].mxu0  ;;  %v12529_v28 = vrot.slane %v10778_v54, 1  ;;  %vm3550_vm12 = vcmp.ge.s32.totalorder %v12072_v60, 1  ;;  %v3374_v0 = vsel %vm3373_vm9, 1, %v12484_v20  ;;  %v12103_v49 = vsel %vm3476_vm10, %v3501_v12, %v12026_v2  ;;  %v12530_v55 = vld [vmem:[#allocation22_spill] sm:$0xff] }
 0x58d   : > { %v7983_v42 = vpop.f32.mrb[59].mxu0  ;;  %v3362_v15 = vshrl.u32 %v3361_v6, 3  ;;  %v12106_v1 = vmul.u32.u64.low 2454267026, %v12077_v27  ;;  %v12107_v23 = vmul.u32.u64.high 2454267026, %v12077_v27, %v12106_v1  ;;  %v4617_v29 = vmul.f32 %v6912_v61, %v4532_v38  ;;  %v12531_v38 = vld [vmem:[#allocation23_spill] sm:$0xff] }
 0x58e   : > { %v6027_v53 = vsel %vm6008_vm13, %v12529_v28, %v12528_v36  ;;  %v5686_v40 = vpop.f32.mrb[56].mxu1  ;;  %vm3427_vm14 = vcmp.ne.s32.totalorder %v3322_v14, 0  ;;  %v3388_v36 = vsel %vm3387_vm11, 1, %v12484_v20  ;;  %vm3452_vm15 = vcmp.lt.s32.totalorder %v3322_v14, 0 }
 0x58f   : > { %v5746_v42 = vadd.f32 %v5686_v40, %v12530_v55  ;;  %v8186_v54 = vpop.f32.mrb[57].mxu1  ;;  %8325 = vmatmul.mubr.bf16.gmra.mrb[112].mxu0 %v6027_v53  ;;  %vm3428_vm0 = vcmp.ne.s32.totalorder %v3336_v13, 0  ;;  %v3349_v12 = vmul.u32 14, %v3348_v35  ;;  %v3375_v2 = vadd.s32 %v12053_v11, %v3374_v0  ;;  %vm3477_vm5 = vmand %vm3452_vm15, %vm3427_vm14 }
 0x590   : > { %v5689_v34 = vpop.f32.mrb[58].mxu1  ;;  %8328 = vmatprep.mubr.msk.bf16.mxu0 %vm8932_vm1, %v12486_v4  ;;  %v4618_v6 = vmul.f32 %v6913_v62, %v4535_v56  ;;  %vm3453_vm2 = vcmp.lt.s32.totalorder %v3336_v13, 0  ;;  %v3502_v55 = vadd.s32 14, %v3322_v14  ;;  %v3363_v21 = vmul.u32 14, %v3362_v15 }
 0x591   : > { %v12115_v28 = vadd.f32 %v5746_v42, %v4617_v29  ;;  %v5747_v61 = vadd.f32 %v5689_v34, %v12531_v38  ;;  %v8187_v40 = vpop.f32.mrb[59].mxu1  ;;  %v3389_v54 = vadd.s32 %v12065_v3, %v3388_v36  ;;  %vm3401_vm3 = vc.u32 %v12106_v1, 2454267026  ;;  %vm12128_vm6 = vmand %vm3453_vm2, %vm3428_vm0 }
 0x592   : > { %v4540_v53 = vpop.f32.mrb[60].mxu0  ;;  %vm3551_vm4 = vcmp.ge.s32.totalorder %v12103_v49, 1  ;;  %v3503_v11 = vadd.s32 14, %v3336_v13  ;;  %v6914_v56 = vsel %vm3550_vm12, 1.0, %v12486_v4  ;;  %v3350_v3 = vsub.s32 %v11962_v25, %v3349_v12  ;;  %v12536_v25 = vld [vmem:[#allocation24_spill] sm:$0xff] }
 0x593   : > { %v12119_v47 = vadd.f32 %v5747_v61, %v4618_v6  ;;  %v7986_v16 = vpop.f32.mrb[61].mxu0  ;;  %v3376_v0 = vshrl.u32 %v3375_v2, 3  ;;  %v12534_v15 = vrot.slane %v12527_v50, 1  ;;  %v12535_v1 = vrot.slane %v10790_v24, 1 }
 0x594   : > { %v4543_v35 = vpop.f32.mrb[62].mxu0  ;;  %v3402_v42 = vsel %vm3401_vm3, 1, %v12484_v20  ;;  %v6915_v36 = vsel %vm3551_vm4, 1.0, %v12486_v4  ;;  %v12140_v6 = vsel %vm3477_vm5, %v3502_v55, %v3322_v14  ;;  %v3364_v38 = vsub.s32 %v11975_v10, %v3363_v21 }
 0x595   : > { %v7987_v16 = vpop.f32.mrb[63].mxu0  ;;  %v6029_v29 = vsel %vm6008_vm13, %v12535_v1, %v12534_v15  ;;  %v3390_v61 = vshrl.u32 %v3389_v54, 3  ;;  %v4619_v40 = vmul.f32 %v6914_v56, %v4540_v53  ;;  %v12146_v24 = vsel %vm12128_vm6, %v3503_v11, %v3336_v13  ;;  %v12537_v53 = vld [vmem:[#allocation25_spill] sm:$0xff] }
 0x596   : > { %v5694_v34 = vpop.f32.mrb[60].mxu1  ;;  %vm3429_vm7 = vcmp.ne.s32.totalorder %v3350_v3, 0  ;;  %vm3454_vm8 = vcmp.lt.s32.totalorder %v3350_v3, 0  ;;  %v3377_v20 = vmul.u32 14, %v3376_v0  ;;  %v3403_v14 = vadd.s32 %v12107_v23, %v3402_v42 }
 0x597   : > { %v5748_v12 = vadd.f32 %v5694_v34, %v12536_v25  ;;  %v8190_v2 = vpop.f32.mrb[61].mxu1  ;;  %8329 = vmatmul.mubr.bf16.gmra.mrb[116].mxu0 %v6029_v29  ;;  %v4620_v10 = vmul.f32 %v6915_v36, %v4543_v35  ;;  %vm3552_vm9 = vcmp.ge.s32.totalorder %v12140_v6, 1  ;;  %v3504_v13 = vadd.s32 14, %v3350_v3  ;;  %vm3479_vm14 = vmand %vm3454_vm8, %vm3429_vm7 }
 0x598   : > { %v5697_v16 = vpop.f32.mrb[62].mxu1  ;;  %8332 = vmatprep.mubr.msk.bf16.mxu0 %vm8932_vm1, %v12486_v4  ;;  %vm3430_vm10 = vcmp.ne.s32.totalorder %v3364_v38, 0  ;;  %vm3455_vm11 = vcmp.lt.s32.totalorder %v3364_v38, 0  ;;  %v3391_v11 = vmul.u32 14, %v3390_v61  ;;  %vm3553_vm12 = vcmp.ge.s32.totalorder %v12146_v24, 1  ;;  %v12538_v61 = vld [vmem:[#allocation6_spill] sm:$0xff] }
 0x599   : > { %v12151_v55 = vadd.f32 %v5748_v12, %v4619_v40  ;;  %v5749_v21 = vadd.f32 %v5697_v16, %v12537_v53  ;;  %v8191_v54 = vpop.f32.mrb[63].mxu1  ;;  %v6916_v23 = vsel %vm3552_vm9, 1.0, %v12486_v4  ;;  %v3505_v0 = vadd.s32 14, %v3364_v38  ;;  %vm3480_vm15 = vmand %vm3455_vm11, %vm3430_vm10  ;;  %v12541_v53 = vld [vmem:[#allocation26_spill] sm:$0xff] }
 0x59a   : > { %v4548_v56 = vpop.f32.mrb[64].mxu0  ;;  %v3378_v1 = vsub.s32 %v12029_v44, %v3377_v20  ;;  %v3404_v29 = vshrl.u32 %v3403_v14, 3  ;;  %v6917_v36 = vsel %vm3553_vm12, 1.0, %v12486_v4  ;;  %v12539_v40 = vrot.slane %v12538_v61, 1 }
 0x59b   : > { %v12155_v62 = vadd.f32 %v5749_v21, %v4620_v10  ;;  %v7990_v15 = vpop.f32.mrb[65].mxu0  ;;  %v12540_v25 = vrot.slane %v12527_v50, 1  ;;  %v12168_v2 = vsel %vm3479_vm14, %v3504_v13, %v3350_v3  ;;  %v3392_v16 = vsub.s32 %v12040_v8, %v3391_v11  ;;  %v12542_v3 = vld [vmem:[#allocation27_spill] sm:$0xff] }
 0x59c   : > { %v4551_v35 = vpop.f32.mrb[66].mxu0  ;;  %v4621_v10 = vmul.f32 %v6916_v23, %v4548_v56  ;;  %v12172_v14 = vsel %vm3480_vm15, %v3505_v0, %v3364_v38  ;;  %vm3431_vm0 = vcmp.ne.s32.totalorder %v3378_v1, 0  ;;  %vm3456_vm2 = vcmp.lt.s32.totalorder %v3378_v1, 0 }
 0x59d   : > { %v7991_v42 = vpop.f32.mrb[67].mxu0  ;;  %v6031_v12 = vsel %vm6008_vm13, %v12540_v25, %v12539_v40  ;;  %v3405_v50 = vmul.u32 14, %v3404_v29  ;;  %v4622_v54 = vmul.f32 %v6917_v36, %v4551_v35  ;;  %vm3554_vm13 = vcmp.ge.s32.totalorder %v12168_v2, 1  ;;  %vm3481_vm6 = vmand %vm3456_vm2, %vm3431_vm0 }
 0x59e   : > { %v5702_v34 = vpop.f32.mrb[64].mxu1  ;;  %v3506_v11 = vadd.s32 14, %v3378_v1  ;;  %vm3432_vm3 = vcmp.ne.s32.totalorder %v3392_v16, 0  ;;  %vm3457_vm4 = vcmp.lt.s32.totalorder %v3392_v16, 0  ;;  %vm3555_vm5 = vcmp.ge.s32.totalorder %v12172_v14, 1 }
 0x59f   : > { %v5750_v21 = vadd.f32 %v5702_v34, %v12541_v53  ;;  %v8194_v44 = vpop.f32.mrb[65].mxu1  ;;  %8333 = vmatmul.mubr.bf16.gmra.mrb[120].mxu0 %v6031_v12  ;;  %v6918_v35 = vsel %vm3554_vm13, 1.0, %v12486_v4  ;;  %v3507_v29 = vadd.s32 14, %v3392_v16  ;;  %v3406_v42 = vsub.s32 %v12077_v27, %v3405_v50  ;;  %vm3482_vm7 = vmand %vm3457_vm4, %vm3432_vm3  ;;  %v12543_v53 = vld [vmem:[#allocation9_spill] sm:$0xff] }
 0x5a0   : > { %v5705_v20 = vpop.f32.mrb[66].mxu1  ;;  %8336 = vmatprep.mubr.msk.bf16.mxu0 %vm8932_vm1, %v12486_v4  ;;  %v6919_v34 = vsel %vm3555_vm5, 1.0, %v12486_v4  ;;  %v12187_v40 = vsel %vm3481_vm6, %v3506_v11, %v3378_v1  ;;  %vm3613_vm13 = vcmp.le.s32.totalorder %v11681_v52, 12  ;;  %v12567_v52 = vld [vmem:[#allocation35_spill] sm:$0xff]  ;;  %vm3616_vm5 = vcmp.le.s32.totalorder %v11763_v41, 12 }
 0x5a1   : > { %v12176_v15 = vadd.f32 %v5750_v21, %v4621_v10  ;;  %v5751_v13 = vadd.f32 %v5705_v20, %v12542_v3  ;;  %v8195_v8 = vpop.f32.mrb[67].mxu1  ;;  %v12191_v44 = vsel %vm3482_vm7, %v3507_v29, %v3392_v16  ;;  %vm3433_vm8 = vcmp.ne.s32.totalorder %v3406_v42, 0 }
 0x5a2   : > { %v4556_v56 = vpop.f32.mrb[68].mxu0  ;;  %vm3458_vm9 = vcmp.lt.s32.totalorder %v3406_v42, 0  ;;  %vm3556_vm10 = vcmp.ge.s32.totalorder %v12187_v40, 1  ;;  %vm3557_vm11 = vcmp.ge.s32.totalorder %v12191_v44, 1  ;;  %vm3615_vm4 = vcmp.le.s32.totalorder %v12567_v52, 12 }
 0x5a3   : > { %v12180_v38 = vadd.f32 %v5751_v13, %v4622_v54  ;;  %v7994_v23 = vpop.f32.mrb[69].mxu0  ;;  %v4623_v25 = vmul.f32 %v6918_v35, %v4556_v56  ;;  %v3508_v54 = vadd.s32 14, %v3406_v42  ;;  %vm3483_vm12 = vmand %vm3458_vm9, %vm3433_vm8  ;;  %v6920_v16 = vsel %vm3556_vm10, 1.0, %v12486_v4 }
 0x5a4   : > { %v4559_v0 = vpop.f32.mrb[70].mxu0  ;;  %v6921_v11 = vsel %vm3557_vm11, 1.0, %v12486_v4  ;;  %vm3617_vm6 = vcmp.le.s32.totalorder %v11826_v31, 12  ;;  %vm3618_vm7 = vcmp.le.s32.totalorder %v11866_v57, 12  ;;  %vm3619_vm8 = vcmp.le.s32.totalorder %v11898_v32, 12 }
 0x5a5   : > { %v7995_v36 = vpop.f32.mrb[71].mxu0  ;;  %v4624_v27 = vmul.f32 %v6919_v34, %v4559_v0  ;;  %v12204_v35 = vsel %vm3483_vm12, %v3508_v54, %v3406_v42  ;;  %vm3620_vm9 = vcmp.le.s32.totalorder %v11924_v63, 12  ;;  %v6933_v57 = vsel %vm3619_vm8, 1.0, %v12486_v4  ;;  %v12568_v63 = vld [vmem:[#allocation36_spill] sm:$0xff] }
 0x5a6   : > { %v5710_v61 = vpop.f32.mrb[68].mxu1  ;;  %v12544_v36 = vld [vmem:[#allocation7_spill] sm:$0xff]  ;;  %vm3558_vm14 = vcmp.ge.s32.totalorder %v12204_v35, 1  ;;  %vm3621_vm10 = vcmp.le.s32.totalorder %v11952_v18, 12  ;;  %vm3622_vm11 = vcmp.le.s32.totalorder %v12568_v63, 12  ;;  %vm3623_vm12 = vcmp.le.s32.totalorder %v12011_v51, 12 }
 0x5a7   : > { %v5752_v12 = vadd.f32 %v5710_v61, %v11503_v30  ;;  %v8198_v10 = vpop.f32.mrb[69].mxu1  ;;  %8337 = vmatmul.mubr.bf16.gmra.mrb[124].mxu0 %v12543_v53  ;;  %v12545_v34 = vrot.slane %v12544_v36, 1  ;;  %v12550_v36 = vld [vmem:[#allocation12_spill] sm:$0xff] }
 0x5a8   : > { %v5713_v21 = vpop.f32.mrb[70].mxu1  ;;  %8340 = vmatprep.mubr.msk.bf16.mxu0 %vm8932_vm1, %v12486_v4  ;;  %v12546_v10 = vld [vmem:[#allocation29_spill] sm:$0xff] }
 0x5a9   : > { %v12195_v20 = vadd.f32 %v5752_v12, %v4623_v25  ;;  %v5753_v1 = vadd.f32 %v5713_v21, %v11522_v43  ;;  %v8199_v50 = vpop.f32.mrb[71].mxu1 }
 0x5aa   : > { %v4564_v30 = vpop.f32.mrb[72].mxu0 }
 0x5ab   : > { %v12199_v3 = vadd.f32 %v5753_v1, %v4624_v27  ;;  %v7998_v13 = vpop.f32.mrb[73].mxu0  ;;  %v4625_v43 = vmul.f32 %v6920_v16, %v4564_v30  ;;  %v6922_v1 = vsel %vm3558_vm14, 1.0, %v12486_v4  ;;  %v12547_v16 = vld [vmem:[#allocation33_spill] sm:$0xff] }
 0x5ac   : > { %v4567_v8 = vpop.f32.mrb[74].mxu0 }
 0x5ad   : > { %v7999_v56 = vpop.f32.mrb[75].mxu0  ;;  %v4626_v25 = vmul.f32 %v6921_v11, %v4567_v8  ;;  %v12548_v8 = vld [vmem:[#allocation10_spill] sm:$0xff] }
 0x5ae   : > { %v5718_v23 = vpop.f32.mrb[72].mxu1 }
 0x5af   : > { %v5754_v0 = vadd.f32 %v5718_v23, %v11555_v19  ;;  %v8202_v29 = vpop.f32.mrb[73].mxu1  ;;  %8341 = vmatmul.mubr.bf16.gmra.mrb[128].mxu0 %v12545_v34  ;;  %v12551_v34 = vld [vmem:[#allocation13_spill] sm:$0xff] }
 0x5b0   : > { %v5721_v61 = vpop.f32.mrb[74].mxu1  ;;  %8360 = vmatprep.mubr.msk.bf16.mxu0 %vm8932_vm1, %v12486_v4  ;;  %v12549_v29 = vld [vmem:[#allocation11_spill] sm:$0xff] }
 0x5b1   : > { %v12211_v12 = vadd.f32 %v5754_v0, %v4625_v43  ;;  %v5755_v53 = vadd.f32 %v5721_v61, %v12546_v10  ;;  %v8203_v21 = vpop.f32.mrb[75].mxu1  ;;  %v12552_v61 = vld [vmem:[#allocation14_spill] sm:$0xff]  ;;  %v12554_v10 = vld [vmem:[#allocation16_spill] sm:$0xff] }
 0x5b2   : > { %v4572_v42 = vpop.f32.mrb[76].mxu0  ;;  %v12556_v21 = vld [vmem:[#allocation18_spill] sm:$0xff] }
 0x5b3   : > { %v12215_v27 = vadd.f32 %v5755_v53, %v4626_v25  ;;  %v8002_v19 = vpop.f32.mrb[77].mxu0  ;;  %v4627_v13 = vmul.f32 %v6922_v1, %v4572_v42  ;;  %v12553_v25 = vld [vmem:[#allocation15_spill] sm:$0xff]  ;;  %v12555_v53 = vld [vmem:[#allocation17_spill] sm:$0xff] }
 0x5b4   : > { %v4575_v50 = vpop.f32.mrb[78].mxu0  ;;  %v12557_v42 = vld [vmem:[#allocation19_spill] sm:$0xff]  ;;  %v12558_v19 = vld [vmem:[#allocation20_spill] sm:$0xff]  ;;  %v12559_v1 = vld [vmem:[#allocation21_spill] sm:$0xff] }
 0x5b5   : > { %v8003_v30 = vpop.f32.mrb[79].mxu0  ;;  %v12560_v50 = vld [vmem:[#allocation8_spill] sm:$0xff] }
 0x5b6   : > { %v5726_v54 = vpop.f32.mrb[76].mxu1  ;;  %v12561_v30 = vrot.slane %v12560_v50, 3 }
 0x5b7   : > { %v5756_v56 = vadd.f32 %v5726_v54, %v12547_v16  ;;  %8361 = vmatmul.mubr.bf16.vlgmr.msra.gmra.mrb[80].mxu0 %v12548_v8  ;;  %v8206_v11 = vpop.f32.mrb[77].mxu1  ;;  %v12562_v54 = vld [vmem:[#allocation28_spill] sm:$0xff] }
 0x5b8   : > { %8364 = vmatprep.mubr.msk.bf16.mxu0 %vm8932_vm1, %v12486_v4  ;;  %v5729_v23 = vpop.f32.mrb[78].mxu1  ;;  %vm3609_vm15 = vcmp.le.s32.totalorder %v12562_v54, 12 }
 0x5b9   : > { %v12222_v43 = vadd.f32 %v5756_v56, %v4627_v13  ;;  %v8207_v0 = vpop.f32.mrb[79].mxu1  ;;  %v12563_v13 = vld [vmem:[#allocation30_spill] sm:$0xff]  ;;  %v6923_v16 = vsel %vm3609_vm15, 1.0, %v12486_v4  ;;  %vm3625_vm15 = vcmp.le.s32.totalorder %v12072_v60, 12 }
 0x5ba   : > { %vm3610_vm0 = vcmp.le.s32.totalorder %v12563_v13, 12  ;;  %v12566_v13 = vld [vmem:[#allocation34_spill] sm:$0xff] }
 0x5bb   : > { %v6924_v8 = vsel %vm3610_vm0, 1.0, %v12486_v4  ;;  %vm3614_vm3 = vcmp.le.s32.totalorder %v12566_v13, 12  ;;  %vm3626_vm0 = vcmp.le.s32.totalorder %v12103_v49, 12 }
 0x5bf   : > { %8365 = vmatmul.mubr.bf16.gmra.mrb[84].mxu0 %v12549_v29 }
 0x5c0   : > { %8368 = vmatprep.mubr.msk.bf16.mxu0 %vm8932_vm1, %v12486_v4 }
 0x5c7   : > { %8369 = vmatmul.mubr.bf16.gmra.mrb[88].mxu0 %v12550_v36 }
 0x5c8   : > { %8372 = vmatprep.mubr.msk.bf16.mxu0 %vm8932_vm1, %v12486_v4 }
 0x5cf   : > { %8373 = vmatmul.mubr.bf16.gmra.mrb[92].mxu0 %v12551_v34 }
 0x5d0   : > { %8376 = vmatprep.mubr.msk.bf16.mxu0 %vm8932_vm1, %v12486_v4 }
 0x5d7   : > { %8377 = vmatmul.mubr.bf16.gmra.mrb[96].mxu0 %v12552_v61  ;;  %v12564_v61 = vld [vmem:[#allocation31_spill] sm:$0xff] }
 0x5d8   : > { %8380 = vmatprep.mubr.msk.bf16.mxu0 %vm8932_vm1, %v12486_v4 }
 0x5df   : > { %8381 = vmatmul.mubr.bf16.gmra.mrb[100].mxu0 %v12553_v25 }
 0x5e0   : > { %8384 = vmatprep.mubr.msk.bf16.mxu0 %vm8932_vm1, %v12486_v4 }
 0x5e7   : > { %8385 = vmatmul.mubr.bf16.gmra.mrb[104].mxu0 %v12554_v10  ;;  %v12565_v10 = vld [vmem:[#allocation32_spill] sm:$0xff] }
 0x5e8   : > { %8388 = vmatprep.mubr.msk.bf16.mxu0 %vm8932_vm1, %v12486_v4  ;;  %vm3612_vm2 = vcmp.le.s32.totalorder %v12565_v10, 12 }
 0x5ef   : > { %8389 = vmatmul.mubr.bf16.gmra.mrb[108].mxu0 %v12555_v53 }
 0x5f0   : > { %8392 = vmatprep.mubr.msk.bf16.mxu0 %vm8932_vm1, %v12486_v4 }
 0x5f7   : > { %8393 = vmatmul.mubr.bf16.gmra.mrb[112].mxu0 %v12556_v21 }
 0x5f8   : > { %8396 = vmatprep.mubr.msk.bf16.mxu0 %vm8932_vm1, %v12486_v4 }
 0x5ff   : > { %8397 = vmatmul.mubr.bf16.gmra.mrb[116].mxu0 %v12557_v42 }
 0x600   : > { %8400 = vmatprep.mubr.msk.bf16.mxu0 %vm8932_vm1, %v12486_v4 }
 0x607   : > { %8401 = vmatmul.mubr.bf16.gmra.mrb[120].mxu0 %v12558_v19 }
 0x608   : > { %8404 = vmatprep.mubr.msk.bf16.mxu0 %vm8932_vm1, %v12486_v4 }
 0x60f   : > { %8405 = vmatmul.mubr.bf16.gmra.mrb[124].mxu0 %v12559_v1 }
 0x610   : > { %8408 = vmatprep.mubr.msk.bf16.mxu0 %vm8932_vm1, %v12486_v4  ;;  %vm3611_vm1 = vcmp.le.s32.totalorder %v12564_v61, 12 }
 0x611   : > { %v6925_v53 = vsel %vm3611_vm1, 1.0, %v12486_v4  ;;  %vm3627_vm1 = vcmp.le.s32.totalorder %v12140_v6, 12 }
 0x617   : > { %8409 = vmatmul.mubr.bf16.gmra.mrb[128].mxu0 %v12561_v30 }
 0x68a   : > { %v6372_v56 = vpop.f32.mrb[80].mxu0 }
 0x68b   : > { %v6499_v11 = vmul.f32 %v6923_v16, %v6372_v56  ;;  %v8362_v23 = vpop.f32.mrb[81].mxu0  ;;  %v6927_v16 = vsel %vm3613_vm13, 1.0, %v12486_v4  ;;  %vm3629_vm13 = vcmp.le.s32.totalorder %v12168_v2, 12 }
 0x68c   : > { %v6375_v0 = vpop.f32.mrb[82].mxu0 }
 0x68d   : > { %v6524_v29 = vadd.f32 %v6499_v11, %v11716_v58  ;;  %v6500_v36 = vmul.f32 %v6924_v8, %v6375_v0  ;;  %v8363_v34 = vpop.f32.mrb[83].mxu0  ;;  %v6926_v58 = vsel %vm3612_vm2, 1.0, %v12486_v4  ;;  %v6928_v8 = vsel %vm3614_vm3, 1.0, %v12486_v4 }
 0x68e   : > { %v6929_v34 = vsel %vm3615_vm4, 1.0, %v12486_v4  ;;  %vm3628_vm2 = vcmp.le.s32.totalorder %v12146_v24, 12  ;;  %vm3630_vm3 = vcmp.le.s32.totalorder %v12172_v14, 12  ;;  %v6943_v24 = vsel %vm3629_vm13, 1.0, %v12486_v4 }
 0x68f   : > { %6549 = vst [vmem:[%s12267_s8] sm:$0xff] %v6524_v29  ;;  %v6525_v25 = vadd.f32 %v6500_v36, %v11733_v59  ;;  %vm3631_vm4 = vcmp.le.s32.totalorder %v12187_v40, 12 }
 0x690   : > { %v6945_v14 = vsel %vm3631_vm4, 1.0, %v12486_v4 }
 0x691   : > { %6550 = vst [vmem:[%s12267_s8 + $0x8] sm:$0xff] %v6525_v25  ;;  %v6930_v25 = vsel %vm3616_vm5, 1.0, %v12486_v4  ;;  %vm3632_vm5 = vcmp.le.s32.totalorder %v12191_v44, 12 }
 0x692   : > { %v6380_v21 = vpop.f32.mrb[84].mxu0 }
 0x693   : > { %v6501_v42 = vmul.f32 %v6925_v53, %v6380_v21  ;;  %v8366_v19 = vpop.f32.mrb[85].mxu0 }
 0x694   : > { %v6383_v1 = vpop.f32.mrb[86].mxu0 }
 0x695   : > { %v6526_v50 = vadd.f32 %v6501_v42, %v11783_v26  ;;  %v6502_v30 = vmul.f32 %v6926_v58, %v6383_v1  ;;  %v8367_v54 = vpop.f32.mrb[87].mxu0  ;;  %v6932_v1 = vsel %vm3618_vm7, 1.0, %v12486_v4 }
 0x697   : > { %6551 = vst [vmem:[%s12267_s8 + $0x10] sm:$0xff] %v6526_v50  ;;  %v6527_v59 = vadd.f32 %v6502_v30, %v11791_v7 }
 0x699   : > { %6552 = vst [vmem:[%s12267_s8 + $0x18] sm:$0xff] %v6527_v59 }
 0x69a   : > { %v6388_v56 = vpop.f32.mrb[88].mxu0 }
 0x69b   : > { %v6503_v11 = vmul.f32 %v6927_v16, %v6388_v56  ;;  %v8370_v23 = vpop.f32.mrb[89].mxu0  ;;  %v6934_v16 = vsel %vm3620_vm9, 1.0, %v12486_v4 }
 0x69c   : > { %v6391_v26 = vpop.f32.mrb[90].mxu0 }
 0x69d   : > { %v6528_v0 = vadd.f32 %v6503_v11, %v11856_v5  ;;  %v6504_v29 = vmul.f32 %v6928_v8, %v6391_v26  ;;  %v8371_v36 = vpop.f32.mrb[91].mxu0 }
 0x69f   : > { %6553 = vst [vmem:[%s12267_s8 + $0x20] sm:$0xff] %v6528_v0  ;;  %v6529_v7 = vadd.f32 %v6504_v29, %v11861_v22  ;;  %v6931_v22 = vsel %vm3617_vm6, 1.0, %v12486_v4  ;;  %v6936_v29 = vsel %vm3622_vm11, 1.0, %v12486_v4  ;;  %vm3633_vm6 = vcmp.le.s32.totalorder %v12204_v35, 12  ;;  %v6660_v35 = vld [vmem:[%s12267_s8 + $0x8] sm:$0xff] (%p8994_p5) }
 0x6a0   : > { %v6947_v44 = vsel %vm3633_vm6, 1.0, %v12486_v4  ;;  %6661 = vst [vmem:[%s12372_s11 + $0x40] sm:$0xff] (%p8994_p5), %v6660_v35 }
 0x6a1   : > { %6554 = vst [vmem:[%s12267_s8 + $0x28] sm:$0xff] %v6529_v7 }
 0x6a2   : > { %v6396_v61 = vpop.f32.mrb[92].mxu0 }
 0x6a3   : > { %v6505_v10 = vmul.f32 %v6929_v34, %v6396_v61  ;;  %v8374_v53 = vpop.f32.mrb[93].mxu0 }
 0x6a4   : > { %v6399_v5 = vpop.f32.mrb[94].mxu0 }
 0x6a5   : > { %v6530_v21 = vadd.f32 %v6505_v10, %v11911_v17  ;;  %v6506_v58 = vmul.f32 %v6930_v25, %v6399_v5  ;;  %v8375_v42 = vpop.f32.mrb[95].mxu0  ;;  %v6937_v25 = vsel %vm3623_vm12, 1.0, %v12486_v4 }
 0x6a7   : > { %6555 = vst [vmem:[%s12267_s8 + $0x30] sm:$0xff] %v6530_v21  ;;  %v6531_v41 = vadd.f32 %v6506_v58, %v11919_v9 }
 0x6a9   : > { %6556 = vst [vmem:[%s12267_s8 + $0x38] sm:$0xff] %v6531_v41 }
 0x6aa   : > { %v6404_v19 = vpop.f32.mrb[96].mxu0 }
 0x6ab   : > { %v6507_v50 = vmul.f32 %v6931_v22, %v6404_v19  ;;  %v8378_v30 = vpop.f32.mrb[97].mxu0  ;;  %v6940_v19 = vsel %vm3626_vm0, 1.0, %v12486_v4 }
 0x6ac   : > { %v6407_v17 = vpop.f32.mrb[98].mxu0 }
 0x6ad   : > { %v6532_v54 = vadd.f32 %v6507_v50, %v11955_v48  ;;  %v6508_v59 = vmul.f32 %v6932_v1, %v6407_v17  ;;  %v8379_v13 = vpop.f32.mrb[99].mxu0 }
 0x6af   : > { %6557 = vst [vmem:[%s12267_s8 + $0x40] sm:$0xff] %v6532_v54  ;;  %v6533_v31 = vadd.f32 %v6508_v59, %v11964_v39  ;;  %v6935_v39 = vsel %vm3621_vm10, 1.0, %v12486_v4  ;;  %v6942_v59 = vsel %vm3628_vm2, 1.0, %v12486_v4 }
 0x6b1   : > { %6558 = vst [vmem:[%s12267_s8 + $0x48] sm:$0xff] %v6533_v31 }
 0x6b2   : > { %v6412_v9 = vpop.f32.mrb[100].mxu0 }
 0x6b3   : > { %v6509_v56 = vmul.f32 %v6933_v57, %v6412_v9  ;;  %v8382_v8 = vpop.f32.mrb[101].mxu0 }
 0x6b4   : > { %v6415_v48 = vpop.f32.mrb[102].mxu0 }
 0x6b5   : > { %v6534_v11 = vadd.f32 %v6509_v56, %v12018_v46  ;;  %v6510_v23 = vmul.f32 %v6934_v16, %v6415_v48  ;;  %v8383_v26 = vpop.f32.mrb[103].mxu0  ;;  %v6944_v56 = vsel %vm3630_vm3, 1.0, %v12486_v4 }
 0x6b7   : > { %6559 = vst [vmem:[%s12267_s8 + $0x50] sm:$0xff] %v6534_v11  ;;  %v6535_v32 = vadd.f32 %v6510_v23, %v12031_v45  ;;  %v12569_v45 = vld [vmem:[#allocation37_spill] sm:$0xff] }
 0x6b8   : > { %vm3624_vm14 = vcmp.le.s32.totalorder %v12569_v45, 12  ;;  %v6670_v45 = vld [vmem:[%s12267_s8 + $0x30] sm:$0xff] (%p8994_p5) }
 0x6b9   : > { %6560 = vst [vmem:[%s12267_s8 + $0x58] sm:$0xff] %v6535_v32  ;;  %v6938_v53 = vsel %vm3624_vm14, 1.0, %v12486_v4  ;;  %v6946_v32 = vsel %vm3632_vm5, 1.0, %v12486_v4  ;;  %6671 = vst [vmem:[%s12372_s11 + $0x180] sm:$0xff] (%p8994_p5), %v6670_v45 }
 0x6ba   : > { %v6420_v0 = vpop.f32.mrb[104].mxu0 }
 0x6bb   : > { %v6511_v36 = vmul.f32 %v6935_v39, %v6420_v0  ;;  %v8386_v52 = vpop.f32.mrb[105].mxu0 }
 0x6bc   : > { %v6423_v46 = vpop.f32.mrb[106].mxu0 }
 0x6bd   : > { %v6536_v7 = vadd.f32 %v6511_v36, %v12067_v33  ;;  %v6512_v34 = vmul.f32 %v6936_v29, %v6423_v46  ;;  %v8387_v61 = vpop.f32.mrb[107].mxu0 }
 0x6bf   : > { %6561 = vst [vmem:[%s12267_s8 + $0x60] sm:$0xff] %v6536_v7  ;;  %v6537_v18 = vadd.f32 %v6512_v34, %v12079_v37  ;;  %v6939_v37 = vsel %vm3625_vm15, 1.0, %v12486_v4 }
 0x6c1   : > { %6562 = vst [vmem:[%s12267_s8 + $0x68] sm:$0xff] %v6537_v18  ;;  %v6668_v18 = vld [vmem:[%s12267_s8 + $0x28] sm:$0xff] (%p8994_p5) }
 0x6c2   : > { %v6428_v10 = vpop.f32.mrb[108].mxu0  ;;  %6669 = vst [vmem:[%s12372_s11 + $0x140] sm:$0xff] (%p8994_p5), %v6668_v18 }
 0x6c3   : > { %v6513_v5 = vmul.f32 %v6937_v25, %v6428_v10  ;;  %v8390_v21 = vpop.f32.mrb[109].mxu0  ;;  %v6672_v25 = vld [vmem:[%s12267_s8 + $0x38] sm:$0xff] (%p8994_p5)  ;;  %v6674_v10 = vld [vmem:[%s12267_s8 + $0x40] sm:$0xff] (%p8994_p5) }
 0x6c4   : > { %v6431_v33 = vpop.f32.mrb[110].mxu0  ;;  %6673 = vst [vmem:[%s12372_s11 + $0x1c0] sm:$0xff] (%p8994_p5), %v6672_v25  ;;  %6675 = vst [vmem:[%s12372_s11 + $0x200] sm:$0xff] (%p8994_p5), %v6674_v10  ;;  %v6680_v21 = vld [vmem:[%s12267_s8 + $0x58] sm:$0xff] (%p8994_p5) }
 0x6c5   : > { %v6538_v58 = vadd.f32 %v6513_v5, %v12115_v28  ;;  %v6514_v42 = vmul.f32 %v6938_v53, %v6431_v33  ;;  %v8391_v41 = vpop.f32.mrb[111].mxu0  ;;  %v6676_v53 = vld [vmem:[%s12267_s8 + $0x48] sm:$0xff] (%p8994_p5)  ;;  %v6678_v5 = vld [vmem:[%s12267_s8 + $0x50] sm:$0xff] (%p8994_p5)  ;;  %6681 = vst [vmem:[%s12372_s11 + $0x2c0] sm:$0xff] (%p8994_p5), %v6680_v21 }
 0x6c6   : > { %6677 = vst [vmem:[%s12372_s11 + $0x240] sm:$0xff] (%p8994_p5), %v6676_v53  ;;  %6679 = vst [vmem:[%s12372_s11 + $0x280] sm:$0xff] (%p8994_p5), %v6678_v5  ;;  %v6682_v33 = vld [vmem:[%s12267_s8 + $0x60] sm:$0xff] (%p8994_p5) }
 0x6c7   : > { %6563 = vst [vmem:[%s12267_s8 + $0x70] sm:$0xff] %v6538_v58  ;;  %v6539_v51 = vadd.f32 %v6514_v42, %v12119_v47  ;;  %v6941_v47 = vsel %vm3627_vm1, 1.0, %v12486_v4  ;;  %v6658_v4 = vld [vmem:[%s12267_s8] sm:$0xff] (%p8994_p5)  ;;  %6683 = vst [vmem:[%s12372_s11 + $0x300] sm:$0xff] (%p8994_p5), %v6682_v33 }
 0x6c8   : > { %6659 = vst [vmem:[%s12372_s11] sm:$0xff] (%p8994_p5), %v6658_v4  ;;  %v6684_v58 = vld [vmem:[%s12267_s8 + $0x68] sm:$0xff] (%p8994_p5) }
 0x6c9   : > { %6564 = vst [vmem:[%s12267_s8 + $0x78] sm:$0xff] %v6539_v51  ;;  %6685 = vst [vmem:[%s12372_s11 + $0x340] sm:$0xff] (%p8994_p5), %v6684_v58 }
 0x6ca   : > { %v6436_v22 = vpop.f32.mrb[112].mxu0 }
 0x6cb   : > { %v6515_v1 = vmul.f32 %v6939_v37, %v6436_v22  ;;  %v8394_v50 = vpop.f32.mrb[113].mxu0 }
 0x6cc   : > { %v6439_v28 = vpop.f32.mrb[114].mxu0 }
 0x6cd   : > { %v6540_v30 = vadd.f32 %v6515_v1, %v12151_v55  ;;  %v6516_v17 = vmul.f32 %v6940_v19, %v6439_v28  ;;  %v8395_v54 = vpop.f32.mrb[115].mxu0 }
 0x6ce   : > { %v6686_v42 = vld [vmem:[%s12267_s8 + $0x70] sm:$0xff] (%p8994_p5) }
 0x6cf   : > { %6565 = vst [vmem:[%s12267_s8 + $0x80] sm:$0xff] %v6540_v30  ;;  %v6541_v60 = vadd.f32 %v6516_v17, %v12155_v62  ;;  %6687 = vst [vmem:[%s12372_s11 + $0x380] sm:$0xff] (%p8994_p5), %v6686_v42 }
 0x6d0   : > { %v6688_v41 = vld [vmem:[%s12267_s8 + $0x78] sm:$0xff] (%p8994_p5) }
 0x6d1   : > { %6566 = vst [vmem:[%s12267_s8 + $0x88] sm:$0xff] %v6541_v60  ;;  %6689 = vst [vmem:[%s12372_s11 + $0x3c0] sm:$0xff] (%p8994_p5), %v6688_v41 }
 0x6d2   : > { %v6444_v49 = vpop.f32.mrb[116].mxu0 }
 0x6d3   : > { %v6517_v13 = vmul.f32 %v6941_v47, %v6444_v49  ;;  %v8398_v31 = vpop.f32.mrb[117].mxu0 }
 0x6d4   : > { %v6447_v55 = vpop.f32.mrb[118].mxu0 }
 0x6d5   : > { %v6542_v57 = vadd.f32 %v6517_v13, %v12176_v15  ;;  %v6518_v9 = vmul.f32 %v6942_v59, %v6447_v55  ;;  %v8399_v16 = vpop.f32.mrb[119].mxu0 }
 0x6d6   : > { %v6690_v51 = vld [vmem:[%s12267_s8 + $0x80] sm:$0xff] (%p8994_p5) }
 0x6d7   : > { %6567 = vst [vmem:[%s12267_s8 + $0x90] sm:$0xff] %v6542_v57  ;;  %v6543_v6 = vadd.f32 %v6518_v9, %v12180_v38  ;;  %6691 = vst [vmem:[%s12372_s11 + $0x400] sm:$0xff] (%p8994_p5), %v6690_v51 }
 0x6d8   : > { %v6692_v37 = vld [vmem:[%s12267_s8 + $0x88] sm:$0xff] (%p8994_p5) }
 0x6d9   : > { %6568 = vst [vmem:[%s12267_s8 + $0x98] sm:$0xff] %v6543_v6  ;;  %6693 = vst [vmem:[%s12372_s11 + $0x440] sm:$0xff] (%p8994_p5), %v6692_v37 }
 0x6da   : > { %v6452_v62 = vpop.f32.mrb[120].mxu0 }
 0x6db   : > { %v6519_v8 = vmul.f32 %v6943_v24, %v6452_v62  ;;  %v8402_v48 = vpop.f32.mrb[121].mxu0 }
 0x6dc   : > { %v6455_v15 = vpop.f32.mrb[122].mxu0 }
 0x6dd   : > { %v6544_v11 = vadd.f32 %v6519_v8, %v12195_v20  ;;  %v6520_v23 = vmul.f32 %v6944_v56, %v6455_v15  ;;  %v8403_v26 = vpop.f32.mrb[123].mxu0 }
 0x6de   : > { %v6694_v22 = vld [vmem:[%s12267_s8 + $0x90] sm:$0xff] (%p8994_p5) }
 0x6df   : > { %6569 = vst [vmem:[%s12267_s8 + $0xa0] sm:$0xff] %v6544_v11  ;;  %v6545_v2 = vadd.f32 %v6520_v23, %v12199_v3  ;;  %6695 = vst [vmem:[%s12372_s11 + $0x480] sm:$0xff] (%p8994_p5), %v6694_v22 }
 0x6e0   : > { %v6696_v19 = vld [vmem:[%s12267_s8 + $0x98] sm:$0xff] (%p8994_p5) }
 0x6e1   : > { %6570 = vst [vmem:[%s12267_s8 + $0xa8] sm:$0xff] %v6545_v2  ;;  %6697 = vst [vmem:[%s12372_s11 + $0x4c0] sm:$0xff] (%p8994_p5), %v6696_v19 }
 0x6e2   : > { %v6460_v38 = vpop.f32.mrb[124].mxu0 }
 0x6e3   : > { %v6521_v63 = vmul.f32 %v6945_v14, %v6460_v38  ;;  %v8406_v39 = vpop.f32.mrb[125].mxu0 }
 0x6e4   : > { %v6463_v20 = vpop.f32.mrb[126].mxu0 }
 0x6e5   : > { %v6546_v0 = vadd.f32 %v6521_v63, %v12211_v12  ;;  %v6522_v29 = vmul.f32 %v6946_v32, %v6463_v20  ;;  %v8407_v40 = vpop.f32.mrb[127].mxu0  ;;  %v6662_v12 = vld [vmem:[%s12267_s8 + $0x10] sm:$0xff] (%p8994_p5) }
 0x6e6   : > { %6663 = vst [vmem:[%s12372_s11 + $0x80] sm:$0xff] (%p8994_p5), %v6662_v12  ;;  %v6698_v1 = vld [vmem:[%s12267_s8 + $0xa0] sm:$0xff] (%p8994_p5) }
 0x6e7   : > { %6571 = vst [vmem:[%s12267_s8 + $0xb0] sm:$0xff] %v6546_v0  ;;  %v6547_v3 = vadd.f32 %v6522_v29, %v12215_v27  ;;  %v6664_v27 = vld [vmem:[%s12267_s8 + $0x18] sm:$0xff] (%p8994_p5)  ;;  %6699 = vst [vmem:[%s12372_s11 + $0x500] sm:$0xff] (%p8994_p5), %v6698_v1 }
 0x6e8   : > { %6665 = vst [vmem:[%s12372_s11 + $0xc0] sm:$0xff] (%p8994_p5), %v6664_v27  ;;  %v6700_v50 = vld [vmem:[%s12267_s8 + $0xa8] sm:$0xff] (%p8994_p5) }
 0x6e9   : > { %6572 = vst [vmem:[%s12267_s8 + $0xb8] sm:$0xff] %v6547_v3  ;;  %6580 = sbr.rel (!%p8994_p5) target bundleno = 1784 (0x6f8), region = 85  ;;  %6701 = vst [vmem:[%s12372_s11 + $0x540] sm:$0xff] (%p8994_p5), %v6700_v50 }
 0x6ea   : > { %v6468_v36 = vpop.f32.mrb[128].mxu0 }
 0x6eb   : > { %v6523_v52 = vmul.f32 %v6947_v44, %v6468_v36  ;;  %v8410_v46 = vpop.f32.mrb[129].mxu0 }
 0x6ec   : > { %v6471_v7 = vpop.f32.mrb[130].mxu0 }
 0x6ed   : > { %v6548_v34 = vadd.f32 %v6523_v52, %v12222_v43  ;;  %v8411_v61 = vpop.f32.mrb[131].mxu0  ;;  %v6666_v43 = vld [vmem:[%s12267_s8 + $0x20] sm:$0xff] (%p8994_p5) }
 0x6ee   : > { %6667 = vst [vmem:[%s12372_s11 + $0x100] sm:$0xff] (%p8994_p5), %v6666_v43  ;;  %v6702_v28 = vld [vmem:[%s12267_s8 + $0xb0] sm:$0xff] (%p8994_p5) }
 0x6ef   : > { %6573 = vst [vmem:[%s12267_s8 + $0xc0] sm:$0xf] %v6548_v34  ;;  %6703 = vst [vmem:[%s12372_s11 + $0x580] sm:$0xff] (%p8994_p5), %v6702_v28 }
 0x6f0   : > { %v6704_v30 = vld [vmem:[%s12267_s8 + $0xb8] sm:$0xff] }
 0x6f1   : > { %6705 = vst [vmem:[%s12372_s11 + $0x5c0] sm:$0xff] %v6704_v30 }
 0x6f6   : > { %v6706_v17 = vld [vmem:[%s12267_s8 + $0xc0] sm:$0xff] }
 0x6f7   : > { %6707 = vst [vmem:[%s12372_s11 + $0x600] sm:$0xff] %v6706_v17 }
 0x6f8 PF: > { %p12_p12 = scmp.ge.s32.totalorder %s8982_s22, 10   ;;  %s12570_s18 = smov %s8924_s19 }
 0x6f9   : > { %s12571_s19 = smov %s8992_s25  ;;  %s12572_s20 = smov %s8982_s22 }
 0x6fa   :  { %14 = sbr.rel (!%p12_p12) target bundleno = 2 (0x2), region = 171 }

</bundles_post_ra>
